<compile_context>
chip_gen: v7x
topology: tpu7x:2x2x1
jax: 0.10.0
libtpu: 0.0.40
codegen_flags: <defaults>
</compile_context>

<pallas_src>
import functools

import jax
import jax.numpy as jnp
import numpy as np
from jax.experimental import pallas as pl
from jax.experimental.pallas import tpu as pltpu

LN_EPS = 1e-5
VMEM_LIMIT = 32 * 1024 * 1024


# ---------------------------------------------------------------------------
# Pallas kernel 1: all five convolutions in one call.
# ---------------------------------------------------------------------------
def _fused_conv_kernel(xq_ref, mq_ref, wq_ref, bq_ref,
                       xk_ref, mk_ref, wk_ref, bk_ref,
                       wv_ref, bv_ref, q3_ref, k3_ref, v_ref,
                       *, q_grid_w, k_grid_w, q_pad, k_pad, cr):
    rq = q3_ref.shape[1]
    rk = k3_ref.shape[1]

    def shifted_slab(x_ref, m_ref, grid_w, pad, rows):
        # rows of x_ref are (b, y, x); zero rows pad both ends so every shifted
        # window is a static in-bounds slice; per-tap mask kills x-wrap and
        # inter-batch rows.  No O(R^2) selection matmuls.
        parts = []
        for tap in range(9):                       # static unrolled 3x3 taps
            dy, dx = divmod(tap, 3)
            off = (dy - 1) * grid_w + (dx - 1)
            win = x_ref[pad + off:pad + off + rows, :]     # [rows, C] bf16
            parts.append(win * m_ref[tap])                 # boundary mask
        return jnp.concatenate(parts, axis=-1)             # [rows, 9*C] bf16

    sq = shifted_slab(xq_ref, mq_ref, q_grid_w, q_pad, rq)
    sk = shifted_slab(xk_ref, mk_ref, k_grid_w, k_pad, rk)

    # one large-K (K = 9*C) bf16 matmul per side, f32 accumulation
    oq = jnp.dot(sq, wq_ref[...], preferred_element_type=jnp.float32) + bq_ref[...]
    ok = jnp.dot(sk, wk_ref[...], preferred_element_type=jnp.float32) + bk_ref[...]
    # 1x1 v conv on the un-shifted rows (centre window is the identity shift)
    xk_c = xk_ref[k_pad:k_pad + rk, :]
    ov = jnp.dot(xk_c, wv_ref[...], preferred_element_type=jnp.float32) + bv_ref[...]

    # branch-major bf16 outputs so kernel 2 selects its branch via BlockSpec
    # (no XLA transpose between the two pallas_calls).
    q3_ref[0] = oq[:, :cr].astype(q3_ref.dtype)
    q3_ref[1] = oq[:, cr:].astype(q3_ref.dtype)
    k3_ref[0] = ok[:, :cr].astype(k3_ref.dtype)
    k3_ref[1] = ok[:, cr:].astype(k3_ref.dtype)
    v_ref[...] = ov.astype(v_ref.dtype)


def fused_convs(xq_pad, mq, wq, bq, xk_pad, mk, wk, bk, wv, bv, *,
                q_grid_w, k_grid_w, q_pad, k_pad, cr):
    rq = mq.shape[1]
    rk = mk.shape[1]
    c = wv.shape[0]
    kernel = functools.partial(_fused_conv_kernel, q_grid_w=q_grid_w,
                               k_grid_w=k_grid_w, q_pad=q_pad, k_pad=k_pad, cr=cr)
    return pl.pallas_call(
        kernel,
        out_shape=(jax.ShapeDtypeStruct((2, rq, cr), jnp.bfloat16),
                   jax.ShapeDtypeStruct((2, rk, cr), jnp.bfloat16),
                   jax.ShapeDtypeStruct((rk, c), jnp.bfloat16)),
        grid=(1,),
        in_specs=[
            pl.BlockSpec(xq_pad.shape, lambda i: (0, 0)),
            pl.BlockSpec(mq.shape, lambda i: (0, 0, 0)),
            pl.BlockSpec(wq.shape, lambda i: (0, 0)),
            pl.BlockSpec(bq.shape, lambda i: (0, 0)),
            pl.BlockSpec(xk_pad.shape, lambda i: (0, 0)),
            pl.BlockSpec(mk.shape, lambda i: (0, 0, 0)),
            pl.BlockSpec(wk.shape, lambda i: (0, 0)),
            pl.BlockSpec(bk.shape, lambda i: (0, 0)),
            pl.BlockSpec(wv.shape, lambda i: (0, 0)),
            pl.BlockSpec(bv.shape, lambda i: (0, 0)),
        ],
        out_specs=(pl.BlockSpec((2, rq, cr), lambda i: (0, 0, 0)),
                   pl.BlockSpec((2, rk, cr), lambda i: (0, 0, 0)),
                   pl.BlockSpec((rk, c), lambda i: (0, 0))),
        compiler_params=pltpu.CompilerParams(
            dimension_semantics=("arbitrary",),
            vmem_limit_bytes=VMEM_LIMIT),
    )(xq_pad, mq, wq, bq, xk_pad, mk, wk, bk, wv, bv)


# ---------------------------------------------------------------------------
# Pallas kernel 2: one fused branch (attention + out-proj + LN + FFN + LN);
# grid=(2,) runs the sem/geo branches as a parallel axis.
# ---------------------------------------------------------------------------
def _branch_kernel(q_ref, k_ref, v_ref, view_ref, wo_ref, bo_ref,
                   g1_ref, be1_ref, w1_ref, bb1_ref, w2_ref, bb2_ref,
                   g2_ref, be2_ref, out_ref, attn_ref, *, num_heads, batch):
    n, B = num_heads, batch
    Rq, Cr = q_ref.shape[1], q_ref.shape[2]
    Rk, C = v_ref.shape
    Lq, Lk = Rq // B, Rk // B
    d, dv = Cr // n, C // n

    # leading-dim splits only (layout-free when Lq/Lk are multiples of 8)
    q = q_ref[0].reshape(B, Lq, Cr)         # bf16, q scaling folded in the conv
    k = k_ref[0].reshape(B, Lk, Cr)         # bf16
    v = v_ref[...].reshape(B, Lk, C)        # bf16

    # --- attention per head, batched over B (bf16 MXU, f32 accumulation) ---
    heads = []
    for hh in range(n):
        qh = q[:, :, hh * d:(hh + 1) * d]
        kh = k[:, :, hh * d:(hh + 1) * d]
        vh = v[:, :, hh * dv:(hh + 1) * dv]
        s = jnp.einsum("bqd,bkd->bqk", qh, kh, preferred_element_type=jnp.float32)
        s = s - jnp.max(s, axis=-1, keepdims=True)
        e = jnp.exp(s)
        # approx reciprocal -> rows of the stored attention sum to 1 +- ~1e-3,
        # below the bf16 storage precision of the attn output anyway.
        p = e * pl.reciprocal(jnp.sum(e, axis=-1, keepdims=True), approx=True)
        for b in range(B):
            attn_ref[0, b, hh] = p[b].astype(attn_ref.dtype)
        heads.append(jnp.einsum("bqk,bkd->bqd", p.astype(jnp.bfloat16), vh,
                                preferred_element_type=jnp.float32))

    # --- head merge + out-projection as ONE matmul (no VMEM scratch loop) ---
    r = jnp.concatenate(heads, axis=-1).reshape(Rq, C)      # f32, channel=(head,dv)
    proj = jnp.dot(r.astype(jnp.bfloat16), wo_ref[0],
                   preferred_element_type=jnp.float32) + bo_ref[0]

    # --- residual + LayerNorm (sem/geo), f32 ---
    t = view_ref[...] + proj
    mu = jnp.mean(t, axis=-1, keepdims=True)
    c = t - mu
    var = jnp.mean(c * c, axis=-1, keepdims=True)
    t = c * jax.lax.rsqrt(var + LN_EPS) * g1_ref[0] + be1_ref[0]

    # --- FFN + residual + LayerNorm ---
    h1 = jnp.dot(t.astype(jnp.bfloat16), w1_ref[0],
                 preferred_element_type=jnp.float32) + bb1_ref[0]
    h1 = jnp.maximum(h1, 0.0)
    y = jnp.dot(h1.astype(jnp.bfloat16), w2_ref[0],
                preferred_element_type=jnp.float32) + bb2_ref[0]
    t2 = t + y
    mu2 = jnp.mean(t2, axis=-1, keepdims=True)
    c2 = t2 - mu2
    var2 = jnp.mean(c2 * c2, axis=-1, keepdims=True)
    out_ref[0] = (c2 * jax.lax.rsqrt(var2 + LN_EPS) * g2_ref[0]
                  + be2_ref[0]).astype(out_ref.dtype)


def fused_branches(q3, k3, v, view_rows, wo, bo, g1, be1,
                   w1, bb1, w2, bb2, g2, be2, *, num_heads, batch):
    _, Rq, Cr = q3.shape
    Rk = k3.shape[1]
    C = v.shape[1]
    Hd = w1.shape[-1]
    Lq, Lk = Rq // batch, Rk // batch
    kernel = functools.partial(_branch_kernel, num_heads=num_heads, batch=batch)
    return pl.pallas_call(
        kernel,
        out_shape=(jax.ShapeDtypeStruct((2, Rq, C), jnp.float32),
                   jax.ShapeDtypeStruct((2, batch, num_heads, Lq, Lk), jnp.bfloat16)),
        grid=(2,),
        in_specs=[
            pl.BlockSpec((1, Rq, Cr), lambda b: (b, 0, 0)),
            pl.BlockSpec((1, Rk, Cr), lambda b: (b, 0, 0)),
            pl.BlockSpec((Rk, C), lambda b: (0, 0)),              # shared v
            pl.BlockSpec((Rq, C), lambda b: (0, 0)),              # shared view
            pl.BlockSpec((1, C, C), lambda b: (b, 0, 0)),
            pl.BlockSpec((1, 1, C), lambda b: (b, 0, 0)),
            pl.BlockSpec((1, 1, C), lambda b: (b, 0, 0)),
            pl.BlockSpec((1, 1, C), lambda b: (b, 0, 0)),
            pl.BlockSpec((1, C, Hd), lambda b: (b, 0, 0)),
            pl.BlockSpec((1, 1, Hd), lambda b: (b, 0, 0)),
            pl.BlockSpec((1, Hd, C), lambda b: (b, 0, 0)),
            pl.BlockSpec((1, 1, C), lambda b: (b, 0, 0)),
            pl.BlockSpec((1, 1, C), lambda b: (b, 0, 0)),
            pl.BlockSpec((1, 1, C), lambda b: (b, 0, 0)),
        ],
        out_specs=(pl.BlockSpec((1, Rq, C), lambda b: (b, 0, 0)),
                   pl.BlockSpec((1, batch, num_heads, Lq, Lk),
                                lambda b: (b, 0, 0, 0, 0))),
        compiler_params=pltpu.CompilerParams(
            dimension_semantics=("parallel",),
            vmem_limit_bytes=VMEM_LIMIT),
    )(q3, k3, v, view_rows, wo, bo, g1, be1, w1, bb1, w2, bb2, g2, be2)


# ---------------------------------------------------------------------------
# Plain-JAX glue (all tiny / trace-time)
# ---------------------------------------------------------------------------
def _pool_rows(x, block_res):
    """NCHW avg-pool to block_res and flatten to rows [(b, y, x), C]."""
    B, C, H, W = x.shape
    bh, bw = block_res
    kh, kw = H // bh, W // bw
    p = x.reshape(B, C, bh, kh, bw, kw).mean(axis=(3, 5))        # [B, C, bh, bw]
    return p.transpose(0, 2, 3, 1).reshape(B * bh * bw, C)


def _pos_rows(row_w, col_w, batch):
    """PositionEmbeddingLearned as rows [(b, y, x), 2*npf]."""
    h, npf = row_w.shape
    w = col_w.shape[0]
    x_emb = jnp.broadcast_to(col_w[None, :, :], (h, w, npf))
    y_emb = jnp.broadcast_to(row_w[:, None, :], (h, w, npf))
    p = jnp.concatenate([x_emb, y_emb], axis=-1).reshape(h * w, 2 * npf)
    return jnp.tile(p, (batch, 1))


def _conv_taps(w):
    """torch conv weight [Cout, Cin, 3, 3] -> [9(tap=kh*3+kw), Cin, Cout]."""
    cout, cin = w.shape[0], w.shape[1]
    return jnp.transpose(w, (2, 3, 1, 0)).reshape(9, cin, cout)


def _tap_masks(batch, h, w):
    """Per-tap [9, B*h*w, 1] 0/1 masks: 1 where the shifted source pixel of a
    3x3/pad-1 conv lies inside the image (handles x-wrap and inter-batch rows).
    O(R) host memory, unlike the old [9, R, R] selection matrices."""
    ys, xs = np.meshgrid(np.arange(h), np.arange(w), indexing="ij")
    m = np.zeros((9, batch * h * w, 1), np.float32)
    for tap in range(9):
        dy, dx = divmod(tap, 3)
        ok = ((ys + dy - 1 >= 0) & (ys + dy - 1 < h) &
              (xs + dx - 1 >= 0) & (xs + dx - 1 < w))
        m[tap, :, 0] = np.tile(ok.reshape(-1).astype(np.float32), batch)
    return jnp.asarray(m, dtype=jnp.bfloat16)


# ---------------------------------------------------------------------------
# Full forward pass of Cross_Attention_Douple
# ---------------------------------------------------------------------------
def cross_attention_douple_forward(params, bev_feat_map, rv_feat_map,
                                   num_heads, bev_block_res, rv_block_res):
    B, C, H1, W1 = bev_feat_map.shape
    hb, wb = bev_block_res
    hr, wr = rv_block_res
    bev_kernel = (H1 // hb, W1 // wb)
    Lq, Lk = hb * wb, hr * wr
    Cr = params["q_sem_w"].shape[0]
    n = num_heads
    d = Cr // n
    Hd = params["ffn_sem"]["w1"].shape[1]

    # --- block features; `view` is the bev block BEFORE the in-place pos add ---
    bev_rows = _pool_rows(bev_feat_map, bev_block_res)           # [B*Lq, C] f32
    rv_rows = _pool_rows(rv_feat_map, rv_block_res)              # [B*Lk, C] f32
    q_in = bev_rows + _pos_rows(params["bev_pos_row"], params["bev_pos_col"], B)
    # key and value alias the same tensor -> v conv sees key + k_pos_emb.
    k_in = rv_rows + _pos_rows(params["rv_pos_row"], params["rv_pos_col"], B)

    # zero-pad rows so every 3x3 shift is a static in-bounds slice; bf16 inputs.
    pq, pk = wb + 1, wr + 1
    xq_pad = jnp.pad(q_in, ((pq, pq), (0, 0))).astype(jnp.bfloat16)
    xk_pad = jnp.pad(k_in, ((pk, pk), (0, 0))).astype(jnp.bfloat16)
    mq = _tap_masks(B, hb, wb)
    mk = _tap_masks(B, hr, wr)

    # --- stacked conv weights; query scaling folded into q weights/bias ---
    scaling = float(d) ** -0.5
    wq_slab = (jnp.concatenate([_conv_taps(params["q_sem_w"]),
                                _conv_taps(params["q_geo_w"])], axis=-1)
               * scaling).reshape(9 * C, 2 * Cr).astype(jnp.bfloat16)
    bq = (jnp.concatenate([params["q_sem_b"], params["q_geo_b"]]) * scaling
          ).reshape(1, 2 * Cr)
    wk_slab = jnp.concatenate([_conv_taps(params["k_sem_w"]),
                               _conv_taps(params["k_geo_w"])], axis=-1
                              ).reshape(9 * C, 2 * Cr).astype(jnp.bfloat16)
    bk = jnp.concatenate([params["k_sem_b"], params["k_geo_b"]]).reshape(1, 2 * Cr)
    wv = params["v_w"].astype(jnp.bfloat16)
    bv = params["v_b"].reshape(1, C)

    q3, k3, v = fused_convs(xq_pad, mq, wq_slab, bq, xk_pad, mk, wk_slab, bk, wv, bv,
                            q_grid_w=wb, k_grid_w=wr, q_pad=pq, k_pad=pk, cr=Cr)

    # --- stacked per-branch weights (sem = 0, geo = 1); matmul weights in bf16 ---
    wo = jnp.stack([params["out_sem_w"], params["out_geo_w"]]).astype(jnp.bfloat16)
    bo = jnp.stack([params["out_sem_b"], params["out_geo_b"]]).reshape(2, 1, C)
    g1 = jnp.stack([params["sem_ln_g"], params["geo_ln_g"]]).reshape(2, 1, C)
    be1 = jnp.stack([params["sem_ln_b"], params["geo_ln_b"]]).reshape(2, 1, C)
    fs, fg = params["ffn_sem"], params["ffn_geo"]
    w1 = jnp.stack([fs["w1"], fg["w1"]]).astype(jnp.bfloat16)
    bb1 = jnp.stack([fs["b1"], fg["b1"]]).reshape(2, 1, Hd)
    w2 = jnp.stack([fs["w2"], fg["w2"]]).astype(jnp.bfloat16)
    bb2 = jnp.stack([fs["b2"], fg["b2"]]).reshape(2, 1, C)
    g2 = jnp.stack([fs["gamma"], fg["gamma"]]).reshape(2, 1, C)
    be2 = jnp.stack([fs["beta"], fg["beta"]]).reshape(2, 1, C)

    out_rows, attn5 = fused_branches(q3, k3, v, bev_rows, wo, bo, g1, be1,
                                     w1, bb1, w2, bb2, g2, be2,
                                     num_heads=n, batch=B)

    # [2, B, n, Lq, Lk] -> [2, (b n), Lq, Lk] is a free adjacent-dim merge.
    attn = attn5.reshape(2, B * n, Lq, Lk)

    # --- nearest-neighbour back-projection + residual on the full-res map ---
    outs = []
    for br in range(2):
        blk = out_rows[br].reshape(B, hb, wb, C).transpose(0, 3, 1, 2)
        up = jnp.repeat(jnp.repeat(blk, bev_kernel[0], axis=2), bev_kernel[1], axis=3)
        outs.append(bev_feat_map + up)
    return (outs[0], outs[1]), (attn[0], attn[1])


# ---------------------------------------------------------------------------
# Pure-JAX reference (for a loose numerical self-check in __main__)
# ---------------------------------------------------------------------------
def _reference_forward(params, bev, rv, num_heads, bev_block_res, rv_block_res):
    B, C, H1, W1 = bev.shape
    H2, W2 = rv.shape[2], rv.shape[3]
    hb, wb = bev_block_res
    hr, wr = rv_block_res
    kb = (H1 // hb, W1 // wb)
    kr = (H2 // hr, W2 // wr)
    bev_blk = bev.reshape(B, C, hb, kb[0], wb, kb[1]).mean(axis=(3, 5))
    rv_blk = rv.reshape(B, C, hr, kr[0], wr, kr[1]).mean(axis=(3, 5))

    def pos_nchw(row_w, col_w):
        h, npf = row_w.shape
        w = col_w.shape[0]
        x_emb = jnp.broadcast_to(col_w[None, :, :], (h, w, npf))
        y_emb = jnp.broadcast_to(row_w[:, None, :], (h, w, npf))
        return jnp.concatenate([x_emb, y_emb], -1).transpose(2, 0, 1)[None]

    view = bev_blk
    q_in = bev_blk + pos_nchw(params["bev_pos_row"], params["bev_pos_col"])
    k_in = rv_blk + pos_nchw(params["rv_pos_row"], params["rv_pos_col"])

    def conv3(x, w, b):
        y = jax.lax.conv_general_dilated(x, w, (1, 1), ((1, 1), (1, 1)),
                                         dimension_numbers=("NCHW", "OIHW", "NCHW"))
        return y + b[None, :, None, None]

    q_sem = conv3(q_in, params["q_sem_w"], params["q_sem_b"])
    q_geo = conv3(q_in, params["q_geo_w"], params["q_geo_b"])
    k_sem = conv3(k_in, params["k_sem_w"], params["k_sem_b"])
    k_geo = conv3(k_in, params["k_geo_w"], params["k_geo_b"])
    v = jnp.einsum("bchw,cd->bdhw", k_in, params["v_w"]) + params["v_b"][None, :, None, None]

    Cr = q_sem.shape[1]
    n = num_heads
    d = Cr // n
    dv = C // n
    scale = float(d) ** -0.5
    Lq = hb * wb

    def heads(x, hd):
        b, c, h, w = x.shape
        return x.reshape(b, n, hd, h * w).transpose(0, 1, 3, 2).reshape(b * n, h * w, hd)

    def ln(x, g, bta):
        m = x.mean(-1, keepdims=True)
        cc = x - m
        vv = (cc * cc).mean(-1, keepdims=True)
        return cc * jax.lax.rsqrt(vv + LN_EPS) * g + bta

    view_rows = view.reshape(B, C, Lq).transpose(0, 2, 1)
    outs, attns = [], []
    branches = [
        (q_sem, k_sem, params["out_sem_w"], params["out_sem_b"],
         params["sem_ln_g"], params["sem_ln_b"], params["ffn_sem"]),
        (q_geo, k_geo, params["out_geo_w"], params["out_geo_b"],
         params["geo_ln_g"], params["geo_ln_b"], params["ffn_geo"]),
    ]
    for qc, kc, ow, ob, g, bta, ffn in branches:
        qh = heads(qc * scale, d)
        kh = heads(kc, d)
        vh = heads(v, dv)
        p = jax.nn.softmax(jnp.einsum("bqd,bkd->bqk", qh, kh), axis=-1)
        attns.append(p)
        r = jnp.einsum("bqk,bkd->bqd", p, vh)
        r = r.reshape(B, n, Lq, dv).transpose(0, 2, 1, 3).reshape(B, Lq, C)
        t = ln(view_rows + r @ ow + ob, g, bta)
        h1 = jnp.maximum(t @ ffn["w1"] + ffn["b1"], 0.0)
        t2 = ln(t + h1 @ ffn["w2"] + ffn["b2"], ffn["gamma"], ffn["beta"])
        blk = t2.transpose(0, 2, 1).reshape(B, C, hb, wb)
        up = jnp.repeat(jnp.repeat(blk, kb[0], axis=2), kb[1], axis=3)
        outs.append(bev + up)
    return (outs[0], outs[1]), (attns[0], attns[1])


# ---------------------------------------------------------------------------
# Deterministic synthetic parameters (mirrors the module __init__ shapes)
# ---------------------------------------------------------------------------
def init_params(key, embed_dim, hidden, bev_block_res, rv_block_res):
    C = embed_dim
    Cr = C // 2                  # reduction_ratio = 2
    npf = C // 2                 # pos-embedding feats per axis
    keys = iter(jax.random.split(key, 32))

    def rnd(shape, scale=0.05):
        return (scale * jax.random.normal(next(keys), shape)).astype(jnp.float32)

    def ffn():
        return {"w1": rnd((C, hidden)), "b1": rnd((hidden,), 0.01),
                "w2": rnd((hidden, C)), "b2": rnd((C,), 0.01),
                "gamma": jnp.ones((C,), jnp.float32),
                "beta": jnp.zeros((C,), jnp.float32)}

    return {
        "q_sem_w": rnd((Cr, C, 3, 3)), "q_sem_b": rnd((Cr,), 0.01),
        "q_geo_w": rnd((Cr, C, 3, 3)), "q_geo_b": rnd((Cr,), 0.01),
        "k_sem_w": rnd((Cr, C, 3, 3)), "k_sem_b": rnd((Cr,), 0.01),
        "k_geo_w": rnd((Cr, C, 3, 3)), "k_geo_b": rnd((Cr,), 0.01),
        "v_w": rnd((C, C)), "v_b": rnd((C,), 0.01),
        "out_sem_w": rnd((C, C)), "out_sem_b": rnd((C,), 0.01),
        "out_geo_w": rnd((C, C)), "out_geo_b": rnd((C,), 0.01),
        "sem_ln_g": jnp.ones((C,), jnp.float32), "sem_ln_b": jnp.zeros((C,), jnp.float32),
        "geo_ln_g": jnp.ones((C,), jnp.float32), "geo_ln_b": jnp.zeros((C,), jnp.float32),
        "ffn_sem": ffn(), "ffn_geo": ffn(),
        "bev_pos_row": jax.random.uniform(next(keys), (bev_block_res[0], npf), jnp.float32),
        "bev_pos_col": jax.random.uniform(next(keys), (bev_block_res[1], npf), jnp.float32),
        "rv_pos_row": jax.random.uniform(next(keys), (rv_block_res[0], npf), jnp.float32),
        "rv_pos_col": jax.random.uniform(next(keys), (rv_block_res[1], npf), jnp.float32),
    }


# ---------------------------------------------------------------------------
if __name__ == "__main__":
    B, C = 2, 32
    num_heads = 2
    bev_size, rv_size = (16, 16), (16, 16)
    bev_block_res, rv_block_res = (4, 4), (4, 4)
    hidden = 64

    root = jax.random.PRNGKey(0)
    pkey, k1, k2 = jax.random.split(root, 3)
    params = init_params(pkey, C, hidden, bev_block_res, rv_block_res)
    bev_feat = jax.random.normal(k1, (B, C, *bev_size), jnp.float32)
    rv_feat = jax.random.normal(k2, (B, C, *rv_size), jnp.float32)

    fwd = jax.jit(functools.partial(cross_attention_douple_forward,
                                    num_heads=num_heads,
                                    bev_block_res=bev_block_res,
                                    rv_block_res=rv_block_res))
    (out_sem, out_geo), (attn_sem, attn_geo) = fwd(params, bev_feat, rv_feat)
    jax.block_until_ready((out_sem, out_geo, attn_sem, attn_geo))

    assert out_sem.shape == (B, C, *bev_size) and out_geo.shape == (B, C, *bev_size)
    assert attn_sem.shape == (B * num_heads, 16, 16)
    assert attn_geo.shape == (B * num_heads, 16, 16)
    assert bool(jnp.all(jnp.isfinite(out_sem))) and bool(jnp.all(jnp.isfinite(out_geo)))

    # loose numerical self-check against a pure-JAX f32 reference (tolerances
    # cover bf16 MXU operands, bf16 attn storage and the approx-reciprocal
    # softmax).
    (ref_sem, ref_geo), (ref_as, ref_ag) = _reference_forward(
        params, bev_feat, rv_feat, num_heads, bev_block_res, rv_block_res)
    for name, got, want in [("out_sem", out_sem, ref_sem), ("out_geo", out_geo, ref_geo),
                            ("attn_sem", attn_sem, ref_as), ("attn_geo", attn_geo, ref_ag)]:
        err = float(jnp.max(jnp.abs(got.astype(jnp.float32) - want)))
        assert bool(jnp.allclose(got.astype(jnp.float32), want,
                                 rtol=5e-2, atol=7e-2)), f"{name} max err {err}"

    print("KERNEL_OK")
</pallas_src>

<mosaic_0001>
module attributes {stable_mosaic.version = 11 : i64} {
  func.func @_branch_kernel(%arg0: i32, %arg1: memref<1x32x16xbf16, #tpu.memory_space<vmem>>, %arg2: memref<1x32x16xbf16, #tpu.memory_space<vmem>>, %arg3: memref<32x32xbf16, #tpu.memory_space<vmem>>, %arg4: memref<32x32xf32, #tpu.memory_space<vmem>>, %arg5: memref<1x32x32xbf16, #tpu.memory_space<vmem>>, %arg6: memref<1x1x32xf32, #tpu.memory_space<vmem>>, %arg7: memref<1x1x32xf32, #tpu.memory_space<vmem>>, %arg8: memref<1x1x32xf32, #tpu.memory_space<vmem>>, %arg9: memref<1x32x64xbf16, #tpu.memory_space<vmem>>, %arg10: memref<1x1x64xf32, #tpu.memory_space<vmem>>, %arg11: memref<1x64x32xbf16, #tpu.memory_space<vmem>>, %arg12: memref<1x1x32xf32, #tpu.memory_space<vmem>>, %arg13: memref<1x1x32xf32, #tpu.memory_space<vmem>>, %arg14: memref<1x1x32xf32, #tpu.memory_space<vmem>>, %arg15: memref<1x32x32xf32, #tpu.memory_space<vmem>>, %arg16: memref<1x2x2x16x16xbf16, #tpu.memory_space<vmem>>) attributes {dimension_semantics = [#tpu.dimension_semantics<parallel>], iteration_bounds = array<i64: 2>, scalar_prefetch = 0 : i64, scratch_operands = 0 : i64, tpu.core_type = #tpu.core_type<tc>, window_params = [{transform_indices = @transform_0, window_bounds = array<i64: 1, 32, 16>}, {transform_indices = @transform_1, window_bounds = array<i64: 1, 32, 16>}, {pipeline_mode = #tpu.pipeline_mode<synchronous>, transform_indices = @transform_2, window_bounds = array<i64: 32, 32>}, {pipeline_mode = #tpu.pipeline_mode<synchronous>, transform_indices = @transform_3, window_bounds = array<i64: 32, 32>}, {transform_indices = @transform_4, window_bounds = array<i64: 1, 32, 32>}, {transform_indices = @transform_5, window_bounds = array<i64: 1, 1, 32>}, {transform_indices = @transform_6, window_bounds = array<i64: 1, 1, 32>}, {transform_indices = @transform_7, window_bounds = array<i64: 1, 1, 32>}, {transform_indices = @transform_8, window_bounds = array<i64: 1, 32, 64>}, {transform_indices = @transform_9, window_bounds = array<i64: 1, 1, 64>}, {transform_indices = @transform_10, window_bounds = array<i64: 1, 64, 32>}, {transform_indices = @transform_11, window_bounds = array<i64: 1, 1, 32>}, {transform_indices = @transform_12, window_bounds = array<i64: 1, 1, 32>}, {transform_indices = @transform_13, window_bounds = array<i64: 1, 1, 32>}, {transform_indices = @transform_14, window_bounds = array<i64: 1, 32, 32>}, {transform_indices = @transform_15, window_bounds = array<i64: 1, 2, 2, 16, 16>}]} {
    %c0 = arith.constant 0 : index
    %c0_0 = arith.constant 0 : index
    %c0_1 = arith.constant 0 : index
    %0 = vector.load %arg1[%c0, %c0_0, %c0_1] : memref<1x32x16xbf16, #tpu.memory_space<vmem>>, vector<1x32x16xbf16>
    %1 = vector.shape_cast %0 : vector<1x32x16xbf16> to vector<32x16xbf16>
    %2 = vector.shape_cast %1 : vector<32x16xbf16> to vector<2x16x16xbf16>
    %c0_2 = arith.constant 0 : index
    %c0_3 = arith.constant 0 : index
    %c0_4 = arith.constant 0 : index
    %3 = vector.load %arg2[%c0_2, %c0_3, %c0_4] : memref<1x32x16xbf16, #tpu.memory_space<vmem>>, vector<1x32x16xbf16>
    %4 = vector.shape_cast %3 : vector<1x32x16xbf16> to vector<32x16xbf16>
    %5 = vector.shape_cast %4 : vector<32x16xbf16> to vector<2x16x16xbf16>
    %c0_5 = arith.constant 0 : index
    %c0_6 = arith.constant 0 : index
    %6 = vector.load %arg3[%c0_5, %c0_6] : memref<32x32xbf16, #tpu.memory_space<vmem>>, vector<32x32xbf16>
    %7 = vector.shape_cast %6 : vector<32x32xbf16> to vector<2x16x32xbf16>
    %8 = vector.extract_strided_slice %2 {offsets = [0, 0, 0], sizes = [2, 16, 8], strides = [1, 1, 1]} : vector<2x16x16xbf16> to vector<2x16x8xbf16>
    %9 = vector.extract_strided_slice %5 {offsets = [0, 0, 0], sizes = [2, 16, 8], strides = [1, 1, 1]} : vector<2x16x16xbf16> to vector<2x16x8xbf16>
    %10 = vector.extract_strided_slice %7 {offsets = [0, 0, 0], sizes = [2, 16, 16], strides = [1, 1, 1]} : vector<2x16x32xbf16> to vector<2x16x16xbf16>
    "tpu.trace_start"() <{level = 10 : i32, message = "bqd,bkd->bqk"}> : () -> ()
    %cst = arith.constant dense<0.000000e+00> : vector<2x16x16xf32>
    %11 = tpu.matmul %8, %9, %cst {dimension_numbers = #tpu.dot_dimension_numbers<[2], [2], [1], [1], [0, 0, 0, 1, 1, 1], [0], [0]>} : vector<2x16x8xbf16>, vector<2x16x8xbf16>, vector<2x16x16xf32> -> vector<2x16x16xf32>
    "tpu.trace_stop"() : () -> ()
    %cst_7 = arith.constant dense<0xFF800000> : vector<2x16xf32>
    %12 = vector.multi_reduction <maximumf>, %11, %cst_7 [2] : vector<2x16x16xf32> to vector<2x16xf32>
    %13 = vector.shape_cast %12 : vector<2x16xf32> to vector<2x16x1xf32>
    %14 = vector.broadcast %13 : vector<2x16x1xf32> to vector<2x16x16xf32>
    %15 = arith.subf %11, %14 : vector<2x16x16xf32>
    %16 = math.exp %15 : vector<2x16x16xf32>
    %cst_8 = arith.constant dense<0.000000e+00> : vector<2x16xf32>
    %17 = vector.multi_reduction <add>, %16, %cst_8 [2] : vector<2x16x16xf32> to vector<2x16xf32>
    %18 = vector.shape_cast %17 : vector<2x16xf32> to vector<2x16x1xf32>
    %19 = tpu.reciprocal %18 {approx = true} : vector<2x16x1xf32> -> vector<2x16x1xf32>
    %20 = vector.broadcast %19 : vector<2x16x1xf32> to vector<2x16x16xf32>
    %21 = arith.mulf %16, %20 : vector<2x16x16xf32>
    %22 = vector.extract_strided_slice %21 {offsets = [0, 0, 0], sizes = [1, 16, 16], strides = [1, 1, 1]} : vector<2x16x16xf32> to vector<1x16x16xf32>
    %23 = vector.shape_cast %22 : vector<1x16x16xf32> to vector<16x16xf32>
    %24 = arith.truncf %23 : vector<16x16xf32> to vector<16x16xbf16>
    %c0_9 = arith.constant 0 : index
    %c0_10 = arith.constant 0 : index
    %c0_11 = arith.constant 0 : index
    %c0_12 = arith.constant 0 : index
    %c0_13 = arith.constant 0 : index
    %25 = vector.load %arg16[%c0_9, %c0_10, %c0_11, %c0_12, %c0_13] : memref<1x2x2x16x16xbf16, #tpu.memory_space<vmem>>, vector<1x1x1x16x16xbf16>
    %26 = vector.shape_cast %25 : vector<1x1x1x16x16xbf16> to vector<16x16xbf16>
    %27 = vector.shape_cast %24 : vector<16x16xbf16> to vector<1x1x1x16x16xbf16>
    tpu.vector_store %arg16[%c0_9, %c0_10, %c0_11, %c0_12, %c0_13], %27 {strides = array<i32>} : memref<1x2x2x16x16xbf16, #tpu.memory_space<vmem>>, vector<1x1x1x16x16xbf16>,
    %28 = vector.extract_strided_slice %21 {offsets = [1, 0, 0], sizes = [1, 16, 16], strides = [1, 1, 1]} : vector<2x16x16xf32> to vector<1x16x16xf32>
    %29 = vector.shape_cast %28 : vector<1x16x16xf32> to vector<16x16xf32>
    %30 = arith.truncf %29 : vector<16x16xf32> to vector<16x16xbf16>
    %c0_14 = arith.constant 0 : index
    %c1 = arith.constant 1 : index
    %c0_15 = arith.constant 0 : index
    %c0_16 = arith.constant 0 : index
    %c0_17 = arith.constant 0 : index
    %31 = vector.load %arg16[%c0_14, %c1, %c0_15, %c0_16, %c0_17] : memref<1x2x2x16x16xbf16, #tpu.memory_space<vmem>>, vector<1x1x1x16x16xbf16>
    %32 = vector.shape_cast %31 : vector<1x1x1x16x16xbf16> to vector<16x16xbf16>
    %33 = vector.shape_cast %30 : vector<16x16xbf16> to vector<1x1x1x16x16xbf16>
    tpu.vector_store %arg16[%c0_14, %c1, %c0_15, %c0_16, %c0_17], %33 {strides = array<i32>} : memref<1x2x2x16x16xbf16, #tpu.memory_space<vmem>>, vector<1x1x1x16x16xbf16>,
    %34 = arith.truncf %21 : vector<2x16x16xf32> to vector<2x16x16xbf16>
    "tpu.trace_start"() <{level = 10 : i32, message = "bqk,bkd->bqd"}> : () -> ()
    %cst_18 = arith.constant dense<0.000000e+00> : vector<2x16x16xf32>
    %35 = tpu.matmul %34, %10, %cst_18 {dimension_numbers = #tpu.dot_dimension_numbers<[2], [1], [1], [2], [0, 0, 0, 1, 1, 2], [0], [0]>} : vector<2x16x16xbf16>, vector<2x16x16xbf16>, vector<2x16x16xf32> -> vector<2x16x16xf32>
    "tpu.trace_stop"() : () -> ()
    %36 = vector.extract_strided_slice %2 {offsets = [0, 0, 8], sizes = [2, 16, 8], strides = [1, 1, 1]} : vector<2x16x16xbf16> to vector<2x16x8xbf16>
    %37 = vector.extract_strided_slice %5 {offsets = [0, 0, 8], sizes = [2, 16, 8], strides = [1, 1, 1]} : vector<2x16x16xbf16> to vector<2x16x8xbf16>
    %38 = vector.extract_strided_slice %7 {offsets = [0, 0, 16], sizes = [2, 16, 16], strides = [1, 1, 1]} : vector<2x16x32xbf16> to vector<2x16x16xbf16>
    "tpu.trace_start"() <{level = 10 : i32, message = "bqd,bkd->bqk"}> : () -> ()
    %cst_19 = arith.constant dense<0.000000e+00> : vector<2x16x16xf32>
    %39 = tpu.matmul %36, %37, %cst_19 {dimension_numbers = #tpu.dot_dimension_numbers<[2], [2], [1], [1], [0, 0, 0, 1, 1, 1], [0], [0]>} : vector<2x16x8xbf16>, vector<2x16x8xbf16>, vector<2x16x16xf32> -> vector<2x16x16xf32>
    "tpu.trace_stop"() : () -> ()
    %cst_20 = arith.constant dense<0xFF800000> : vector<2x16xf32>
    %40 = vector.multi_reduction <maximumf>, %39, %cst_20 [2] : vector<2x16x16xf32> to vector<2x16xf32>
    %41 = vector.shape_cast %40 : vector<2x16xf32> to vector<2x16x1xf32>
    %42 = vector.broadcast %41 : vector<2x16x1xf32> to vector<2x16x16xf32>
    %43 = arith.subf %39, %42 : vector<2x16x16xf32>
    %44 = math.exp %43 : vector<2x16x16xf32>
    %cst_21 = arith.constant dense<0.000000e+00> : vector<2x16xf32>
    %45 = vector.multi_reduction <add>, %44, %cst_21 [2] : vector<2x16x16xf32> to vector<2x16xf32>
    %46 = vector.shape_cast %45 : vector<2x16xf32> to vector<2x16x1xf32>
    %47 = tpu.reciprocal %46 {approx = true} : vector<2x16x1xf32> -> vector<2x16x1xf32>
    %48 = vector.broadcast %47 : vector<2x16x1xf32> to vector<2x16x16xf32>
    %49 = arith.mulf %44, %48 : vector<2x16x16xf32>
    %50 = vector.extract_strided_slice %49 {offsets = [0, 0, 0], sizes = [1, 16, 16], strides = [1, 1, 1]} : vector<2x16x16xf32> to vector<1x16x16xf32>
    %51 = vector.shape_cast %50 : vector<1x16x16xf32> to vector<16x16xf32>
    %52 = arith.truncf %51 : vector<16x16xf32> to vector<16x16xbf16>
    %c0_22 = arith.constant 0 : index
    %c0_23 = arith.constant 0 : index
    %c1_24 = arith.constant 1 : index
    %c0_25 = arith.constant 0 : index
    %c0_26 = arith.constant 0 : index
    %53 = vector.load %arg16[%c0_22, %c0_23, %c1_24, %c0_25, %c0_26] : memref<1x2x2x16x16xbf16, #tpu.memory_space<vmem>>, vector<1x1x1x16x16xbf16>
    %54 = vector.shape_cast %53 : vector<1x1x1x16x16xbf16> to vector<16x16xbf16>
    %55 = vector.shape_cast %52 : vector<16x16xbf16> to vector<1x1x1x16x16xbf16>
    tpu.vector_store %arg16[%c0_22, %c0_23, %c1_24, %c0_25, %c0_26], %55 {strides = array<i32>} : memref<1x2x2x16x16xbf16, #tpu.memory_space<vmem>>, vector<1x1x1x16x16xbf16>,
    %56 = vector.extract_strided_slice %49 {offsets = [1, 0, 0], sizes = [1, 16, 16], strides = [1, 1, 1]} : vector<2x16x16xf32> to vector<1x16x16xf32>
    %57 = vector.shape_cast %56 : vector<1x16x16xf32> to vector<16x16xf32>
    %58 = arith.truncf %57 : vector<16x16xf32> to vector<16x16xbf16>
    %c0_27 = arith.constant 0 : index
    %c1_28 = arith.constant 1 : index
    %c1_29 = arith.constant 1 : index
    %c0_30 = arith.constant 0 : index
    %c0_31 = arith.constant 0 : index
    %59 = vector.load %arg16[%c0_27, %c1_28, %c1_29, %c0_30, %c0_31] : memref<1x2x2x16x16xbf16, #tpu.memory_space<vmem>>, vector<1x1x1x16x16xbf16>
    %60 = vector.shape_cast %59 : vector<1x1x1x16x16xbf16> to vector<16x16xbf16>
    %61 = vector.shape_cast %58 : vector<16x16xbf16> to vector<1x1x1x16x16xbf16>
    tpu.vector_store %arg16[%c0_27, %c1_28, %c1_29, %c0_30, %c0_31], %61 {strides = array<i32>} : memref<1x2x2x16x16xbf16, #tpu.memory_space<vmem>>, vector<1x1x1x16x16xbf16>,
    %62 = arith.truncf %49 : vector<2x16x16xf32> to vector<2x16x16xbf16>
    "tpu.trace_start"() <{level = 10 : i32, message = "bqk,bkd->bqd"}> : () -> ()
    %cst_32 = arith.constant dense<0.000000e+00> : vector<2x16x16xf32>
    %63 = tpu.matmul %62, %38, %cst_32 {dimension_numbers = #tpu.dot_dimension_numbers<[2], [1], [1], [2], [0, 0, 0, 1, 1, 2], [0], [0]>} : vector<2x16x16xbf16>, vector<2x16x16xbf16>, vector<2x16x16xf32> -> vector<2x16x16xf32>
    "tpu.trace_stop"() : () -> ()
    %64 = tpu.concatenate %35, %63 in 2 : vector<2x16x16xf32>, vector<2x16x16xf32> -> vector<2x16x32xf32>
    %65 = vector.shape_cast %64 : vector<2x16x32xf32> to vector<32x32xf32>
    %66 = arith.truncf %65 : vector<32x32xf32> to vector<32x32xbf16>
    %c0_33 = arith.constant 0 : index
    %c0_34 = arith.constant 0 : index
    %c0_35 = arith.constant 0 : index
    %67 = vector.load %arg5[%c0_33, %c0_34, %c0_35] : memref<1x32x32xbf16, #tpu.memory_space<vmem>>, vector<1x32x32xbf16>
    %68 = vector.shape_cast %67 : vector<1x32x32xbf16> to vector<32x32xbf16>
    %cst_36 = arith.constant dense<0.000000e+00> : vector<32x32xf32>
    %69 = tpu.matmul %66, %68, %cst_36 {dimension_numbers = #tpu.dot_dimension_numbers<[1], [0], [0], [1], [0, 0, 1, 1], [], []>} : vector<32x32xbf16>, vector<32x32xbf16>, vector<32x32xf32> -> vector<32x32xf32>
    %c0_37 = arith.constant 0 : index
    %c0_38 = arith.constant 0 : index
    %c0_39 = arith.constant 0 : index
    %70 = vector.load %arg6[%c0_37, %c0_38, %c0_39] : memref<1x1x32xf32, #tpu.memory_space<vmem>>, vector<1x1x32xf32>
    %71 = vector.shape_cast %70 : vector<1x1x32xf32> to vector<1x32xf32>
    %72 = vector.broadcast %71 : vector<1x32xf32> to vector<32x32xf32>
    %73 = arith.addf %69, %72 : vector<32x32xf32>
    %c0_40 = arith.constant 0 : index
    %c0_41 = arith.constant 0 : index
    %74 = vector.load %arg4[%c0_40, %c0_41] : memref<32x32xf32, #tpu.memory_space<vmem>>, vector<32x32xf32>
    %75 = arith.addf %74, %73 : vector<32x32xf32>
    %cst_42 = arith.constant dense<0.000000e+00> : vector<32xf32>
    %76 = vector.multi_reduction <add>, %75, %cst_42 [1] : vector<32x32xf32> to vector<32xf32>
    %77 = vector.shape_cast %76 : vector<32xf32> to vector<32x1xf32>
    %cst_43 = arith.constant 3.200000e+01 : f32
    %78 = vector.broadcast %cst_43 : f32 to vector<32x1xf32>
    %79 = arith.divf %77, %78 : vector<32x1xf32>
    %80 = vector.broadcast %79 : vector<32x1xf32> to vector<32x32xf32>
    %81 = arith.subf %75, %80 : vector<32x32xf32>
    %82 = arith.mulf %81, %81 : vector<32x32xf32>
    %cst_44 = arith.constant dense<0.000000e+00> : vector<32xf32>
    %83 = vector.multi_reduction <add>, %82, %cst_44 [1] : vector<32x32xf32> to vector<32xf32>
    %84 = vector.shape_cast %83 : vector<32xf32> to vector<32x1xf32>
    %cst_45 = arith.constant 3.200000e+01 : f32
    %85 = vector.broadcast %cst_45 : f32 to vector<32x1xf32>
    %86 = arith.divf %84, %85 : vector<32x1xf32>
    %cst_46 = arith.constant 9.99999974E-6 : f32
    %87 = vector.broadcast %cst_46 : f32 to vector<32x1xf32>
    %88 = arith.addf %86, %87 : vector<32x1xf32>
    %89 = math.rsqrt %88 : vector<32x1xf32>
    %90 = vector.broadcast %89 : vector<32x1xf32> to vector<32x32xf32>
    %91 = arith.mulf %81, %90 : vector<32x32xf32>
    %c0_47 = arith.constant 0 : index
    %c0_48 = arith.constant 0 : index
    %c0_49 = arith.constant 0 : index
    %92 = vector.load %arg7[%c0_47, %c0_48, %c0_49] : memref<1x1x32xf32, #tpu.memory_space<vmem>>, vector<1x1x32xf32>
    %93 = vector.shape_cast %92 : vector<1x1x32xf32> to vector<1x32xf32>
    %94 = vector.broadcast %93 : vector<1x32xf32> to vector<32x32xf32>
    %95 = arith.mulf %91, %94 : vector<32x32xf32>
    %c0_50 = arith.constant 0 : index
    %c0_51 = arith.constant 0 : index
    %c0_52 = arith.constant 0 : index
    %96 = vector.load %arg8[%c0_50, %c0_51, %c0_52] : memref<1x1x32xf32, #tpu.memory_space<vmem>>, vector<1x1x32xf32>
    %97 = vector.shape_cast %96 : vector<1x1x32xf32> to vector<1x32xf32>
    %98 = vector.broadcast %97 : vector<1x32xf32> to vector<32x32xf32>
    %99 = arith.addf %95, %98 : vector<32x32xf32>
    %100 = arith.truncf %99 : vector<32x32xf32> to vector<32x32xbf16>
    %c0_53 = arith.constant 0 : index
    %c0_54 = arith.constant 0 : index
    %c0_55 = arith.constant 0 : index
    %101 = vector.load %arg9[%c0_53, %c0_54, %c0_55] : memref<1x32x64xbf16, #tpu.memory_space<vmem>>, vector<1x32x64xbf16>
    %102 = vector.shape_cast %101 : vector<1x32x64xbf16> to vector<32x64xbf16>
    %cst_56 = arith.constant dense<0.000000e+00> : vector<32x64xf32>
    %103 = tpu.matmul %100, %102, %cst_56 {dimension_numbers = #tpu.dot_dimension_numbers<[1], [0], [0], [1], [0, 0, 1, 1], [], []>} : vector<32x32xbf16>, vector<32x64xbf16>, vector<32x64xf32> -> vector<32x64xf32>
    %c0_57 = arith.constant 0 : index
    %c0_58 = arith.constant 0 : index
    %c0_59 = arith.constant 0 : index
    %104 = vector.load %arg10[%c0_57, %c0_58, %c0_59] : memref<1x1x64xf32, #tpu.memory_space<vmem>>, vector<1x1x64xf32>
    %105 = vector.shape_cast %104 : vector<1x1x64xf32> to vector<1x64xf32>
    %106 = vector.broadcast %105 : vector<1x64xf32> to vector<32x64xf32>
    %107 = arith.addf %103, %106 : vector<32x64xf32>
    %cst_60 = arith.constant 0.000000e+00 : f32
    %108 = vector.broadcast %cst_60 : f32 to vector<32x64xf32>
    %109 = arith.maximumf %107, %108 : vector<32x64xf32>
    %110 = arith.truncf %109 : vector<32x64xf32> to vector<32x64xbf16>
    %c0_61 = arith.constant 0 : index
    %c0_62 = arith.constant 0 : index
    %c0_63 = arith.constant 0 : index
    %111 = vector.load %arg11[%c0_61, %c0_62, %c0_63] : memref<1x64x32xbf16, #tpu.memory_space<vmem>>, vector<1x64x32xbf16>
    %112 = vector.shape_cast %111 : vector<1x64x32xbf16> to vector<64x32xbf16>
    %cst_64 = arith.constant dense<0.000000e+00> : vector<32x32xf32>
    %113 = tpu.matmul %110, %112, %cst_64 {dimension_numbers = #tpu.dot_dimension_numbers<[1], [0], [0], [1], [0, 0, 1, 1], [], []>} : vector<32x64xbf16>, vector<64x32xbf16>, vector<32x32xf32> -> vector<32x32xf32>
    %c0_65 = arith.constant 0 : index
    %c0_66 = arith.constant 0 : index
    %c0_67 = arith.constant 0 : index
    %114 = vector.load %arg12[%c0_65, %c0_66, %c0_67] : memref<1x1x32xf32, #tpu.memory_space<vmem>>, vector<1x1x32xf32>
    %115 = vector.shape_cast %114 : vector<1x1x32xf32> to vector<1x32xf32>
    %116 = vector.broadcast %115 : vector<1x32xf32> to vector<32x32xf32>
    %117 = arith.addf %113, %116 : vector<32x32xf32>
    %118 = arith.addf %99, %117 : vector<32x32xf32>
    %cst_68 = arith.constant dense<0.000000e+00> : vector<32xf32>
    %119 = vector.multi_reduction <add>, %118, %cst_68 [1] : vector<32x32xf32> to vector<32xf32>
    %120 = vector.shape_cast %119 : vector<32xf32> to vector<32x1xf32>
    %cst_69 = arith.constant 3.200000e+01 : f32
    %121 = vector.broadcast %cst_69 : f32 to vector<32x1xf32>
    %122 = arith.divf %120, %121 : vector<32x1xf32>
    %123 = vector.broadcast %122 : vector<32x1xf32> to vector<32x32xf32>
    %124 = arith.subf %118, %123 : vector<32x32xf32>
    %125 = arith.mulf %124, %124 : vector<32x32xf32>
    %cst_70 = arith.constant dense<0.000000e+00> : vector<32xf32>
    %126 = vector.multi_reduction <add>, %125, %cst_70 [1] : vector<32x32xf32> to vector<32xf32>
    %127 = vector.shape_cast %126 : vector<32xf32> to vector<32x1xf32>
    %cst_71 = arith.constant 3.200000e+01 : f32
    %128 = vector.broadcast %cst_71 : f32 to vector<32x1xf32>
    %129 = arith.divf %127, %128 : vector<32x1xf32>
    %cst_72 = arith.constant 9.99999974E-6 : f32
    %130 = vector.broadcast %cst_72 : f32 to vector<32x1xf32>
    %131 = arith.addf %129, %130 : vector<32x1xf32>
    %132 = math.rsqrt %131 : vector<32x1xf32>
    %133 = vector.broadcast %132 : vector<32x1xf32> to vector<32x32xf32>
    %134 = arith.mulf %124, %133 : vector<32x32xf32>
    %c0_73 = arith.constant 0 : index
    %c0_74 = arith.constant 0 : index
    %c0_75 = arith.constant 0 : index
    %135 = vector.load %arg13[%c0_73, %c0_74, %c0_75] : memref<1x1x32xf32, #tpu.memory_space<vmem>>, vector<1x1x32xf32>
    %136 = vector.shape_cast %135 : vector<1x1x32xf32> to vector<1x32xf32>
    %137 = vector.broadcast %136 : vector<1x32xf32> to vector<32x32xf32>
    %138 = arith.mulf %134, %137 : vector<32x32xf32>
    %c0_76 = arith.constant 0 : index
    %c0_77 = arith.constant 0 : index
    %c0_78 = arith.constant 0 : index
    %139 = vector.load %arg14[%c0_76, %c0_77, %c0_78] : memref<1x1x32xf32, #tpu.memory_space<vmem>>, vector<1x1x32xf32>
    %140 = vector.shape_cast %139 : vector<1x1x32xf32> to vector<1x32xf32>
    %141 = vector.broadcast %140 : vector<1x32xf32> to vector<32x32xf32>
    %142 = arith.addf %138, %141 : vector<32x32xf32>
    %c0_79 = arith.constant 0 : index
    %c0_80 = arith.constant 0 : index
    %c0_81 = arith.constant 0 : index
    %143 = vector.load %arg15[%c0_79, %c0_80, %c0_81] : memref<1x32x32xf32, #tpu.memory_space<vmem>>, vector<1x32x32xf32>
    %144 = vector.shape_cast %143 : vector<1x32x32xf32> to vector<32x32xf32>
    %145 = vector.shape_cast %142 : vector<32x32xf32> to vector<1x32x32xf32>
    tpu.vector_store %arg15[%c0_79, %c0_80, %c0_81], %145 {strides = array<i32>} : memref<1x32x32xf32, #tpu.memory_space<vmem>>, vector<1x32x32xf32>,
    return
  }
  func.func @transform_0(%arg0: i32) -> (i32, i32, i32) {
    %c0_i32 = arith.constant 0 : i32
    %c0_i32_0 = arith.constant 0 : i32
    %c0_i32_1 = arith.constant 0 : i32
    return %arg0, %c0_i32, %c0_i32_0 : i32, i32, i32
  }
  func.func @transform_1(%arg0: i32) -> (i32, i32, i32) {
    %c0_i32 = arith.constant 0 : i32
    %c0_i32_0 = arith.constant 0 : i32
    %c0_i32_1 = arith.constant 0 : i32
    return %arg0, %c0_i32, %c0_i32_0 : i32, i32, i32
  }
  func.func @transform_2(%arg0: i32) -> (i32, i32) {
    %c0_i32 = arith.constant 0 : i32
    %c0_i32_0 = arith.constant 0 : i32
    %c0_i32_1 = arith.constant 0 : i32
    return %c0_i32, %c0_i32_0 : i32, i32
  }
  func.func @transform_3(%arg0: i32) -> (i32, i32) {
    %c0_i32 = arith.constant 0 : i32
    %c0_i32_0 = arith.constant 0 : i32
    %c0_i32_1 = arith.constant 0 : i32
    return %c0_i32, %c0_i32_0 : i32, i32
  }
  func.func @transform_4(%arg0: i32) -> (i32, i32, i32) {
    %c0_i32 = arith.constant 0 : i32
    %c0_i32_0 = arith.constant 0 : i32
    %c0_i32_1 = arith.constant 0 : i32
    return %arg0, %c0_i32, %c0_i32_0 : i32, i32, i32
  }
  func.func @transform_5(%arg0: i32) -> (i32, i32, i32) {
    %c0_i32 = arith.constant 0 : i32
    %c0_i32_0 = arith.constant 0 : i32
    %c0_i32_1 = arith.constant 0 : i32
    return %arg0, %c0_i32, %c0_i32_0 : i32, i32, i32
  }
  func.func @transform_6(%arg0: i32) -> (i32, i32, i32) {
    %c0_i32 = arith.constant 0 : i32
    %c0_i32_0 = arith.constant 0 : i32
    %c0_i32_1 = arith.constant 0 : i32
    return %arg0, %c0_i32, %c0_i32_0 : i32, i32, i32
  }
  func.func @transform_7(%arg0: i32) -> (i32, i32, i32) {
    %c0_i32 = arith.constant 0 : i32
    %c0_i32_0 = arith.constant 0 : i32
    %c0_i32_1 = arith.constant 0 : i32
    return %arg0, %c0_i32, %c0_i32_0 : i32, i32, i32
  }
  func.func @transform_8(%arg0: i32) -> (i32, i32, i32) {
    %c0_i32 = arith.constant 0 : i32
    %c0_i32_0 = arith.constant 0 : i32
    %c0_i32_1 = arith.constant 0 : i32
    return %arg0, %c0_i32, %c0_i32_0 : i32, i32, i32
  }
  func.func @transform_9(%arg0: i32) -> (i32, i32, i32) {
    %c0_i32 = arith.constant 0 : i32
    %c0_i32_0 = arith.constant 0 : i32
    %c0_i32_1 = arith.constant 0 : i32
    return %arg0, %c0_i32, %c0_i32_0 : i32, i32, i32
  }
  func.func @transform_10(%arg0: i32) -> (i32, i32, i32) {
    %c0_i32 = arith.constant 0 : i32
    %c0_i32_0 = arith.constant 0 : i32
    %c0_i32_1 = arith.constant 0 : i32
    return %arg0, %c0_i32, %c0_i32_0 : i32, i32, i32
  }
  func.func @transform_11(%arg0: i32) -> (i32, i32, i32) {
    %c0_i32 = arith.constant 0 : i32
    %c0_i32_0 = arith.constant 0 : i32
    %c0_i32_1 = arith.constant 0 : i32
    return %arg0, %c0_i32, %c0_i32_0 : i32, i32, i32
  }
  func.func @transform_12(%arg0: i32) -> (i32, i32, i32) {
    %c0_i32 = arith.constant 0 : i32
    %c0_i32_0 = arith.constant 0 : i32
    %c0_i32_1 = arith.constant 0 : i32
    return %arg0, %c0_i32, %c0_i32_0 : i32, i32, i32
  }
  func.func @transform_13(%arg0: i32) -> (i32, i32, i32) {
    %c0_i32 = arith.constant 0 : i32
    %c0_i32_0 = arith.constant 0 : i32
    %c0_i32_1 = arith.constant 0 : i32
    return %arg0, %c0_i32, %c0_i32_0 : i32, i32, i32
  }
  func.func @transform_14(%arg0: i32) -> (i32, i32, i32) {
    %c0_i32 = arith.constant 0 : i32
    %c0_i32_0 = arith.constant 0 : i32
    %c0_i32_1 = arith.constant 0 : i32
    return %arg0, %c0_i32, %c0_i32_0 : i32, i32, i32
  }
  func.func @transform_15(%arg0: i32) -> (i32, i32, i32, i32, i32) {
    %c0_i32 = arith.constant 0 : i32
    %c0_i32_0 = arith.constant 0 : i32
    %c0_i32_1 = arith.constant 0 : i32
    %c0_i32_2 = arith.constant 0 : i32
    %c0_i32_3 = arith.constant 0 : i32
    return %arg0, %c0_i32, %c0_i32_0, %c0_i32_1, %c0_i32_2 : i32, i32, i32, i32, i32
  }
}

module attributes {stable_mosaic.version = 11 : i64} {
  func.func @_fused_conv_kernel(%arg0: i32, %arg1: memref<42x32xbf16, #tpu.memory_space<vmem>>, %arg2: memref<9x32x1xbf16, #tpu.memory_space<vmem>>, %arg3: memref<288x32xbf16, #tpu.memory_space<vmem>>, %arg4: memref<1x32xf32, #tpu.memory_space<vmem>>, %arg5: memref<42x32xbf16, #tpu.memory_space<vmem>>, %arg6: memref<9x32x1xbf16, #tpu.memory_space<vmem>>, %arg7: memref<288x32xbf16, #tpu.memory_space<vmem>>, %arg8: memref<1x32xf32, #tpu.memory_space<vmem>>, %arg9: memref<32x32xbf16, #tpu.memory_space<vmem>>, %arg10: memref<1x32xf32, #tpu.memory_space<vmem>>, %arg11: memref<2x32x16xbf16, #tpu.memory_space<vmem>>, %arg12: memref<2x32x16xbf16, #tpu.memory_space<vmem>>, %arg13: memref<32x32xbf16, #tpu.memory_space<vmem>>) attributes {dimension_semantics = [#tpu.dimension_semantics<arbitrary>], iteration_bounds = array<i64: 1>, scalar_prefetch = 0 : i64, scratch_operands = 0 : i64, tpu.core_type = #tpu.core_type<tc>, window_params = [{pipeline_mode = #tpu.pipeline_mode<synchronous>, transform_indices = @transform_0, window_bounds = array<i64: 42, 32>}, {pipeline_mode = #tpu.pipeline_mode<synchronous>, transform_indices = @transform_1, window_bounds = array<i64: 9, 32, 1>}, {pipeline_mode = #tpu.pipeline_mode<synchronous>, transform_indices = @transform_2, window_bounds = array<i64: 288, 32>}, {pipeline_mode = #tpu.pipeline_mode<synchronous>, transform_indices = @transform_3, window_bounds = array<i64: 1, 32>}, {pipeline_mode = #tpu.pipeline_mode<synchronous>, transform_indices = @transform_4, window_bounds = array<i64: 42, 32>}, {pipeline_mode = #tpu.pipeline_mode<synchronous>, transform_indices = @transform_5, window_bounds = array<i64: 9, 32, 1>}, {pipeline_mode = #tpu.pipeline_mode<synchronous>, transform_indices = @transform_6, window_bounds = array<i64: 288, 32>}, {pipeline_mode = #tpu.pipeline_mode<synchronous>, transform_indices = @transform_7, window_bounds = array<i64: 1, 32>}, {pipeline_mode = #tpu.pipeline_mode<synchronous>, transform_indices = @transform_8, window_bounds = array<i64: 32, 32>}, {pipeline_mode = #tpu.pipeline_mode<synchronous>, transform_indices = @transform_9, window_bounds = array<i64: 1, 32>}, {pipeline_mode = #tpu.pipeline_mode<synchronous>, transform_indices = @transform_10, window_bounds = array<i64: 2, 32, 16>}, {pipeline_mode = #tpu.pipeline_mode<synchronous>, transform_indices = @transform_11, window_bounds = array<i64: 2, 32, 16>}, {pipeline_mode = #tpu.pipeline_mode<synchronous>, transform_indices = @transform_12, window_bounds = array<i64: 32, 32>}]} {
    %c0 = arith.constant 0 : index
    %c0_0 = arith.constant 0 : index
    %0 = vector.load %arg1[%c0, %c0_0] : memref<42x32xbf16, #tpu.memory_space<vmem>>, vector<32x32xbf16>
    %c0_1 = arith.constant 0 : index
    %c0_2 = arith.constant 0 : index
    %c0_3 = arith.constant 0 : index
    %1 = vector.load %arg2[%c0_1, %c0_2, %c0_3] : memref<9x32x1xbf16, #tpu.memory_space<vmem>>, vector<1x32x1xbf16>
    %2 = vector.shape_cast %1 : vector<1x32x1xbf16> to vector<32x1xbf16>
    %3 = vector.broadcast %2 : vector<32x1xbf16> to vector<32x32xbf16>
    %4 = arith.mulf %0, %3 : vector<32x32xbf16>
    %c1 = arith.constant 1 : index
    %c0_4 = arith.constant 0 : index
    %5 = vector.load %arg1[%c1, %c0_4] : memref<42x32xbf16, #tpu.memory_space<vmem>>, vector<32x32xbf16>
    %c1_5 = arith.constant 1 : index
    %c0_6 = arith.constant 0 : index
    %c0_7 = arith.constant 0 : index
    %6 = vector.load %arg2[%c1_5, %c0_6, %c0_7] : memref<9x32x1xbf16, #tpu.memory_space<vmem>>, vector<1x32x1xbf16>
    %7 = vector.shape_cast %6 : vector<1x32x1xbf16> to vector<32x1xbf16>
    %8 = vector.broadcast %7 : vector<32x1xbf16> to vector<32x32xbf16>
    %9 = arith.mulf %5, %8 : vector<32x32xbf16>
    %c2 = arith.constant 2 : index
    %c0_8 = arith.constant 0 : index
    %10 = vector.load %arg1[%c2, %c0_8] : memref<42x32xbf16, #tpu.memory_space<vmem>>, vector<32x32xbf16>
    %c2_9 = arith.constant 2 : index
    %c0_10 = arith.constant 0 : index
    %c0_11 = arith.constant 0 : index
    %11 = vector.load %arg2[%c2_9, %c0_10, %c0_11] : memref<9x32x1xbf16, #tpu.memory_space<vmem>>, vector<1x32x1xbf16>
    %12 = vector.shape_cast %11 : vector<1x32x1xbf16> to vector<32x1xbf16>
    %13 = vector.broadcast %12 : vector<32x1xbf16> to vector<32x32xbf16>
    %14 = arith.mulf %10, %13 : vector<32x32xbf16>
    %c4 = arith.constant 4 : index
    %c0_12 = arith.constant 0 : index
    %15 = vector.load %arg1[%c4, %c0_12] : memref<42x32xbf16, #tpu.memory_space<vmem>>, vector<32x32xbf16>
    %c3 = arith.constant 3 : index
    %c0_13 = arith.constant 0 : index
    %c0_14 = arith.constant 0 : index
    %16 = vector.load %arg2[%c3, %c0_13, %c0_14] : memref<9x32x1xbf16, #tpu.memory_space<vmem>>, vector<1x32x1xbf16>
    %17 = vector.shape_cast %16 : vector<1x32x1xbf16> to vector<32x1xbf16>
    %18 = vector.broadcast %17 : vector<32x1xbf16> to vector<32x32xbf16>
    %19 = arith.mulf %15, %18 : vector<32x32xbf16>
    %c5 = arith.constant 5 : index
    %c0_15 = arith.constant 0 : index
    %20 = vector.load %arg1[%c5, %c0_15] : memref<42x32xbf16, #tpu.memory_space<vmem>>, vector<32x32xbf16>
    %c4_16 = arith.constant 4 : index
    %c0_17 = arith.constant 0 : index
    %c0_18 = arith.constant 0 : index
    %21 = vector.load %arg2[%c4_16, %c0_17, %c0_18] : memref<9x32x1xbf16, #tpu.memory_space<vmem>>, vector<1x32x1xbf16>
    %22 = vector.shape_cast %21 : vector<1x32x1xbf16> to vector<32x1xbf16>
    %23 = vector.broadcast %22 : vector<32x1xbf16> to vector<32x32xbf16>
    %24 = arith.mulf %20, %23 : vector<32x32xbf16>
    %c6 = arith.constant 6 : index
    %c0_19 = arith.constant 0 : index
    %25 = vector.load %arg1[%c6, %c0_19] : memref<42x32xbf16, #tpu.memory_space<vmem>>, vector<32x32xbf16>
    %c5_20 = arith.constant 5 : index
    %c0_21 = arith.constant 0 : index
    %c0_22 = arith.constant 0 : index
    %26 = vector.load %arg2[%c5_20, %c0_21, %c0_22] : memref<9x32x1xbf16, #tpu.memory_space<vmem>>, vector<1x32x1xbf16>
    %27 = vector.shape_cast %26 : vector<1x32x1xbf16> to vector<32x1xbf16>
    %28 = vector.broadcast %27 : vector<32x1xbf16> to vector<32x32xbf16>
    %29 = arith.mulf %25, %28 : vector<32x32xbf16>
    %c8 = arith.constant 8 : index
    %c0_23 = arith.constant 0 : index
    %30 = vector.load %arg1[%c8, %c0_23] : memref<42x32xbf16, #tpu.memory_space<vmem>>, vector<32x32xbf16>
    %c6_24 = arith.constant 6 : index
    %c0_25 = arith.constant 0 : index
    %c0_26 = arith.constant 0 : index
    %31 = vector.load %arg2[%c6_24, %c0_25, %c0_26] : memref<9x32x1xbf16, #tpu.memory_space<vmem>>, vector<1x32x1xbf16>
    %32 = vector.shape_cast %31 : vector<1x32x1xbf16> to vector<32x1xbf16>
    %33 = vector.broadcast %32 : vector<32x1xbf16> to vector<32x32xbf16>
    %34 = arith.mulf %30, %33 : vector<32x32xbf16>
    %c9 = arith.constant 9 : index
    %c0_27 = arith.constant 0 : index
    %35 = vector.load %arg1[%c9, %c0_27] : memref<42x32xbf16, #tpu.memory_space<vmem>>, vector<32x32xbf16>
    %c7 = arith.constant 7 : index
    %c0_28 = arith.constant 0 : index
    %c0_29 = arith.constant 0 : index
    %36 = vector.load %arg2[%c7, %c0_28, %c0_29] : memref<9x32x1xbf16, #tpu.memory_space<vmem>>, vector<1x32x1xbf16>
    %37 = vector.shape_cast %36 : vector<1x32x1xbf16> to vector<32x1xbf16>
    %38 = vector.broadcast %37 : vector<32x1xbf16> to vector<32x32xbf16>
    %39 = arith.mulf %35, %38 : vector<32x32xbf16>
    %c10 = arith.constant 10 : index
    %c0_30 = arith.constant 0 : index
    %40 = vector.load %arg1[%c10, %c0_30] : memref<42x32xbf16, #tpu.memory_space<vmem>>, vector<32x32xbf16>
    %c8_31 = arith.constant 8 : index
    %c0_32 = arith.constant 0 : index
    %c0_33 = arith.constant 0 : index
    %41 = vector.load %arg2[%c8_31, %c0_32, %c0_33] : memref<9x32x1xbf16, #tpu.memory_space<vmem>>, vector<1x32x1xbf16>
    %42 = vector.shape_cast %41 : vector<1x32x1xbf16> to vector<32x1xbf16>
    %43 = vector.broadcast %42 : vector<32x1xbf16> to vector<32x32xbf16>
    %44 = arith.mulf %40, %43 : vector<32x32xbf16>
    %45 = tpu.concatenate %4, %9, %14, %19, %24, %29, %34, %39, %44 in 1 : vector<32x32xbf16>, vector<32x32xbf16>, vector<32x32xbf16>, vector<32x32xbf16>, vector<32x32xbf16>, vector<32x32xbf16>, vector<32x32xbf16>, vector<32x32xbf16>, vector<32x32xbf16> -> vector<32x288xbf16>
    %c0_34 = arith.constant 0 : index
    %c0_35 = arith.constant 0 : index
    %46 = vector.load %arg5[%c0_34, %c0_35] : memref<42x32xbf16, #tpu.memory_space<vmem>>, vector<32x32xbf16>
    %c0_36 = arith.constant 0 : index
    %c0_37 = arith.constant 0 : index
    %c0_38 = arith.constant 0 : index
    %47 = vector.load %arg6[%c0_36, %c0_37, %c0_38] : memref<9x32x1xbf16, #tpu.memory_space<vmem>>, vector<1x32x1xbf16>
    %48 = vector.shape_cast %47 : vector<1x32x1xbf16> to vector<32x1xbf16>
    %49 = vector.broadcast %48 : vector<32x1xbf16> to vector<32x32xbf16>
    %50 = arith.mulf %46, %49 : vector<32x32xbf16>
    %c1_39 = arith.constant 1 : index
    %c0_40 = arith.constant 0 : index
    %51 = vector.load %arg5[%c1_39, %c0_40] : memref<42x32xbf16, #tpu.memory_space<vmem>>, vector<32x32xbf16>
    %c1_41 = arith.constant 1 : index
    %c0_42 = arith.constant 0 : index
    %c0_43 = arith.constant 0 : index
    %52 = vector.load %arg6[%c1_41, %c0_42, %c0_43] : memref<9x32x1xbf16, #tpu.memory_space<vmem>>, vector<1x32x1xbf16>
    %53 = vector.shape_cast %52 : vector<1x32x1xbf16> to vector<32x1xbf16>
    %54 = vector.broadcast %53 : vector<32x1xbf16> to vector<32x32xbf16>
    %55 = arith.mulf %51, %54 : vector<32x32xbf16>
    %c2_44 = arith.constant 2 : index
    %c0_45 = arith.constant 0 : index
    %56 = vector.load %arg5[%c2_44, %c0_45] : memref<42x32xbf16, #tpu.memory_space<vmem>>, vector<32x32xbf16>
    %c2_46 = arith.constant 2 : index
    %c0_47 = arith.constant 0 : index
    %c0_48 = arith.constant 0 : index
    %57 = vector.load %arg6[%c2_46, %c0_47, %c0_48] : memref<9x32x1xbf16, #tpu.memory_space<vmem>>, vector<1x32x1xbf16>
    %58 = vector.shape_cast %57 : vector<1x32x1xbf16> to vector<32x1xbf16>
    %59 = vector.broadcast %58 : vector<32x1xbf16> to vector<32x32xbf16>
    %60 = arith.mulf %56, %59 : vector<32x32xbf16>
    %c4_49 = arith.constant 4 : index
    %c0_50 = arith.constant 0 : index
    %61 = vector.load %arg5[%c4_49, %c0_50] : memref<42x32xbf16, #tpu.memory_space<vmem>>, vector<32x32xbf16>
    %c3_51 = arith.constant 3 : index
    %c0_52 = arith.constant 0 : index
    %c0_53 = arith.constant 0 : index
    %62 = vector.load %arg6[%c3_51, %c0_52, %c0_53] : memref<9x32x1xbf16, #tpu.memory_space<vmem>>, vector<1x32x1xbf16>
    %63 = vector.shape_cast %62 : vector<1x32x1xbf16> to vector<32x1xbf16>
    %64 = vector.broadcast %63 : vector<32x1xbf16> to vector<32x32xbf16>
    %65 = arith.mulf %61, %64 : vector<32x32xbf16>
    %c5_54 = arith.constant 5 : index
    %c0_55 = arith.constant 0 : index
    %66 = vector.load %arg5[%c5_54, %c0_55] : memref<42x32xbf16, #tpu.memory_space<vmem>>, vector<32x32xbf16>
    %c4_56 = arith.constant 4 : index
    %c0_57 = arith.constant 0 : index
    %c0_58 = arith.constant 0 : index
    %67 = vector.load %arg6[%c4_56, %c0_57, %c0_58] : memref<9x32x1xbf16, #tpu.memory_space<vmem>>, vector<1x32x1xbf16>
    %68 = vector.shape_cast %67 : vector<1x32x1xbf16> to vector<32x1xbf16>
    %69 = vector.broadcast %68 : vector<32x1xbf16> to vector<32x32xbf16>
    %70 = arith.mulf %66, %69 : vector<32x32xbf16>
    %c6_59 = arith.constant 6 : index
    %c0_60 = arith.constant 0 : index
    %71 = vector.load %arg5[%c6_59, %c0_60] : memref<42x32xbf16, #tpu.memory_space<vmem>>, vector<32x32xbf16>
    %c5_61 = arith.constant 5 : index
    %c0_62 = arith.constant 0 : index
    %c0_63 = arith.constant 0 : index
    %72 = vector.load %arg6[%c5_61, %c0_62, %c0_63] : memref<9x32x1xbf16, #tpu.memory_space<vmem>>, vector<1x32x1xbf16>
    %73 = vector.shape_cast %72 : vector<1x32x1xbf16> to vector<32x1xbf16>
    %74 = vector.broadcast %73 : vector<32x1xbf16> to vector<32x32xbf16>
    %75 = arith.mulf %71, %74 : vector<32x32xbf16>
    %c8_64 = arith.constant 8 : index
    %c0_65 = arith.constant 0 : index
    %76 = vector.load %arg5[%c8_64, %c0_65] : memref<42x32xbf16, #tpu.memory_space<vmem>>, vector<32x32xbf16>
    %c6_66 = arith.constant 6 : index
    %c0_67 = arith.constant 0 : index
    %c0_68 = arith.constant 0 : index
    %77 = vector.load %arg6[%c6_66, %c0_67, %c0_68] : memref<9x32x1xbf16, #tpu.memory_space<vmem>>, vector<1x32x1xbf16>
    %78 = vector.shape_cast %77 : vector<1x32x1xbf16> to vector<32x1xbf16>
    %79 = vector.broadcast %78 : vector<32x1xbf16> to vector<32x32xbf16>
    %80 = arith.mulf %76, %79 : vector<32x32xbf16>
    %c9_69 = arith.constant 9 : index
    %c0_70 = arith.constant 0 : index
    %81 = vector.load %arg5[%c9_69, %c0_70] : memref<42x32xbf16, #tpu.memory_space<vmem>>, vector<32x32xbf16>
    %c7_71 = arith.constant 7 : index
    %c0_72 = arith.constant 0 : index
    %c0_73 = arith.constant 0 : index
    %82 = vector.load %arg6[%c7_71, %c0_72, %c0_73] : memref<9x32x1xbf16, #tpu.memory_space<vmem>>, vector<1x32x1xbf16>
    %83 = vector.shape_cast %82 : vector<1x32x1xbf16> to vector<32x1xbf16>
    %84 = vector.broadcast %83 : vector<32x1xbf16> to vector<32x32xbf16>
    %85 = arith.mulf %81, %84 : vector<32x32xbf16>
    %c10_74 = arith.constant 10 : index
    %c0_75 = arith.constant 0 : index
    %86 = vector.load %arg5[%c10_74, %c0_75] : memref<42x32xbf16, #tpu.memory_space<vmem>>, vector<32x32xbf16>
    %c8_76 = arith.constant 8 : index
    %c0_77 = arith.constant 0 : index
    %c0_78 = arith.constant 0 : index
    %87 = vector.load %arg6[%c8_76, %c0_77, %c0_78] : memref<9x32x1xbf16, #tpu.memory_space<vmem>>, vector<1x32x1xbf16>
    %88 = vector.shape_cast %87 : vector<1x32x1xbf16> to vector<32x1xbf16>
    %89 = vector.broadcast %88 : vector<32x1xbf16> to vector<32x32xbf16>
    %90 = arith.mulf %86, %89 : vector<32x32xbf16>
    %91 = tpu.concatenate %50, %55, %60, %65, %70, %75, %80, %85, %90 in 1 : vector<32x32xbf16>, vector<32x32xbf16>, vector<32x32xbf16>, vector<32x32xbf16>, vector<32x32xbf16>, vector<32x32xbf16>, vector<32x32xbf16>, vector<32x32xbf16>, vector<32x32xbf16> -> vector<32x288xbf16>
    %c0_79 = arith.constant 0 : index
    %c0_80 = arith.constant 0 : index
    %92 = vector.load %arg3[%c0_79, %c0_80] : memref<288x32xbf16, #tpu.memory_space<vmem>>, vector<288x32xbf16>
    %cst = arith.constant dense<0.000000e+00> : vector<32x32xf32>
    %93 = tpu.matmul %45, %92, %cst {dimension_numbers = #tpu.dot_dimension_numbers<[1], [0], [0], [1], [0, 0, 1, 1], [], []>} : vector<32x288xbf16>, vector<288x32xbf16>, vector<32x32xf32> -> vector<32x32xf32>
    %c0_81 = arith.constant 0 : index
    %c0_82 = arith.constant 0 : index
    %94 = vector.load %arg4[%c0_81, %c0_82] : memref<1x32xf32, #tpu.memory_space<vmem>>, vector<1x32xf32>
    %95 = vector.broadcast %94 : vector<1x32xf32> to vector<32x32xf32>
    %96 = arith.addf %93, %95 : vector<32x32xf32>
    %c0_83 = arith.constant 0 : index
    %c0_84 = arith.constant 0 : index
    %97 = vector.load %arg7[%c0_83, %c0_84] : memref<288x32xbf16, #tpu.memory_space<vmem>>, vector<288x32xbf16>
    %cst_85 = arith.constant dense<0.000000e+00> : vector<32x32xf32>
    %98 = tpu.matmul %91, %97, %cst_85 {dimension_numbers = #tpu.dot_dimension_numbers<[1], [0], [0], [1], [0, 0, 1, 1], [], []>} : vector<32x288xbf16>, vector<288x32xbf16>, vector<32x32xf32> -> vector<32x32xf32>
    %c0_86 = arith.constant 0 : index
    %c0_87 = arith.constant 0 : index
    %99 = vector.load %arg8[%c0_86, %c0_87] : memref<1x32xf32, #tpu.memory_space<vmem>>, vector<1x32xf32>
    %100 = vector.broadcast %99 : vector<1x32xf32> to vector<32x32xf32>
    %101 = arith.addf %98, %100 : vector<32x32xf32>
    %c5_88 = arith.constant 5 : index
    %c0_89 = arith.constant 0 : index
    %102 = vector.load %arg5[%c5_88, %c0_89] : memref<42x32xbf16, #tpu.memory_space<vmem>>, vector<32x32xbf16>
    %c0_90 = arith.constant 0 : index
    %c0_91 = arith.constant 0 : index
    %103 = vector.load %arg9[%c0_90, %c0_91] : memref<32x32xbf16, #tpu.memory_space<vmem>>, vector<32x32xbf16>
    %cst_92 = arith.constant dense<0.000000e+00> : vector<32x32xf32>
    %104 = tpu.matmul %102, %103, %cst_92 {dimension_numbers = #tpu.dot_dimension_numbers<[1], [0], [0], [1], [0, 0, 1, 1], [], []>} : vector<32x32xbf16>, vector<32x32xbf16>, vector<32x32xf32> -> vector<32x32xf32>
    %c0_93 = arith.constant 0 : index
    %c0_94 = arith.constant 0 : index
    %105 = vector.load %arg10[%c0_93, %c0_94] : memref<1x32xf32, #tpu.memory_space<vmem>>, vector<1x32xf32>
    %106 = vector.broadcast %105 : vector<1x32xf32> to vector<32x32xf32>
    %107 = arith.addf %104, %106 : vector<32x32xf32>
    %108 = vector.extract_strided_slice %96 {offsets = [0, 0], sizes = [32, 16], strides = [1, 1]} : vector<32x32xf32> to vector<32x16xf32>
    %109 = arith.truncf %108 : vector<32x16xf32> to vector<32x16xbf16>
    %c0_95 = arith.constant 0 : index
    %c0_96 = arith.constant 0 : index
    %c0_97 = arith.constant 0 : index
    %110 = vector.load %arg11[%c0_95, %c0_96, %c0_97] : memref<2x32x16xbf16, #tpu.memory_space<vmem>>, vector<1x32x16xbf16>
    %111 = vector.shape_cast %110 : vector<1x32x16xbf16> to vector<32x16xbf16>
    %112 = vector.shape_cast %109 : vector<32x16xbf16> to vector<1x32x16xbf16>
    tpu.vector_store %arg11[%c0_95, %c0_96, %c0_97], %112 {strides = array<i32>} : memref<2x32x16xbf16, #tpu.memory_space<vmem>>, vector<1x32x16xbf16>,
    %113 = vector.extract_strided_slice %96 {offsets = [0, 16], sizes = [32, 16], strides = [1, 1]} : vector<32x32xf32> to vector<32x16xf32>
    %114 = arith.truncf %113 : vector<32x16xf32> to vector<32x16xbf16>
    %c1_98 = arith.constant 1 : index
    %c0_99 = arith.constant 0 : index
    %c0_100 = arith.constant 0 : index
    %115 = vector.load %arg11[%c1_98, %c0_99, %c0_100] : memref<2x32x16xbf16, #tpu.memory_space<vmem>>, vector<1x32x16xbf16>
    %116 = vector.shape_cast %115 : vector<1x32x16xbf16> to vector<32x16xbf16>
    %117 = vector.shape_cast %114 : vector<32x16xbf16> to vector<1x32x16xbf16>
    tpu.vector_store %arg11[%c1_98, %c0_99, %c0_100], %117 {strides = array<i32>} : memref<2x32x16xbf16, #tpu.memory_space<vmem>>, vector<1x32x16xbf16>,
    %118 = vector.extract_strided_slice %101 {offsets = [0, 0], sizes = [32, 16], strides = [1, 1]} : vector<32x32xf32> to vector<32x16xf32>
    %119 = arith.truncf %118 : vector<32x16xf32> to vector<32x16xbf16>
    %c0_101 = arith.constant 0 : index
    %c0_102 = arith.constant 0 : index
    %c0_103 = arith.constant 0 : index
    %120 = vector.load %arg12[%c0_101, %c0_102, %c0_103] : memref<2x32x16xbf16, #tpu.memory_space<vmem>>, vector<1x32x16xbf16>
    %121 = vector.shape_cast %120 : vector<1x32x16xbf16> to vector<32x16xbf16>
    %122 = vector.shape_cast %119 : vector<32x16xbf16> to vector<1x32x16xbf16>
    tpu.vector_store %arg12[%c0_101, %c0_102, %c0_103], %122 {strides = array<i32>} : memref<2x32x16xbf16, #tpu.memory_space<vmem>>, vector<1x32x16xbf16>,
    %123 = vector.extract_strided_slice %101 {offsets = [0, 16], sizes = [32, 16], strides = [1, 1]} : vector<32x32xf32> to vector<32x16xf32>
    %124 = arith.truncf %123 : vector<32x16xf32> to vector<32x16xbf16>
    %c1_104 = arith.constant 1 : index
    %c0_105 = arith.constant 0 : index
    %c0_106 = arith.constant 0 : index
    %125 = vector.load %arg12[%c1_104, %c0_105, %c0_106] : memref<2x32x16xbf16, #tpu.memory_space<vmem>>, vector<1x32x16xbf16>
    %126 = vector.shape_cast %125 : vector<1x32x16xbf16> to vector<32x16xbf16>
    %127 = vector.shape_cast %124 : vector<32x16xbf16> to vector<1x32x16xbf16>
    tpu.vector_store %arg12[%c1_104, %c0_105, %c0_106], %127 {strides = array<i32>} : memref<2x32x16xbf16, #tpu.memory_space<vmem>>, vector<1x32x16xbf16>,
    %128 = arith.truncf %107 : vector<32x32xf32> to vector<32x32xbf16>
    %c0_107 = arith.constant 0 : index
    %c0_108 = arith.constant 0 : index
    %129 = vector.load %arg13[%c0_107, %c0_108] : memref<32x32xbf16, #tpu.memory_space<vmem>>, vector<32x32xbf16>
    tpu.vector_store %arg13[%c0_107, %c0_108], %128 {strides = array<i32>} : memref<32x32xbf16, #tpu.memory_space<vmem>>, vector<32x32xbf16>,
    return
  }
  func.func @transform_0(%arg0: i32) -> (i32, i32) {
    %c0_i32 = arith.constant 0 : i32
    %c0_i32_0 = arith.constant 0 : i32
    %c0_i32_1 = arith.constant 0 : i32
    return %c0_i32, %c0_i32_0 : i32, i32
  }
  func.func @transform_1(%arg0: i32) -> (i32, i32, i32) {
    %c0_i32 = arith.constant 0 : i32
    %c0_i32_0 = arith.constant 0 : i32
    %c0_i32_1 = arith.constant 0 : i32
    %c0_i32_2 = arith.constant 0 : i32
    return %c0_i32, %c0_i32_0, %c0_i32_1 : i32, i32, i32
  }
  func.func @transform_2(%arg0: i32) -> (i32, i32) {
    %c0_i32 = arith.constant 0 : i32
    %c0_i32_0 = arith.constant 0 : i32
    %c0_i32_1 = arith.constant 0 : i32
    return %c0_i32, %c0_i32_0 : i32, i32
  }
  func.func @transform_3(%arg0: i32) -> (i32, i32) {
    %c0_i32 = arith.constant 0 : i32
    %c0_i32_0 = arith.constant 0 : i32
    %c0_i32_1 = arith.constant 0 : i32
    return %c0_i32, %c0_i32_0 : i32, i32
  }
  func.func @transform_4(%arg0: i32) -> (i32, i32) {
    %c0_i32 = arith.constant 0 : i32
    %c0_i32_0 = arith.constant 0 : i32
    %c0_i32_1 = arith.constant 0 : i32
    return %c0_i32, %c0_i32_0 : i32, i32
  }
  func.func @transform_5(%arg0: i32) -> (i32, i32, i32) {
    %c0_i32 = arith.constant 0 : i32
    %c0_i32_0 = arith.constant 0 : i32
    %c0_i32_1 = arith.constant 0 : i32
    %c0_i32_2 = arith.constant 0 : i32
    return %c0_i32, %c0_i32_0, %c0_i32_1 : i32, i32, i32
  }
  func.func @transform_6(%arg0: i32) -> (i32, i32) {
    %c0_i32 = arith.constant 0 : i32
    %c0_i32_0 = arith.constant 0 : i32
    %c0_i32_1 = arith.constant 0 : i32
    return %c0_i32, %c0_i32_0 : i32, i32
  }
  func.func @transform_7(%arg0: i32) -> (i32, i32) {
    %c0_i32 = arith.constant 0 : i32
    %c0_i32_0 = arith.constant 0 : i32
    %c0_i32_1 = arith.constant 0 : i32
    return %c0_i32, %c0_i32_0 : i32, i32
  }
  func.func @transform_8(%arg0: i32) -> (i32, i32) {
    %c0_i32 = arith.constant 0 : i32
    %c0_i32_0 = arith.constant 0 : i32
    %c0_i32_1 = arith.constant 0 : i32
    return %c0_i32, %c0_i32_0 : i32, i32
  }
  func.func @transform_9(%arg0: i32) -> (i32, i32) {
    %c0_i32 = arith.constant 0 : i32
    %c0_i32_0 = arith.constant 0 : i32
    %c0_i32_1 = arith.constant 0 : i32
    return %c0_i32, %c0_i32_0 : i32, i32
  }
  func.func @transform_10(%arg0: i32) -> (i32, i32, i32) {
    %c0_i32 = arith.constant 0 : i32
    %c0_i32_0 = arith.constant 0 : i32
    %c0_i32_1 = arith.constant 0 : i32
    %c0_i32_2 = arith.constant 0 : i32
    return %c0_i32, %c0_i32_0, %c0_i32_1 : i32, i32, i32
  }
  func.func @transform_11(%arg0: i32) -> (i32, i32, i32) {
    %c0_i32 = arith.constant 0 : i32
    %c0_i32_0 = arith.constant 0 : i32
    %c0_i32_1 = arith.constant 0 : i32
    %c0_i32_2 = arith.constant 0 : i32
    return %c0_i32, %c0_i32_0, %c0_i32_1 : i32, i32, i32
  }
  func.func @transform_12(%arg0: i32) -> (i32, i32) {
    %c0_i32 = arith.constant 0 : i32
    %c0_i32_0 = arith.constant 0 : i32
    %c0_i32_1 = arith.constant 0 : i32
    return %c0_i32, %c0_i32_0 : i32, i32
  }
}

</mosaic_0001>

<bundles_post_ra>
// kernel: cross_attention_douple_forward.3
= control target key start
LH: loop header
LB: loop body
LE: loop exit
PB: predicated region body
PF: predicated region fallthrough
CT: control target
= control target key end

     0   :  { %s2258_s18 = smov 0   ;;  %s2475_s0 = inlined_call_operand.vmem [shape: bf16[2,32,16], index: 0, kind: input, shape index: {}]   ;;  %s2476_s1 = inlined_call_operand.vmem [shape: bf16[2,32,16], index: 1, kind: input, shape index: {}]   ;;  %s2477_s2 = inlined_call_operand.vmem [shape: bf16[32,32], index: 2, kind: input, shape index: {}]   ;;  %s2478_s3 = inlined_call_operand.vmem [shape: f32[32,32], index: 3, kind: input, shape index: {}]   ;;  %s2479_s4 = inlined_call_operand.vmem [shape: bf16[2,32,32], index: 4, kind: input, shape index: {}]   ;;  %s2480_s5 = inlined_call_operand.vmem [shape: f32[2,1,32], index: 5, kind: input, shape index: {}]   ;;  %s2481_s6 = inlined_call_operand.vmem [shape: f32[2,1,32], index: 6, kind: input, shape index: {}]   ;;  %s2482_s7 = inlined_call_operand.vmem [shape: f32[2,1,32], index: 7, kind: input, shape index: {}]   ;;  %s2483_s8 = inlined_call_operand.vmem [shape: bf16[2,32,64], index: 8, kind: input, shape index: {}]   ;;  %s2484_s9 = inlined_call_operand.vmem [shape: f32[2,1,64], index: 9, kind: input, shape index: {}]   ;;  %s2485_s10 = inlined_call_operand.vmem [shape: bf16[2,64,32], index: 10, kind: input, shape index: {}]   ;;  %s2486_s11 = inlined_call_operand.vmem [shape: f32[2,1,32], index: 11, kind: input, shape index: {}]   ;;  %s2487_s12 = inlined_call_operand.vmem [shape: f32[2,1,32], index: 12, kind: input, shape index: {}]   ;;  %s2488_s13 = inlined_call_operand.vmem [shape: f32[2,1,32], index: 13, kind: input, shape index: {}]   ;;  %s2489_s14 = inlined_call_operand.vmem [shape: f32[2,32,32], index: 14, kind: output, shape index: {0}]   ;;  %s2490_s15 = inlined_call_operand.vmem [shape: bf16[2,2,2,16,16], index: 15, kind: output, shape index: {1}]  }
   0x1 LB: > { %s1889_s19 = sadd.s32 4294967295, %s2171_s18   ;;  %p1893_p0 = scmp.ge.s32.totalorder %s2171_s18, 1  ;;  %s2171_s18 = sphi %s2258_s18, %s26_s18  }
   0x2   : > { %p536_p1 = scmp.lt.s32.totalorder %s2171_s18, 3 }
   0x4   : > { %p537_p2 = pnand %p1893_p0, %p536_p1 }
   0x5   : > { %p630_p3 = scmp.lt.s32.totalorder (!%p537_p2), %s1889_s19, 1  ;;  %v2173_v0 = vmov (!%p537_p2), 0.0   ;;  %vm2174_vm0 = vmmov (!%p537_p2), 0   ;;  %vm709_vm1 = vcmask (!%p537_p2), 64512   ;;  %vm814_vm2 = vcmask (!%p537_p2), 130048   ;;  %s2175_s27 = smov (!%p537_p2), 120  }
   0x6   : > { %540 = sbr.rel (%p537_p2) target bundleno = 2785 (0xae1), region = 76  ;;  %2004 = vmatprep.subr.bf16.mxu1 (!%p537_p2), %v2173_v0  ;;  %2006 = vmatprep.mubr.msk.bf16.mxu1 (!%p537_p2), %vm2174_vm0, %v2173_v0  ;;  %v2305_v34 = vld [vmem:[%s2477_s2] sm:$0xff] (!%p537_p2)   ;;  %v2313_v40 = vld [vmem:[%s2477_s2 + $0x8] sm:$0xff] (!%p537_p2)   ;;  %vm867_vm3 = vcmask (!%p537_p2), 125952   ;;  %s2176_s24 = smov (!%p537_p2), 112   ;;  %vm1288_vm4 = vcmask (!%p537_p2), 261120  }
   0x7   : > { %2016 = vmatprep.subr.bf16.mxu0 (!%p537_p2), %v2173_v0  ;;  %2018 = vmatprep.mubr.msk.bf16.mxu0 (!%p537_p2), %vm2174_vm0, %v2173_v0  ;;  %s2177_s28 = smov (!%p537_p2), 16   ;;  %vm1552_vm5 = vcmask (!%p537_p2), 523264  }
   0x8   : > { %2017 = vmatpush3.bf16.msra.mxu0 (!%p537_p2), %v2305_v34 }
   0x9   : > { %2028 = vmatprep.subr.bf16.mxu0 (!%p537_p2), %v2173_v0 }
   0xd   : > { %s2492_s19 = smov (!%p630_p3, %s1889_s19), 1 }
   0xe   : > { %s2275_s20 = sshll.u32 %s2492_s19, 4  ;;  %s2318_s17 = sshll.u32 %s2492_s19, 5 }
   0xf   : > { %s639_s23 = scalar_lea.vmem %s2476_s1, %s2275_s20  ;;  %s634_s26 = scalar_lea.vmem %s2475_s0, %s2275_s20 }
  0x10   : > { %v2103_v1 = vld [vmem:[%s639_s23] sm:$0xff]   ;;  %v2105_v3 = vld [vmem:[%s639_s23 + $0x8] sm:$0xff]   ;;  %s2324_s23 = scalar_lea.vmem %s2490_s15, %s2318_s17  ;;  %s647_s16 = scalar_lea.vmem %s2480_s5, %s2492_s19 }
  0x11   : > { %v714_v2 = vsel %vm709_vm1, %v2103_v1, 0  ;;  %v2104_v4 = vld [vmem:[%s634_s26] sm:$0xff]   ;;  %v771_v5 = vsel %vm709_vm1, %v2105_v3, 0  ;;  %v2106_v6 = vld [vmem:[%s634_s26 + $0x8] sm:$0xff]   ;;  %s650_s25 = scalar_lea.vmem %s2481_s6, %s2492_s19 }
  0x12   : > { %2005 = vmatpush3.bf16.xpose.msra.mxu1 %v714_v2 }
  0x13   : > { %2010 = vmatprep.subr.bf16.mxu1 %v2173_v0 }
  0x19   : > { %2007 = vmatmul.mubr.msk.bf16.vlgmr.msra.gmra.mrb[0].mxu1 %vm709_vm1, %v2104_v4 }
  0x1a   : > { %2011 = vmatpush3.bf16.xpose.msra.mxu1 %v771_v5  ;;  %2012 = vmatprep.mubr.msk.bf16.mxu1 %vm2174_vm0, %v2173_v0 }
  0x1b   : > { %2022 = vmatprep.subr.bf16.mxu1 %v2173_v0 }
  0x21   : > { %2013 = vmatmul.mubr.msk.bf16.vlgmr.msra.gmra.mrb[4].mxu1 %vm709_vm1, %v2106_v6 }
  0x22   : > { %2024 = vmatprep.mubr.msk.bf16.mxu1 %vm2174_vm0, %v2173_v0  ;;  %2023 = vmatpush3.bf16.msra.mxu1 %v2313_v40 }
  0x23   : > { %2034 = vmatprep.subr.bf16.mxu1 %v2173_v0 }
  0xec   : > { %v750_v7 = vpop.f32.mrb[0].mxu1 }
  0xed   : > { %v2008_v8 = vpop.f32.mrb[1].mxu1  ;;  %v815_v9 = vsel %vm814_vm2, %v750_v7, -inf }
  0xee   : > { %816 = vmax.xlane.f32.xlu0 %v815_v9  ;;  %v753_v10 = vpop.f32.mrb[2].mxu1 }
  0xef   : > { %v2009_v11 = vpop.f32.mrb[3].mxu1  ;;  %v818_v12 = vsel %vm814_vm2, %v753_v10, -inf }
  0xf2   : > { %819 = vmax.xlane.f32.xlu0 %v818_v12 }
  0xf4   : > { %v807_v13 = vpop.f32.mrb[4].mxu1 }
  0xf5   : > { %v821_v14 = vsel %vm814_vm2, %v807_v13, -inf  ;;  %v2014_v15 = vpop.f32.mrb[5].mxu1 }
  0xf6   : > { %822 = vmax.xlane.f32.xlu1 %v821_v14  ;;  %v810_v16 = vpop.f32.mrb[6].mxu1 }
  0xf7   : > { %v824_v17 = vsel %vm814_vm2, %v810_v16, -inf  ;;  %v2015_v18 = vpop.f32.mrb[7].mxu1 }
  0xfa   : > { %825 = vmax.xlane.f32.xlu1 %v824_v17 }
 0x17b   : > { %v817_v19 = vpop.xlane.xlu0 %816 }
 0x17c   : > { %v827_v20 = vsub.f32 %v750_v7, %v817_v19 }
 0x17e   : > { %v831_v21 = vmul.f32 1.442695, %v827_v20 }
 0x17f   : > { %v820_v22 = vpop.xlane.xlu0 %819 }
 0x180   : > { %2117 = vpow2.f32 %v831_v21  ;;  %v828_v23 = vsub.f32 %v753_v10, %v820_v22 }
 0x182   : > { %v833_v24 = vmul.f32 1.442695, %v828_v23 }
 0x183   : > { %v823_v25 = vpop.xlane.xlu1 %822 }
 0x184   : > { %2119 = vpow2.f32 %v833_v24  ;;  %v829_v26 = vsub.f32 %v807_v13, %v823_v25 }
 0x186   : > { %v835_v27 = vmul.f32 1.442695, %v829_v26 }
 0x187   : > { %v826_v35 = vpop.xlane.xlu1 %825 }
 0x188   : > { %2121 = vpow2.f32 %v835_v27  ;;  %v830_v36 = vsub.f32 %v810_v16, %v826_v35 }
 0x18a   : > { %v2118_v28 = vpop.eup %2117  ;;  %v837_v37 = vmul.f32 1.442695, %v830_v36 }
 0x18b   : > { %v839_v29 = vsel %vm814_vm2, %v2118_v28, 0.0 }
 0x18c   : > { %840 = vadd.xlane.f32.xlu0 %v839_v29  ;;  %2123 = vpow2.f32 %v837_v37 }
 0x18e   : > { %v2120_v30 = vpop.eup %2119 }
 0x18f   : > { %v842_v31 = vsel %vm814_vm2, %v2120_v30, 0.0 }
 0x190   : > { %843 = vadd.xlane.f32.xlu1 %v842_v31 }
 0x192   : > { %v2122_v32 = vpop.eup %2121 }
 0x193   : > { %v845_v33 = vsel %vm814_vm2, %v2122_v32, 0.0 }
 0x194   : > { %846 = vadd.xlane.f32.xlu0 %v845_v33 }
 0x196   : > { %v2124_v38 = vpop.eup %2123 }
 0x197   : > { %v848_v39 = vsel %vm814_vm2, %v2124_v38, 0.0 }
 0x1a1   : > { %1034 = vrot.lane.b32.xlu1 %v2105_v3, %s2175_s27 }
 0x1aa   : > { %983 = vrot.lane.b32.xlu0 %v2103_v1, %s2175_s27 }
 0x1c5   : > { %849 = vadd.xlane.f32.xlu1 %v848_v39 }
 0x1d6   : > { %981 = vrot.lane.b32.xlu1 %v2104_v4, %s2175_s27 }
 0x1da   : > { %1032 = vrot.lane.b32.xlu1 %v2106_v6, %s2175_s27  ;;  %s644_s27 = scalar_lea.vmem %s2479_s4, %s2275_s20 }
 0x219   : > { %v841_v41 = vpop.xlane.xlu0 %840 }
 0x21a   : > { %2125 = vrcp.f32 %v841_v41 }
 0x21d   : > { %v844_v42 = vpop.xlane.xlu1 %843 }
 0x21e   : > { %2127 = vrcp.f32 %v844_v42 }
 0x221   : > { %v847_v43 = vpop.xlane.xlu0 %846  ;;  %v1035_v56 = vpop.permute.xlu1 %1034 }
 0x222   : > { %2129 = vrcp.f32 %v847_v43  ;;  %v1040_v63 = vsel %vm709_vm1, %v1035_v56, 0 }
 0x224   : > { %v2126_v44 = vpop.eup %2125 }
 0x225   : > { %v855_v45 = vmul.f32 %v2126_v44, %v2118_v28  ;;  %v984_v48 = vpop.permute.xlu0 %983 }
 0x226   : > { %v989_v52 = vsel %vm709_vm1, %v984_v48, 0 }
 0x227   : > { %v1966_v46 = vpack.c.bf16 %v855_v45, %v855_v45 }
 0x228   : > { %v2128_v47 = vpop.eup %2127 }
 0x229   : > { %v856_v49 = vmul.f32 %v2128_v47, %v2120_v30  ;;  %868 = vst.msk [vmem:[%s2324_s23] sm:$0xf] %vm867_vm3, %v1966_v46 }
 0x22b   : > { %v859_v50 = vpack.c.bf16 %v856_v49, %v855_v45  ;;  %v1967_v51 = vpack.c.bf16 %v856_v49, %v856_v49 }
 0x22c   : > { %v2130_v53 = vpop.eup %2129 }
 0x22d   : > { %v857_v54 = vmul.f32 %v2130_v53, %v2122_v32  ;;  %869 = vst.msk [vmem:[%s2324_s23 + $0x4] sm:$0xf] %vm867_vm3, %v1967_v51  ;;  %2019 = vmatmul.mubr.msk.bf16.vlgmr.msra.gmra.mrb[0].mxu0 %vm814_vm2, %v859_v50 }
 0x22e   : > { %2029 = vmatpush3.bf16.xpose.msra.mxu0 %v989_v52  ;;  %2030 = vmatprep.mubr.msk.bf16.mxu0 %vm2174_vm0, %v2173_v0 }
 0x22f   : > { %v1968_v55 = vpack.c.bf16 %v857_v54, %v857_v54  ;;  %2040 = vmatprep.subr.bf16.mxu0 %v2173_v0 }
 0x231   : > { %1918 = vst.msk [vmem:[%s2324_s23 + $0x10] sm:$0xf] %vm867_vm3, %v1968_v55 }
 0x252   : > { %v850_v57 = vpop.xlane.xlu1 %849 }
 0x253   : > { %2131 = vrcp.f32 %v850_v57 }
 0x256   : > { %v982_v58 = vpop.permute.xlu1 %981 }
 0x257   : > { %2031 = vmatmul.mubr.msk.bf16.vlgmr.msra.gmra.mrb[4].mxu0 %vm709_vm1, %v982_v58 }
 0x258   : > { %2042 = vmatprep.mubr.msk.bf16.mxu0 %vm2174_vm0, %v2173_v0 }
 0x25a   : > { %v1033_v1 = vpop.permute.xlu1 %1032 }
 0x25d   : > { %v2132_v59 = vpop.eup %2131 }
 0x25e   : > { %v858_v60 = vmul.f32 %v2132_v59, %v2124_v38 }
 0x260   : > { %v1969_v61 = vpack.c.bf16 %v858_v60, %v858_v60  ;;  %v870_v62 = vpack.c.bf16 %v858_v60, %v857_v54 }
 0x262   : > { %1919 = vst.msk [vmem:[%s2324_s23 + $0x14] sm:$0xf] %vm867_vm3, %v1969_v61  ;;  %2025 = vmatmul.mubr.msk.bf16.vlgmr.msra.gmra.mrb[8].mxu1 %vm814_vm2, %v870_v62  ;;  %v2109_v61 = vld [vmem:[%s644_s27] sm:$0xff]  }
 0x263   : > { %2035 = vmatpush3.bf16.xpose.msra.mxu1 %v1040_v63  ;;  %2036 = vmatprep.mubr.msk.bf16.mxu1 %vm2174_vm0, %v2173_v0 }
 0x264   : > { %2046 = vmatprep.subr.bf16.mxu1 %v2173_v0 }
 0x26a   : > { %2037 = vmatmul.mubr.msk.bf16.vlgmr.msra.gmra.mrb[12].mxu1 %vm709_vm1, %v1033_v1 }
 0x26b   : > { %2048 = vmatprep.mubr.msk.bf16.mxu1 %vm2174_vm0, %v2173_v0 }
 0x300   : > { %v2350_v2 = vpop.f32.mrb[0].mxu0 }
 0x301   : > { %v2020_v3 = vpop.f32.mrb[1].mxu0 }
 0x302   : > { %v2352_v4 = vpop.f32.mrb[2].mxu0 }
 0x303   : > { %v2021_v5 = vpop.f32.mrb[3].mxu0 }
 0x32a   : > { %v1025_v6 = vpop.f32.mrb[4].mxu0 }
 0x32b   : > { %v2032_v7 = vpop.f32.mrb[5].mxu0  ;;  %v1083_v8 = vsel %vm814_vm2, %v1025_v6, -inf }
 0x32c   : > { %1084 = vmax.xlane.f32.xlu0 %v1083_v8  ;;  %v1028_v9 = vpop.f32.mrb[6].mxu0 }
 0x32d   : > { %v1086_v10 = vsel %vm814_vm2, %v1028_v9, -inf  ;;  %v2033_v11 = vpop.f32.mrb[7].mxu0 }
 0x32e   : > { %1087 = vmax.xlane.f32.xlu1 %v1086_v10 }
 0x335   : > { %v2356_v12 = vpop.f32.mrb[8].mxu1 }
 0x336   : > { %v2026_v13 = vpop.f32.mrb[9].mxu1 }
 0x337   : > { %v2358_v0 = vpop.f32.mrb[10].mxu1 }
 0x338   : > { %v2027_v14 = vpop.f32.mrb[11].mxu1 }
 0x33d   : > { %v1076_v15 = vpop.f32.mrb[12].mxu1 }
 0x33e   : > { %v2038_v16 = vpop.f32.mrb[13].mxu1  ;;  %v1089_v17 = vsel %vm814_vm2, %v1076_v15, -inf }
 0x33f   : > { %1090 = vmax.xlane.f32.xlu0 %v1089_v17  ;;  %v1079_v18 = vpop.f32.mrb[14].mxu1 }
 0x340   : > { %v2039_v19 = vpop.f32.mrb[15].mxu1  ;;  %v1092_v20 = vsel %vm814_vm2, %v1079_v18, -inf }
 0x343   : > { %1093 = vmax.xlane.f32.xlu0 %v1092_v20 }
 0x3b9   : > { %v1085_v21 = vpop.xlane.xlu0 %1084 }
 0x3ba   : > { %v1095_v22 = vsub.f32 %v1025_v6, %v1085_v21  ;;  %v2110_v6 = vld [vmem:[%s644_s27 + $0x8] sm:$0xff]  }
 0x3bb   : > { %v1088_v23 = vpop.xlane.xlu1 %1087 }
 0x3bc   : > { %v1099_v24 = vmul.f32 1.442695, %v1095_v22  ;;  %v1096_v25 = vsub.f32 %v1028_v9, %v1088_v23 }
 0x3be   : > { %2133 = vpow2.f32 %v1099_v24  ;;  %v1101_v26 = vmul.f32 1.442695, %v1096_v25 }
 0x3c0   : > { %2135 = vpow2.f32 %v1101_v26  ;;  %v1344_v26 = vld [vmem:[%s2478_s3] sm:$0xff] }
 0x3c8   : > { %v2134_v27 = vpop.eup %2133 }
 0x3c9   : > { %v1107_v28 = vsel %vm814_vm2, %v2134_v27, 0.0 }
 0x3ca   : > { %v2136_v29 = vpop.eup %2135  ;;  %1108 = vadd.xlane.f32.xlu0 %v1107_v28 }
 0x3cb   : > { %v1110_v30 = vsel %vm814_vm2, %v2136_v29, 0.0 }
 0x3cc   : > { %1111 = vadd.xlane.f32.xlu1 %v1110_v30  ;;  %v1091_v31 = vpop.xlane.xlu0 %1090  ;;  %v1346_v30 = vld [vmem:[%s2478_s3 + $0x10] sm:$0xff] }
 0x3cd   : > { %v1097_v32 = vsub.f32 %v1076_v15, %v1091_v31 }
 0x3cf   : > { %v1103_v33 = vmul.f32 1.442695, %v1097_v32 }
 0x3d0   : > { %v1094_v35 = vpop.xlane.xlu0 %1093 }
 0x3d1   : > { %2137 = vpow2.f32 %v1103_v33  ;;  %v1098_v36 = vsub.f32 %v1079_v18, %v1094_v35 }
 0x3d3   : > { %v1105_v37 = vmul.f32 1.442695, %v1098_v36 }
 0x3d5   : > { %2139 = vpow2.f32 %v1105_v37 }
 0x3db   : > { %v2138_v38 = vpop.eup %2137 }
 0x3dc   : > { %v1113_v39 = vsel %vm814_vm2, %v2138_v38, 0.0 }
 0x3dd   : > { %1114 = vadd.xlane.f32.xlu0 %v1113_v39 }
 0x3df   : > { %v2140_v41 = vpop.eup %2139 }
 0x3e0   : > { %v1116_v42 = vsel %vm814_vm2, %v2140_v41, 0.0 }
 0x3e1   : > { %1117 = vadd.xlane.f32.xlu1 %v1116_v42 }
 0x3f2   : > { %1196 = vrot.lane.b32.xlu1 %v2313_v40, %s2176_s24 }
 0x3f3   : > { %1149 = vrot.lane.b32.xlu0 %v2305_v34, %s2176_s24 }
 0x457   : > { %v1109_v43 = vpop.xlane.xlu0 %1108 }
 0x458   : > { %2141 = vrcp.f32 %v1109_v43 }
 0x459   : > { %v1112_v44 = vpop.xlane.xlu1 %1111 }
 0x45a   : > { %2143 = vrcp.f32 %v1112_v44 }
 0x462   : > { %v2142_v45 = vpop.eup %2141 }
 0x463   : > { %v1123_v46 = vmul.f32 %v2142_v45, %v2134_v27 }
 0x464   : > { %v2144_v47 = vpop.eup %2143 }
 0x465   : > { %v1970_v48 = vpack.c.bf16 %v1123_v46, %v1123_v46  ;;  %v1124_v49 = vmul.f32 %v2144_v47, %v2136_v29 }
 0x467   : > { %1928 = vst.msk [vmem:[%s2324_s23 + $0x8] sm:$0xf] %vm867_vm3, %v1970_v48  ;;  %v1971_v50 = vpack.c.bf16 %v1124_v49, %v1124_v49  ;;  %v1127_v52 = vpack.c.bf16 %v1124_v49, %v1123_v46 }
 0x469   : > { %1929 = vst.msk [vmem:[%s2324_s23 + $0xc] sm:$0xf] %vm867_vm3, %v1971_v50 }
 0x46a   : > { %v1115_v51 = vpop.xlane.xlu0 %1114 }
 0x46b   : > { %2145 = vrcp.f32 %v1115_v51 }
 0x46e   : > { %v1118_v40 = vpop.xlane.xlu1 %1117  ;;  %v1150_v34 = vpop.permute.xlu0 %1149 }
 0x46f   : > { %2147 = vrcp.f32 %v1118_v40  ;;  %2041 = vmatpush3.bf16.msra.mxu0 %v1150_v34 }
 0x470   : > { %2052 = vmatprep.subr.bf16.mxu0 %v2109_v61 }
 0x472   : > { %2043 = vmatmul.mubr.msk.bf16.vlgmr.msra.gmra.mrb[8].mxu0 %vm814_vm2, %v1127_v52  ;;  %v1197_v53 = vpop.permute.xlu1 %1196 }
 0x473   : > { %2047 = vmatpush3.bf16.msra.mxu1 %v1197_v53  ;;  %2053 = vmatpush3.bf16.msra.mxu0 %v2109_v61 }
 0x474   : > { %2054 = vmatprep.subr.bf16.mxu0 %v2110_v6 }
 0x475   : > { %v2146_v54 = vpop.eup %2145 }
 0x476   : > { %v1125_v55 = vmul.f32 %v2146_v54, %v2138_v38  ;;  %v1347_v38 = vld [vmem:[%s2478_s3 + $0x18] sm:$0xff] }
 0x477   : > { %2055 = vmatpush3.bf16.msra.mxu0 %v2110_v6 }
 0x478   : > { %v1972_v56 = vpack.c.bf16 %v1125_v55, %v1125_v55 }
 0x479   : > { %v2148_v57 = vpop.eup %2147 }
 0x47a   : > { %1932 = vst.msk [vmem:[%s2324_s23 + $0x18] sm:$0xf] %vm867_vm3, %v1972_v56  ;;  %v1126_v58 = vmul.f32 %v2148_v57, %v2140_v41 }
 0x47c   : > { %v1973_v59 = vpack.c.bf16 %v1126_v58, %v1126_v58  ;;  %v1138_v60 = vpack.c.bf16 %v1126_v58, %v1125_v55 }
 0x47e   : > { %1933 = vst.msk [vmem:[%s2324_s23 + $0x1c] sm:$0xf] %vm867_vm3, %v1973_v59  ;;  %2049 = vmatmul.mubr.msk.bf16.vlgmr.msra.gmra.mrb[16].mxu1 %vm814_vm2, %v1138_v60  ;;  %s2424_s23 = scalar_lea.vmem %s2485_s10, %s2318_s17 }
 0x545   : > { %v1189_v62 = vpop.f32.mrb[8].mxu0 }
 0x546   : > { %v2044_v63 = vpop.f32.mrb[9].mxu0 }
 0x547   : > { %v1192_v1 = vpop.f32.mrb[10].mxu0 }
 0x548   : > { %v2093_v3 = vpack.i.bf16 %v1192_v1, %v1189_v62  ;;  %v2045_v5 = vpop.f32.mrb[11].mxu0  ;;  %v2113_v1 = vld [vmem:[%s2424_s23] sm:$0xff]  }
 0x549   : > { %2068 = vmatprep.subr.bf16.mxu0 %v2113_v1 }
 0x54a   : > { %2094 = vrot.lane.b32.xlu1 %v2093_v3, %s2177_s28  ;;  %v2114_v3 = vld [vmem:[%s2424_s23 + $0x8] sm:$0xff]  }
 0x551   : > { %v1236_v7 = vpop.f32.mrb[16].mxu1 }
 0x552   : > { %v2050_v8 = vpop.f32.mrb[17].mxu1 }
 0x553   : > { %v1239_v9 = vpop.f32.mrb[18].mxu1 }
 0x554   : > { %v2098_v10 = vpack.i.bf16 %v1239_v9, %v1236_v7  ;;  %v2051_v11 = vpop.f32.mrb[19].mxu1 }
 0x556   : > { %2099 = vrot.lane.b32.xlu1 %v2098_v10, %s2177_s28  ;;  %s653_s28 = scalar_lea.vmem %s2482_s7, %s2492_s19 }
 0x5bc   : > { %v2095_v13 = vpop.permute.xlu1 %2094 }
 0x5bd   : > { %v2097_v14 = vunpack.i.h.bf16 %v2095_v13  ;;  %v2096_v15 = vunpack.i.l.bf16 %v2095_v13 }
 0x5bf   : > { %v1260_v16 = vsel %vm814_vm2, %v2352_v4, %v2097_v14  ;;  %v1259_v17 = vsel %vm814_vm2, %v2350_v2, %v2096_v15  ;;  %v1936_v2 = vld [vmem:[%s647_s16] ss:$0 sm:$0xff]  ;;  %s658_s16 = scalar_lea.vmem %s2483_s8, %s2275_s20 }
 0x5c0   : > { %v1263_v18 = vpack.c.bf16 %v1260_v16, %v1259_v17  ;;  %v2111_v62 = vld [vmem:[%s658_s16] sm:$0xff]   ;;  %v2112_v63 = vld [vmem:[%s658_s16 + $0x8] sm:$0xff]   ;;  %s661_s16 = scalar_lea.vmem %s2484_s9, %s2492_s19 }
 0x5c1   : > { %2060 = vmatprep.subr.bf16.mxu1 %v2111_v62 }
 0x5c2   : > { %2056 = vmatprep.mubr.msk.bf16.mxu0 %vm1288_vm4, %v1263_v18  ;;  %2061 = vmatpush3.bf16.msra.mxu1 %v2111_v62 }
 0x5c3   : > { %2062 = vmatprep.subr.bf16.mxu1 %v2112_v63 }
 0x5c6   : > { %2063 = vmatpush3.bf16.msra.mxu1 %v2112_v63 }
 0x5c8   : > { %v2100_v19 = vpop.permute.xlu1 %2099 }
 0x5c9   : > { %v2102_v20 = vunpack.i.h.bf16 %v2100_v19  ;;  %v2101_v21 = vunpack.i.l.bf16 %v2100_v19  ;;  %v1941_v19 = vld [vmem:[%s650_s25] ss:$0 sm:$0xff]  ;;  %s672_s25 = scalar_lea.vmem %s2487_s12, %s2492_s19 }
 0x5cb   : > { %v1262_v22 = vsel %vm814_vm2, %v2358_v0, %v2102_v20  ;;  %v1261_v23 = vsel %vm814_vm2, %v2356_v12, %v2101_v21  ;;  %v1345_v12 = vld [vmem:[%s2478_s3 + $0x8] sm:$0xff] }
 0x5cc   : > { %v1264_v24 = vpack.c.bf16 %v1262_v22, %v1261_v23 }
 0x5ce   : > { %2057 = vmatmul.mubr.msk.bf16.vlgmr.msra.gmra.mrb[12].mxu0 %vm1288_vm4, %v1264_v24 }
 0x5cf   : > { %2069 = vmatpush3.bf16.msra.mxu0 %v2113_v1 }
 0x5d0   : > { %2070 = vmatprep.subr.bf16.mxu0 %v2114_v3 }
 0x5d3   : > { %2071 = vmatpush3.bf16.msra.mxu0 %v2114_v3 }
 0x6a1   : > { %v2058_v4 = vpop.f32.mrb[12].mxu0 }
 0x6a2   : > { %v1329_v25 = vpop.f32.mrb[13].mxu0  ;;  %v1338_v27 = vadd.f32 %v2058_v4, %v1936_v2 }
 0x6a3   : > { %v1330_v28 = vadd.f32 %v1936_v2, %v1329_v25  ;;  %v2059_v0 = vpop.f32.mrb[14].mxu0 }
 0x6a4   : > { %v1332_v29 = vpop.f32.mrb[15].mxu0  ;;  %v1341_v33 = vadd.f32 %v2059_v0, %v1936_v2  ;;  %v1350_v37 = vadd.f32 %v1346_v30, %v1338_v27 }
 0x6a5   : > { %v1333_v31 = vadd.f32 %v1936_v2, %v1332_v29  ;;  %v1348_v32 = vadd.f32 %v1344_v26, %v1330_v28  ;;  %v1942_v2 = vld [vmem:[%s653_s28] ss:$0 sm:$0xff]  ;;  %s675_s28 = scalar_lea.vmem %s2488_s13, %s2492_s19 }
 0x6a6   : > { %v1358_v41 = vsel %vm1288_vm4, %v1350_v37, 0.0  ;;  %v1351_v42 = vadd.f32 %v1347_v38, %v1341_v33 }
 0x6a7   : > { %v1352_v35 = vsel %vm1288_vm4, %v1348_v32, 0.0  ;;  %v1349_v36 = vadd.f32 %v1345_v12, %v1333_v31 }
 0x6a8   : > { %1353 = vadd.xlane.f32.xlu0 %v1352_v35  ;;  %v1361_v43 = vsel %vm1288_vm4, %v1351_v42, 0.0  ;;  %v2115_v35 = vld [vmem:[%s2424_s23 + $0x10] sm:$0xff]  }
 0x6a9   : > { %v1355_v39 = vsel %vm1288_vm4, %v1349_v36, 0.0  ;;  %2072 = vmatprep.subr.bf16.mxu0 %v2115_v35 }
 0x6aa   : > { %1356 = vadd.xlane.f32.xlu1 %v1355_v39  ;;  %2073 = vmatpush3.bf16.msra.mxu0 %v2115_v35 }
 0x6ac   : > { %1359 = vadd.xlane.f32.xlu0 %v1358_v41 }
 0x6b0   : > { %1362 = vadd.xlane.f32.xlu0 %v1361_v43 }
 0x735   : > { %v1354_v44 = vpop.xlane.xlu0 %1353 }
 0x736   : > { %v1365_v45 = vmul.f32 0.03125, %v1354_v44 }
 0x737   : > { %v1357_v46 = vpop.xlane.xlu1 %1356 }
 0x738   : > { %v1369_v47 = vsub.f32 %v1348_v32, %v1365_v45  ;;  %v1366_v48 = vmul.f32 0.03125, %v1357_v46 }
 0x739   : > { %v1360_v49 = vpop.xlane.xlu0 %1359 }
 0x73a   : > { %v1370_v50 = vsub.f32 %v1349_v36, %v1366_v48  ;;  %v1367_v51 = vmul.f32 0.03125, %v1360_v49  ;;  %v1373_v40 = vmul.f32 %v1369_v47, %v1369_v47  ;;  %v2116_v36 = vld [vmem:[%s2424_s23 + $0x18] sm:$0xff]   ;;  %s669_s23 = scalar_lea.vmem %s2486_s11, %s2492_s19 }
 0x73b   : > { %2074 = vmatprep.subr.bf16.mxu0 %v2116_v36 }
 0x73c   : > { %v1371_v34 = vsub.f32 %v1350_v37, %v1367_v51  ;;  %v1377_v52 = vsel %vm1288_vm4, %v1373_v40, 0.0  ;;  %v1374_v53 = vmul.f32 %v1370_v50, %v1370_v50  ;;  %2075 = vmatpush3.bf16.msra.mxu0 %v2116_v36  ;;  %v1943_v37 = vld [vmem:[%s661_s16] ss:$0 sm:$0xff]  ;;  %s680_s16 = scalar_lea.vmem %s2489_s14, %s2318_s17 }
 0x73d   : > { %1378 = vadd.xlane.f32.xlu0 %v1377_v52  ;;  %v1363_v54 = vpop.xlane.xlu0 %1362 }
 0x73e   : > { %v1368_v55 = vmul.f32 0.03125, %v1363_v54  ;;  %v1380_v56 = vsel %vm1288_vm4, %v1374_v53, 0.0  ;;  %v1375_v57 = vmul.f32 %v1371_v34, %v1371_v34 }
 0x73f   : > { %1381 = vadd.xlane.f32.xlu1 %v1380_v56 }
 0x740   : > { %v1372_v58 = vsub.f32 %v1351_v42, %v1368_v55  ;;  %v1383_v59 = vsel %vm1288_vm4, %v1375_v57, 0.0 }
 0x741   : > { %1384 = vadd.xlane.f32.xlu0 %v1383_v59 }
 0x742   : > { %v1376_v60 = vmul.f32 %v1372_v58, %v1372_v58 }
 0x744   : > { %v1386_v61 = vsel %vm1288_vm4, %v1376_v60, 0.0 }
 0x745   : > { %1387 = vadd.xlane.f32.xlu1 %v1386_v61 }
 0x7ca   : > { %v1379_v5 = vpop.xlane.xlu0 %1378 }
 0x7cb   : > { %v1389_v6 = vmul.f32 0.03125, %v1379_v5 }
 0x7cc   : > { %v1382_v7 = vpop.xlane.xlu1 %1381 }
 0x7cd   : > { %v1393_v8 = vadd.f32 1e-05, %v1389_v6  ;;  %v1390_v9 = vmul.f32 0.03125, %v1382_v7 }
 0x7ce   : > { %v1385_v10 = vpop.xlane.xlu0 %1384 }
 0x7cf   : > { %2149 = vrsqrt.f32 %v1393_v8  ;;  %v1394_v11 = vadd.f32 1e-05, %v1390_v9  ;;  %v1391_v13 = vmul.f32 0.03125, %v1385_v10 }
 0x7d1   : > { %2151 = vrsqrt.f32 %v1394_v11  ;;  %v1395_v14 = vadd.f32 1e-05, %v1391_v13 }
 0x7d2   : > { %v1388_v15 = vpop.xlane.xlu1 %1387 }
 0x7d3   : > { %2153 = vrsqrt.f32 %v1395_v14  ;;  %v1392_v16 = vmul.f32 0.03125, %v1388_v15 }
 0x7d5   : > { %v1396_v17 = vadd.f32 1e-05, %v1392_v16 }
 0x7d7   : > { %2155 = vrsqrt.f32 %v1396_v17 }
 0x7d9   : > { %v2150_v18 = vpop.eup %2149 }
 0x7da   : > { %v1401_v20 = vmul.f32 %v2150_v18, %v1369_v47 }
 0x7db   : > { %v2152_v21 = vpop.eup %2151 }
 0x7dc   : > { %v1402_v22 = vmul.f32 %v2152_v21, %v1370_v50  ;;  %v1412_v23 = vmul.f32 %v1941_v19, %v1401_v20 }
 0x7dd   : > { %v2154_v24 = vpop.eup %2153 }
 0x7de   : > { %v1403_v4 = vmul.f32 %v2154_v24, %v1371_v34  ;;  %v1413_v25 = vmul.f32 %v1941_v19, %v1402_v22  ;;  %v1423_v26 = vadd.f32 %v1942_v2, %v1412_v23  ;;  %v1948_v34 = vld [vmem:[%s669_s23] ss:$0 sm:$0xff] }
 0x7e0   : > { %v1424_v27 = vadd.f32 %v1942_v2, %v1413_v25  ;;  %v1414_v0 = vmul.f32 %v1941_v19, %v1403_v4 }
 0x7e1   : > { %v2156_v28 = vpop.eup %2155 }
 0x7e2   : > { %v1404_v29 = vmul.f32 %v2156_v28, %v1372_v58  ;;  %v1427_v12 = vpack.c.bf16 %v1424_v27, %v1423_v26  ;;  %v1425_v31 = vadd.f32 %v1942_v2, %v1414_v0 }
 0x7e4   : > { %v1415_v30 = vmul.f32 %v1941_v19, %v1404_v29  ;;  %2064 = vmatprep.mubr.msk.bf16.mxu1 %vm1288_vm4, %v1427_v12 }
 0x7e6   : > { %v1426_v32 = vadd.f32 %v1942_v2, %v1415_v30 }
 0x7e8   : > { %v1428_v33 = vpack.c.bf16 %v1426_v32, %v1425_v31 }
 0x7ea   : > { %2065 = vmatmul.mubr.msk.bf16.vlgmr.msra.gmra.mrb[20].mxu1 %vm1288_vm4, %v1428_v33 }
 0x8bd   : > { %v2066_v38 = vpop.f32.mrb[20].mxu1 }
 0x8be   : > { %v1501_v39 = vadd.f32 %v2066_v38, %v1943_v37  ;;  %v1492_v41 = vpop.f32.mrb[21].mxu1  ;;  %v1955_v38 = vld [vmem:[%s672_s25] ss:$0 sm:$0xff] }
 0x8bf   : > { %v1493_v42 = vadd.f32 %v1943_v37, %v1492_v41  ;;  %v2067_v43 = vpop.f32.mrb[22].mxu1 }
 0x8c0   : > { %v1504_v44 = vadd.f32 %v2067_v43, %v1943_v37  ;;  %v1495_v45 = vpop.f32.mrb[23].mxu1  ;;  %v1509_v47 = vmax.f32 %v1501_v39, 0.0 }
 0x8c1   : > { %v1496_v46 = vadd.f32 %v1943_v37, %v1495_v45  ;;  %v1507_v49 = vmax.f32 %v1493_v42, 0.0  ;;  %v1956_v42 = vld [vmem:[%s675_s28] ss:$0 sm:$0xff] }
 0x8c2   : > { %v1510_v48 = vmax.f32 %v1504_v44, 0.0 }
 0x8c3   : > { %v1508_v50 = vmax.f32 %v1496_v46, 0.0 }
 0x8c4   : > { %v1512_v51 = vpack.c.bf16 %v1510_v48, %v1509_v47 }
 0x8c5   : > { %v1511_v40 = vpack.c.bf16 %v1508_v50, %v1507_v49 }
 0x8c7   : > { %2076 = vmatprep.mubr.msk.bf16.mxu0 %vm1552_vm5, %v1511_v40 }
 0x8c8   : > { %2077 = vmatmul.mubr.msk.bf16.vlgmr.msra.gmra.mrb[16].mxu0 %vm1552_vm5, %v1512_v51 }
 0x99b   : > { %v2078_v52 = vpop.f32.mrb[16].mxu0 }
 0x99c   : > { %v1593_v53 = vpop.f32.mrb[17].mxu0  ;;  %v1602_v54 = vadd.f32 %v2078_v52, %v1948_v34 }
 0x99d   : > { %v1594_v55 = vadd.f32 %v1948_v34, %v1593_v53  ;;  %v2079_v56 = vpop.f32.mrb[18].mxu0 }
 0x99e   : > { %v1596_v57 = vpop.f32.mrb[19].mxu0  ;;  %v1605_v58 = vadd.f32 %v2079_v56, %v1948_v34  ;;  %v1610_v63 = vadd.f32 %v1602_v54, %v1425_v31 }
 0x99f   : > { %v1597_v59 = vadd.f32 %v1948_v34, %v1596_v57  ;;  %v1608_v60 = vadd.f32 %v1594_v55, %v1423_v26 }
 0x9a0   : > { %v1611_v3 = vadd.f32 %v1605_v58, %v1426_v32  ;;  %v1618_v5 = vsel %vm1288_vm4, %v1610_v63, 0.0 }
 0x9a1   : > { %v1612_v61 = vsel %vm1288_vm4, %v1608_v60, 0.0  ;;  %v1609_v62 = vadd.f32 %v1597_v59, %v1424_v27 }
 0x9a2   : > { %1613 = vadd.xlane.f32.xlu0 %v1612_v61  ;;  %v1621_v6 = vsel %vm1288_vm4, %v1611_v3, 0.0 }
 0x9a3   : > { %v1615_v1 = vsel %vm1288_vm4, %v1609_v62, 0.0 }
 0x9a4   : > { %1616 = vadd.xlane.f32.xlu1 %v1615_v1 }
 0x9a6   : > { %1619 = vadd.xlane.f32.xlu0 %v1618_v5 }
 0x9a8   : > { %1622 = vadd.xlane.f32.xlu1 %v1621_v6 }
 0xa2f   : > { %v1614_v7 = vpop.xlane.xlu0 %1613 }
 0xa30   : > { %v1624_v8 = vmul.f32 0.03125, %v1614_v7 }
 0xa31   : > { %v1617_v9 = vpop.xlane.xlu1 %1616 }
 0xa32   : > { %v1628_v10 = vsub.f32 %v1608_v60, %v1624_v8  ;;  %v1625_v11 = vmul.f32 0.03125, %v1617_v9 }
 0xa33   : > { %v1620_v13 = vpop.xlane.xlu0 %1619 }
 0xa34   : > { %v1629_v14 = vsub.f32 %v1609_v62, %v1625_v11  ;;  %v1626_v15 = vmul.f32 0.03125, %v1620_v13  ;;  %v1632_v16 = vmul.f32 %v1628_v10, %v1628_v10 }
 0xa35   : > { %v1623_v17 = vpop.xlane.xlu1 %1622 }
 0xa36   : > { %v1630_v18 = vsub.f32 %v1610_v63, %v1626_v15  ;;  %v1627_v19 = vmul.f32 0.03125, %v1623_v17  ;;  %v1636_v20 = vsel %vm1288_vm4, %v1632_v16, 0.0  ;;  %v1633_v21 = vmul.f32 %v1629_v14, %v1629_v14 }
 0xa37   : > { %1637 = vadd.xlane.f32.xlu0 %v1636_v20 }
 0xa38   : > { %v1631_v22 = vsub.f32 %v1611_v3, %v1627_v19  ;;  %v1639_v23 = vsel %vm1288_vm4, %v1633_v21, 0.0  ;;  %v1634_v24 = vmul.f32 %v1630_v18, %v1630_v18 }
 0xa39   : > { %1640 = vadd.xlane.f32.xlu1 %v1639_v23 }
 0xa3a   : > { %v1642_v2 = vsel %vm1288_vm4, %v1634_v24, 0.0  ;;  %v1635_v4 = vmul.f32 %v1631_v22, %v1631_v22 }
 0xa3b   : > { %1643 = vadd.xlane.f32.xlu0 %v1642_v2 }
 0xa3c   : > { %v1645_v25 = vsel %vm1288_vm4, %v1635_v4, 0.0 }
 0xa3d   : > { %1646 = vadd.xlane.f32.xlu1 %v1645_v25 }
 0xac4   : > { %v1638_v26 = vpop.xlane.xlu0 %1637 }
 0xac5   : > { %v1648_v27 = vmul.f32 0.03125, %v1638_v26 }
 0xac6   : > { %v1641_v28 = vpop.xlane.xlu1 %1640 }
 0xac7   : > { %v1652_v0 = vadd.f32 1e-05, %v1648_v27  ;;  %v1649_v29 = vmul.f32 0.03125, %v1641_v28 }
 0xac8   : > { %v1644_v12 = vpop.xlane.xlu0 %1643 }
 0xac9   : > { %2157 = vrsqrt.f32 %v1652_v0  ;;  %v1653_v30 = vadd.f32 1e-05, %v1649_v29  ;;  %v1650_v31 = vmul.f32 0.03125, %v1644_v12 }
 0xaca   : > { %v1647_v32 = vpop.xlane.xlu1 %1646 }
 0xacb   : > { %2159 = vrsqrt.f32 %v1653_v30  ;;  %v1654_v33 = vadd.f32 1e-05, %v1650_v31  ;;  %v1651_v35 = vmul.f32 0.03125, %v1647_v32 }
 0xacd   : > { %2161 = vrsqrt.f32 %v1654_v33  ;;  %v1655_v36 = vadd.f32 1e-05, %v1651_v35 }
 0xacf   : > { %2163 = vrsqrt.f32 %v1655_v36 }
 0xad3   : > { %v2158_v37 = vpop.eup %2157 }
 0xad4   : > { %v1660_v39 = vmul.f32 %v2158_v37, %v1628_v10 }
 0xad5   : > { %v2160_v41 = vpop.eup %2159 }
 0xad6   : > { %v1671_v43 = vmul.f32 %v1955_v38, %v1660_v39  ;;  %v1661_v44 = vmul.f32 %v2160_v41, %v1629_v14 }
 0xad7   : > { %v2162_v45 = vpop.eup %2161 }
 0xad8   : > { %v1682_v46 = vadd.f32 %v1956_v42, %v1671_v43  ;;  %v1672_v47 = vmul.f32 %v1955_v38, %v1661_v44  ;;  %v1662_v48 = vmul.f32 %v2162_v45, %v1630_v18 }
 0xad9   : > { %v2164_v49 = vpop.eup %2163 }
 0xada   : > { %1686 = vst.msk [vmem:[%s680_s16] sm:$0xff] %vm1288_vm4, %v1682_v46  ;;  %v1683_v50 = vadd.f32 %v1956_v42, %v1672_v47  ;;  %v1673_v51 = vmul.f32 %v1955_v38, %v1662_v48  ;;  %v1663_v40 = vmul.f32 %v2164_v49, %v1631_v22 }
 0xadc   : > { %1687 = vst.msk [vmem:[%s680_s16 + $0x8] sm:$0xff] %vm1288_vm4, %v1683_v50  ;;  %v1684_v34 = vadd.f32 %v1956_v42, %v1673_v51  ;;  %v1674_v52 = vmul.f32 %v1955_v38, %v1663_v40 }
 0xade   : > { %1688 = vst.msk [vmem:[%s680_s16 + $0x10] sm:$0xff] %vm1288_vm4, %v1684_v34  ;;  %v1685_v53 = vadd.f32 %v1956_v42, %v1674_v52 }
 0xae0   : > { %1689 = vst.msk [vmem:[%s680_s16 + $0x18] sm:$0xff] %vm1288_vm4, %v1685_v53 }
 0xae1 PF: > { %s26_s18 = sadd.s32 1, %s2171_s18  }
 0xae2   : > { %p23_p4 = scmp.ge.s32.totalorder %s26_s18, 4  }
 0xae4   :  { %25 = sbr.rel (!%p23_p4) target bundleno = 1 (0x1), region = 154 }

// kernel: cross_attention_douple_forward.2
= control target key start
LH: loop header
LB: loop body
LE: loop exit
PB: predicated region body
PF: predicated region fallthrough
CT: control target
= control target key end

     0   :  { %v3136_v0 = vmov 0   ;;  %vm157_vm0 = vsmask.f32 256  ;;  %vm158_vm1 = vsmask.f32 4368  ;;  %vm534_vm2 = vcmask 1042432   ;;  %s4583_s1 = inlined_call_operand.vmem [shape: bf16[9,32,1], index: 1, kind: input, shape index: {}, may-alias: {1,5}]   ;;  %s4584_s5 = inlined_call_operand.vmem [shape: bf16[9,32,1], index: 5, kind: input, shape index: {}, may-alias: {1,5}]   ;;  %s4585_s2 = inlined_call_operand.vmem [shape: bf16[288,32], index: 2, kind: input, shape index: {}]   ;;  %s4586_s0 = inlined_call_operand.vmem [shape: bf16[42,32], index: 0, kind: input, shape index: {}]   ;;  %s4587_s4 = inlined_call_operand.vmem [shape: bf16[42,32], index: 4, kind: input, shape index: {}]   ;;  %s4588_s6 = inlined_call_operand.vmem [shape: bf16[288,32], index: 6, kind: input, shape index: {}]   ;;  %s4589_s8 = inlined_call_operand.vmem [shape: bf16[32,32], index: 8, kind: input, shape index: {}]   ;;  %s4590_s3 = inlined_call_operand.vmem [shape: f32[1,32], index: 3, kind: input, shape index: {}]   ;;  %s4591_s10 = inlined_call_operand.vmem [shape: bf16[2,32,16], index: 10, kind: output, shape index: {0}]   ;;  %s4592_s7 = inlined_call_operand.vmem [shape: f32[1,32], index: 7, kind: input, shape index: {}]   ;;  %s4593_s11 = inlined_call_operand.vmem [shape: bf16[2,32,16], index: 11, kind: output, shape index: {1}]   ;;  %s4594_s9 = inlined_call_operand.vmem [shape: f32[1,32], index: 9, kind: input, shape index: {}]   ;;  %s4595_s12 = inlined_call_operand.vmem [shape: bf16[32,32], index: 12, kind: output, shape index: {2}]  }
   0x1   :  { %3086 = vset.pattern.permute.xlu1 %v3136_v0  ;;  %3085 = vset.pattern.permute.xlu0 %v3136_v0  ;;  %v2815_v1 = vld [vmem:[%s4583_s1 + $0x70] sm:$0xf]  ;;  %v2816_v3 = vld [vmem:[%s4583_s1 + $0x74] sm:$0xf]  ;;  %v2794_v5 = vld [vmem:[%s4583_s1 + $0x1c] sm:$0xf] }
   0x2   :  { %v2791_v2 = vld [vmem:[%s4583_s1 + $0x10] sm:$0xf]  ;;  %628 = vperm.xlu1 %3086, %v2815_v1   ;;  %v2792_v4 = vld [vmem:[%s4583_s1 + $0x14] sm:$0xf]  ;;  %v2793_v6 = vld [vmem:[%s4583_s1 + $0x18] sm:$0xf] }
   0x3   :  { %111 = vperm.xlu0 %3085, %v2791_v2   ;;  %v2818_v7 = vld [vmem:[%s4583_s1 + $0x7c] sm:$0xf]  ;;  %v2817_v8 = vld [vmem:[%s4583_s1 + $0x78] sm:$0xf]  ;;  %v2849_v9 = vld [vmem:[%s4584_s5 + $0x14] sm:$0xf] }
   0x4   :  { %v2848_v10 = vld [vmem:[%s4584_s5 + $0x10] sm:$0xf]  ;;  %v2808_v11 = vld [vmem:[%s4583_s1 + $0x54] sm:$0xf]  ;;  %v2809_v14 = vld [vmem:[%s4583_s1 + $0x58] sm:$0xf] }
   0x5   :  { %v2807_v12 = vld [vmem:[%s4583_s1 + $0x50] sm:$0xf]  ;;  %v2850_v15 = vld [vmem:[%s4584_s5 + $0x18] sm:$0xf]  ;;  %v2873_v16 = vld [vmem:[%s4584_s5 + $0x74] sm:$0xf] }
   0x6   :  { %640 = vperm.xlu1 %3086, %v2816_v3   ;;  %v2872_v13 = vld [vmem:[%s4584_s5 + $0x70] sm:$0xf]  ;;  %v2795_v17 = vld [vmem:[%s4583_s1 + $0x20] sm:$0xf]  ;;  %v2851_v18 = vld [vmem:[%s4584_s5 + $0x1c] sm:$0xf] }
   0x7   :  { %123 = vperm.xlu0 %3085, %v2792_v4   ;;  %v2797_v19 = vld [vmem:[%s4583_s1 + $0x28] sm:$0xf]  ;;  %v2796_v20 = vld [vmem:[%s4583_s1 + $0x24] sm:$0xf]  ;;  %v2874_v21 = vld [vmem:[%s4584_s5 + $0x78] sm:$0xf] }
   0x8   :  { %v2810_v22 = vld [vmem:[%s4583_s1 + $0x5c] sm:$0xf]  ;;  %v2799_v23 = vld [vmem:[%s4583_s1 + $0x30] sm:$0xf]  ;;  %v2801_v25 = vld [vmem:[%s4583_s1 + $0x38] sm:$0xf] }
   0x9   :  { %v2875_v24 = vld [vmem:[%s4584_s5 + $0x7c] sm:$0xf]  ;;  %v2800_v26 = vld [vmem:[%s4583_s1 + $0x34] sm:$0xf]  ;;  %v2864_v27 = vld [vmem:[%s4584_s5 + $0x50] sm:$0xf] }
   0xa   :  { %147 = vperm.xlu1 %3086, %v2794_v5   ;;  %v2798_v28 = vld [vmem:[%s4583_s1 + $0x2c] sm:$0xf]  ;;  %v2866_v29 = vld [vmem:[%s4584_s5 + $0x58] sm:$0xf]  ;;  %v2865_v30 = vld [vmem:[%s4584_s5 + $0x54] sm:$0xf] }
   0xb   :  { %135 = vperm.xlu0 %3085, %v2793_v6   ;;  %v2852_v31 = vld [vmem:[%s4584_s5 + $0x20] sm:$0xf]  ;;  %v2802_v32 = vld [vmem:[%s4583_s1 + $0x3c] sm:$0xf]  ;;  %v2854_v33 = vld [vmem:[%s4584_s5 + $0x28] sm:$0xf] }
   0xc   :  { %v2853_v34 = vld [vmem:[%s4584_s5 + $0x24] sm:$0xf]  ;;  %v2856_v35 = vld [vmem:[%s4584_s5 + $0x30] sm:$0xf]  ;;  %v2867_v36 = vld [vmem:[%s4584_s5 + $0x5c] sm:$0xf] }
   0xd   :  { %v2858_v37 = vld [vmem:[%s4584_s5 + $0x38] sm:$0xf]  ;;  %v2857_v38 = vld [vmem:[%s4584_s5 + $0x34] sm:$0xf]  ;;  %v2811_v39 = vld [vmem:[%s4583_s1 + $0x60] sm:$0xf] }
   0xe   :  { %664 = vperm.xlu1 %3086, %v2818_v7   ;;  %v2855_v40 = vld [vmem:[%s4584_s5 + $0x2c] sm:$0xf]  ;;  %v2859_v41 = vld [vmem:[%s4584_s5 + $0x3c] sm:$0xf]  ;;  %v2812_v42 = vld [vmem:[%s4583_s1 + $0x64] sm:$0xf]  ;;  %v55_v7 = vlaneseq }
   0xf   :  { %652 = vperm.xlu0 %3085, %v2817_v8   ;;  %v2869_v43 = vld [vmem:[%s4584_s5 + $0x64] sm:$0xf]  ;;  %v2868_v44 = vld [vmem:[%s4584_s5 + $0x60] sm:$0xf]  ;;  %v2814_v45 = vld [vmem:[%s4583_s1 + $0x6c] sm:$0xf] }
  0x10   :  { %v2813_v46 = vld [vmem:[%s4583_s1 + $0x68] sm:$0xf]  ;;  %v2871_v47 = vld [vmem:[%s4584_s5 + $0x6c] sm:$0xf]  ;;  %v2820_v49 = vld [vmem:[%s4583_s1 + $0x84] sm:$0xf] }
  0x11   :  { %v2870_v48 = vld [vmem:[%s4584_s5 + $0x68] sm:$0xf]  ;;  %v2819_v50 = vld [vmem:[%s4583_s1 + $0x80] sm:$0xf]  ;;  %v2822_v51 = vld [vmem:[%s4583_s1 + $0x8c] sm:$0xf] }
  0x12   :  { %1143 = vperm.xlu1 %3086, %v2849_v9   ;;  %v2821_v52 = vld [vmem:[%s4583_s1 + $0x88] sm:$0xf]  ;;  %v2804_v53 = vld [vmem:[%s4583_s1 + $0x44] sm:$0xf]  ;;  %v2803_v54 = vld [vmem:[%s4583_s1 + $0x40] sm:$0xf] }
  0x13   :  { %1131 = vperm.xlu0 %3085, %v2848_v10   ;;  %v2806_v55 = vld [vmem:[%s4583_s1 + $0x4c] sm:$0xf]  ;;  %v2805_v56 = vld [vmem:[%s4583_s1 + $0x48] sm:$0xf]  ;;  %v2861_v57 = vld [vmem:[%s4584_s5 + $0x44] sm:$0xf] }
  0x14   :  { %v2860_v58 = vld [vmem:[%s4584_s5 + $0x40] sm:$0xf]  ;;  %v2863_v59 = vld [vmem:[%s4584_s5 + $0x4c] sm:$0xf]  ;;  %v2862_v60 = vld [vmem:[%s4584_s5 + $0x48] sm:$0xf] }
  0x15   :  { %v44_v61 = vld [vmem:[%s4583_s1 + $0x4] sm:$0xf]  ;;  %v43_v62 = vld [vmem:[%s4583_s1] sm:$0xf]  ;;  %v3090_v2 = vld [vmem:[%s4585_s2 + $0x88] sm:$0xff]   ;;  %vm535_vm3 = vcmask 1046532  }
  0x16   :  { %496 = vperm.xlu1 %3086, %v2808_v11   ;;  %v1064_v63 = vld [vmem:[%s4584_s5 + $0x4] sm:$0xf]  ;;  %v1063_v0 = vld [vmem:[%s4584_s5] sm:$0xf]  ;;  %v46_v3 = vld [vmem:[%s4583_s1 + $0xc] sm:$0xf] }
  0x17   :  { %484 = vperm.xlu0 %3085, %v2807_v12   ;;  %v3089_v1 = vld [vmem:[%s4585_s2 + $0x80] sm:$0xff]   ;;  %v45_v4 = vld [vmem:[%s4583_s1 + $0x8] sm:$0xf]  ;;  %v3137_v5 = vmov 839922192   ;;  %vm3466_vm4 = vmor %vm157_vm0, %vm158_vm1  ;;  %vm263_vm6 = vcmask 1040384  }
  0x18   :  { %3055 = vmatprep.subr.bf16.mxu1 %v3089_v1  ;;  %v53_v6 = vunpack.c.l.s4 %v3137_v5  ;;  %v2877_v10 = vld [vmem:[%s4584_s5 + $0x84] sm:$0xf]  ;;  %v2876_v11 = vld [vmem:[%s4584_s5 + $0x80] sm:$0xf]  ;;  %vm3528_vm5 = vmor %vm534_vm2, %vm535_vm3  ;;  %vm264_vm7 = vcmask 1044484   ;;  %vm945_vm8 = vcmask 1044480  }
  0x19   :  { %3056 = vmatpush3.bf16.msra.mxu1 %v3089_v1  ;;  %vm346_vm9 = vcmask 1041408   ;;  %vm347_vm10 = vcmask 1045508   ;;  %vm821_vm11 = vsmask.f32 7424  ;;  %vm3700_vm12 = vmor %vm263_vm6, %vm264_vm7  ;;  %s3138_s25 = smov 32   ;;  %vm859_vm13 = vcmask 1046528  }
  0x1a   :  { %1633 = vperm.xlu1 %3086, %v2872_v13   ;;  %3057 = vmatprep.subr.bf16.mxu1 %v3090_v2  ;;  %v54_v12 = vunpack.c.0.s8 %v53_v6  ;;  %v56_v13 = vshrl.u32 %v55_v7, 7  ;;  %vm3781_vm14 = vmor %vm346_vm9, %vm347_vm10  ;;  %vm882_vm15 = vcmask 1045504   ;;  %s3139_s27 = smov 64   ;;  %v3111_v5 = vld [vmem:[%s4585_s2 + $0x30] sm:$0xff]   ;;  %s3140_s21 = smov 96   ;;  %vm1024_vm0 = vcmask 261120  }
  0x1b   :  { %508 = vperm.xlu0 %3085, %v2809_v14   ;;  %vm424_vm1 = vsmask.f32 2304  ;;  %vm425_vm2 = vsmask.f32 6416  ;;  %vm1036_vm6 = vcmask 785408   ;;  %vm2699_vm7 = vcmask 125952  }
  0x1c   :  { %vm4279_vm3 = vmor %vm424_vm1, %vm425_vm2  ;;  %s3141_s17 = smov 112  }
  0x1d   :  { %3058 = vmatpush3.bf16.msra.mxu1 %v3090_v2 }
  0x1e   :  { %1155 = vperm.xlu1 %3086, %v2850_v15  }
  0x1f   :  { %1645 = vperm.xlu0 %3085, %v2873_v16   ;;  %v1066_v16 = vld [vmem:[%s4584_s5 + $0xc] sm:$0xf] }
  0x22   :  { %213 = vperm.xlu1 %3086, %v2795_v17   ;;  %v3420_v17 = vsub.s32 %v54_v12, %v56_v13 }
  0x23   :  { %1167 = vperm.xlu0 %3085, %v2851_v18   ;;  %v2878_v18 = vld [vmem:[%s4584_s5 + $0x88] sm:$0xf] }
  0x26   :  { %237 = vperm.xlu1 %3086, %v2797_v19  }
  0x27   :  { %225 = vperm.xlu0 %3085, %v2796_v20  }
  0x2a   :  { %1657 = vperm.xlu1 %3086, %v2874_v21  }
  0x2b   :  { %520 = vperm.xlu0 %3085, %v2810_v22  }
  0x2e   :  { %296 = vperm.xlu1 %3086, %v2799_v23   ;;  %v1065_v23 = vld [vmem:[%s4584_s5 + $0x8] sm:$0xf] }
  0x2f   :  { %1669 = vperm.xlu0 %3085, %v2875_v24  }
  0x32   :  { %320 = vperm.xlu1 %3086, %v2801_v25  }
  0x33   :  { %308 = vperm.xlu0 %3085, %v2800_v26  }
  0x36   :  { %1492 = vperm.xlu1 %3086, %v2864_v27  }
  0x37   :  { %249 = vperm.xlu0 %3085, %v2798_v28  }
  0x3a   :  { %1516 = vperm.xlu1 %3086, %v2866_v29  }
  0x3b   :  { %1504 = vperm.xlu0 %3085, %v2865_v30  }
  0x3e   :  { %1230 = vperm.xlu1 %3086, %v2852_v31  }
  0x3f   :  { %332 = vperm.xlu0 %3085, %v2802_v32   ;;  %v2879_v32 = vld [vmem:[%s4584_s5 + $0x8c] sm:$0xf] }
  0x42   :  { %1254 = vperm.xlu1 %3086, %v2854_v33  }
  0x43   :  { %1242 = vperm.xlu0 %3085, %v2853_v34  }
  0x46   :  { %1310 = vperm.xlu1 %3086, %v2856_v35  }
  0x47   :  { %1528 = vperm.xlu0 %3085, %v2867_v36  }
  0x4a   :  { %1334 = vperm.xlu1 %3086, %v2858_v37  }
  0x4b   :  { %1322 = vperm.xlu0 %3085, %v2857_v38  }
  0x4e   :  { %566 = vperm.xlu1 %3086, %v2811_v39  }
  0x4f   :  { %1266 = vperm.xlu0 %3085, %v2855_v40  }
  0x52   :  { %1346 = vperm.xlu1 %3086, %v2859_v41  }
  0x53   :  { %578 = vperm.xlu0 %3085, %v2812_v42  }
  0x56   :  { %1583 = vperm.xlu1 %3086, %v2869_v43  }
  0x57   :  { %1571 = vperm.xlu0 %3085, %v2868_v44  }
  0x5a   :  { %602 = vperm.xlu1 %3086, %v2814_v45  }
  0x5b   :  { %590 = vperm.xlu0 %3085, %v2813_v46  }
  0x5e   :  { %1607 = vperm.xlu1 %3086, %v2871_v47  }
  0x5f   :  { %1595 = vperm.xlu0 %3085, %v2870_v48  }
  0x62   :  { %739 = vperm.xlu1 %3086, %v2820_v49  }
  0x63   :  { %727 = vperm.xlu0 %3085, %v2819_v50  }
  0x66   :  { %763 = vperm.xlu1 %3086, %v2822_v51  }
  0x67   :  { %751 = vperm.xlu0 %3085, %v2821_v52  }
  0x6a   :  { %390 = vperm.xlu1 %3086, %v2804_v53  }
  0x6b   :  { %378 = vperm.xlu0 %3085, %v2803_v54  }
  0x6e   :  { %414 = vperm.xlu1 %3086, %v2806_v55  }
  0x6f   :  { %402 = vperm.xlu0 %3085, %v2805_v56  }
  0x72   :  { %1401 = vperm.xlu1 %3086, %v2861_v57  }
  0x73   :  { %1389 = vperm.xlu0 %3085, %v2860_v58  }
  0x76   :  { %1425 = vperm.xlu1 %3086, %v2863_v59  }
  0x77   :  { %1413 = vperm.xlu0 %3085, %v2862_v60  }
  0x7a   :  { %61 = vperm.xlu1 %3086, %v44_v61  }
  0x7b   :  { %49 = vperm.xlu0 %3085, %v43_v62   ;;  %v3459_v62 = vld [vmem:[%s4586_s0] sm:$0xf] }
  0x7e   :  { %1081 = vperm.xlu1 %3086, %v1064_v63  }
  0x7f   :  { %1069 = vperm.xlu0 %3085, %v1063_v0  }
  0x81   :  { %v629_v8 = vpop.permute.xlu1 %628 }
  0x82   :  { %v112_v9 = vpop.permute.xlu0 %111  ;;  %85 = vperm.xlu1 %3086, %v46_v3   ;;  %v637_v21 = vrot.slane %v629_v8, %v3420_v17 }
  0x83   :  { %73 = vperm.xlu0 %3085, %v45_v4   ;;  %v120_v22 = vrot.slane %v112_v9, %v3420_v17 }
  0x84   :  { %v675_v30 = vshrl.u32 %v637_v21, 16  ;;  %v678_v42 = vshll.u32 %v637_v21, 16 }
  0x85   :  { %v641_v14 = vpop.permute.xlu1 %640  ;;  %v161_v31 = vshrl.u32 %v120_v22, 16  ;;  %v164_v44 = vshll.u32 %v120_v22, 16 }
  0x86   :  { %v124_v15 = vpop.permute.xlu0 %123  ;;  %1744 = vperm.xlu1 %3086, %v2877_v10   ;;  %v649_v24 = vrot.slane %v641_v14, %v3420_v17  ;;  %v677_v41 = vrot.slane %v675_v30, 7 }
  0x87   :  { %1732 = vperm.xlu0 %3085, %v2876_v11   ;;  %v132_v25 = vrot.slane %v124_v15, %v3420_v17  ;;  %v163_v43 = vrot.slane %v161_v31, 7 }
  0x88   :  { %v683_v33 = vshrl.u32 %v649_v24, 16  ;;  %v686_v49 = vshll.u32 %v649_v24, 16  ;;  %v3451_v57 = vor.u32 %v678_v42, %v677_v41  ;;  %v681_v61 = vrot.slane %v677_v41, 4  ;;  %v3489_v24 = vld [vmem:[%s4586_s0 + $0x4] sm:$0xf] }
  0x89   :  { %v148_v19 = vpop.permute.xlu1 %147  ;;  %v169_v34 = vshrl.u32 %v132_v25, 16  ;;  %v172_v53 = vshll.u32 %v132_v25, 16  ;;  %v3453_v58 = vor.u32 %v164_v44, %v163_v43  ;;  %v167_v4 = vrot.slane %v163_v43, 4 }
  0x8a   :  { %v136_v20 = vpop.permute.xlu0 %135  ;;  %1105 = vperm.xlu1 %3086, %v1066_v16   ;;  %v156_v29 = vrot.slane %v148_v19, %v3420_v17  ;;  %v3439_v45 = vrot.slane %v683_v33, 7  ;;  %v3503_v33 = vld [vmem:[%s4586_s0 + $0x8] sm:$0xf] }
  0x8b   :  { %1756 = vperm.xlu0 %3085, %v2878_v18   ;;  %v144_v28 = vrot.slane %v136_v20, %v3420_v17  ;;  %v171_v46 = vrot.slane %v169_v34, 7  ;;  %v200_v13 = vmul.bf16 %v3453_v58, %v3459_v62 }
  0x8c   :  { %v187_v38 = vshrl.u32 %v156_v29, 16  ;;  %v688_v63 = vor.u32 %v686_v49, %v3439_v45  ;;  %v190_v1 = vshll.u32 %v156_v29, 16  ;;  %v690_v14 = vrot.slane %v3439_v45, 4 }
  0x8d   :  { %v665_v26 = vpop.permute.xlu1 %664  ;;  %v178_v37 = vshrl.u32 %v144_v28, 16  ;;  %v181_v59 = vshll.u32 %v144_v28, 16  ;;  %v174_v0 = vor.u32 %v172_v53, %v171_v46  ;;  %v176_v15 = vrot.slane %v171_v46, 4  ;;  %v3552_v53 = vld [vmem:[%s4586_s0 + $0xc] sm:$0xf] }
  0x8e   :  { %v653_v27 = vpop.permute.xlu0 %652  ;;  %v673_v39 = vrot.slane %v665_v26, %v3420_v17  ;;  %v3449_v54 = vrot.slane %v187_v38, 7  ;;  %v3482_v18 = vsel %vm3466_vm4, %v681_v61, %v688_v63  ;;  %v3516_v38 = vld [vmem:[%s4586_s0 + $0xc] sm:$0xf]  ;;  %4610 = vst [vmem:[#allocation3_spill] sm:$0xff] %v3552_v53 }
  0x8f   :  { %1093 = vperm.xlu0 %3085, %v1065_v23   ;;  %v661_v40 = vrot.slane %v653_v27, %v3420_v17  ;;  %v180_v50 = vrot.slane %v178_v37, 7  ;;  %v175_v19 = vsel %vm3466_vm4, %v167_v4, %v174_v0 }
  0x90   :  { %v701_v55 = vshrl.u32 %v673_v39, 16  ;;  %v192_v9 = vor.u32 %v190_v1, %v3449_v54  ;;  %v704_v20 = vshll.u32 %v673_v39, 16  ;;  %v3521_v39 = vld [vmem:[%s4586_s0 + $0x4] sm:$0xf]  ;;  %v194_v41 = vrot.slane %v3449_v54, 4 }
  0x91   :  { %v1144_v35 = vpop.permute.xlu1 %1143  ;;  %v692_v56 = vshrl.u32 %v661_v40, 16  ;;  %v183_v6 = vor.u32 %v181_v59, %v180_v50  ;;  %v185_v10 = vrot.slane %v180_v50, 4  ;;  %v695_v21 = vshll.u32 %v661_v40, 16  ;;  %v3566_v59 = vld [vmem:[%s4586_s0 + $0x10] sm:$0xf] }
  0x92   :  { %v1132_v36 = vpop.permute.xlu0 %1131  ;;  %v3444_v51 = vrot.slane %v1144_v35, %v3420_v17  ;;  %v3473_v11 = vrot.slane %v701_v55, 7  ;;  %v201_v40 = vmul.bf16 %v175_v19, %v3489_v24  ;;  %4611 = vst [vmem:[#allocation4_spill] sm:$0xff] %v3566_v59  ;;  %v714_v1 = vmul.bf16 %v3451_v57, %v3521_v39 }
  0x93   :  { %1768 = vperm.xlu0 %3085, %v2879_v32   ;;  %v3447_v52 = vrot.slane %v1132_v36, %v3420_v17  ;;  %v694_v12 = vrot.slane %v692_v56, 7  ;;  %v184_v25 = vsel %vm3466_vm4, %v176_v15, %v183_v6  ;;  %v193_v29 = vsel %vm3466_vm4, %v185_v10, %v192_v9  ;;  %v3593_v9 = vld [vmem:[%s4587_s4 + $0x4] sm:$0xf] }
  0x94   :  { %v1186_v7 = vshrl.u32 %v3444_v51, 16  ;;  %v706_v30 = vor.u32 %v704_v20, %v3473_v11  ;;  %v1189_v34 = vshll.u32 %v3444_v51, 16  ;;  %v3546_v51 = vld [vmem:[%s4586_s0 + $0x10] sm:$0x1]  ;;  %v203_v58 = vmul.bf16 %v193_v29, %v3516_v38 }
  0x95   :  { %v3441_v47 = vpop.permute.xlu1 %496  ;;  %v1178_v8 = vshrl.u32 %v3447_v52, 16  ;;  %v697_v31 = vor.u32 %v695_v21, %v694_v12  ;;  %v699_v32 = vrot.slane %v694_v12, 4  ;;  %v1181_v42 = vshll.u32 %v3447_v52, 16  ;;  %v476_v12 = vld [vmem:[%s4586_s0] sm:$0x8] }
  0x96   :  { %v485_v48 = vpop.permute.xlu0 %484  ;;  %v3493_v26 = vrot.slane %v1186_v7, 7  ;;  %v505_v28 = vrot.slane %v3441_v47, %v3420_v17  ;;  %v3540_v47 = vld [vmem:[%s4586_s0 + $0x8] sm:$0xf]  ;;  %v202_v52 = vmul.bf16 %v184_v25, %v3503_v33  ;;  %v3603_v15 = vcombine.low %v200_v13, %v201_v40 }
  0x97   :  { %v493_v60 = vrot.slane %v485_v48, %v3420_v17  ;;  %v1180_v27 = vrot.slane %v1178_v8, 7  ;;  %4609 = vst [vmem:[#allocation2_spill] sm:$0xff] %v3540_v47  ;;  %v3556_v54 = vsel %vm3466_vm4, %v690_v14, %v697_v31  ;;  %v3560_v55 = vsel %vm3466_vm4, %v699_v32, %v706_v30 }
  0x98   :  { %v1191_v48 = vor.u32 %v1189_v34, %v3493_v26  ;;  %v539_v50 = vrot.slane %v505_v28, 5  ;;  %v3587_v8 = vmul.bf16 %v194_v41, %v3546_v51  ;;  %v716_v19 = vmul.bf16 %v3556_v54, %v3552_v53 }
  0x99   :  { %v1634_v2 = vpop.permute.xlu1 %1633  ;;  %v3478_v16 = vrot.slane %v493_v60, 5  ;;  %v1184_v49 = vrot.slane %v1180_v27, 4  ;;  %v1183_v56 = vor.u32 %v1181_v42, %v1180_v27  ;;  %v1119_v60 = vld [vmem:[%s4587_s4] sm:$0xf]  ;;  %v717_v20 = vmul.bf16 %v3560_v55, %v3566_v59 }
  0x9a   :  { %v3462_v3 = vpop.permute.xlu0 %508  ;;  %v3533_v44 = vrot.slane %v1634_v2, %v3420_v17  ;;  %v715_v2 = vmul.bf16 %v3482_v18, %v3540_v47  ;;  %v3614_v27 = vcombine.low %v202_v52, %v203_v58  ;;  %v541_v28 = vrot.slane %v539_v50, 4  ;;  %v3091_v52 = vld [vmem:[%s4585_s2 + $0x40] sm:$0xff]   ;;  %v3094_v18 = vld [vmem:[%s4585_s2 + $0x8] sm:$0xff]  }
  0x9b   :  { %v538_v35 = vrot.slane %v3478_v16, 4  ;;  %v517_v62 = vrot.slane %v3462_v3, %v3420_v17  ;;  %v1193_v3 = vrot.slane %v3493_v26, 4  ;;  %v1192_v10 = vsel %vm3466_vm4, %v1184_v49, %v1191_v48  ;;  %2987 = vmatprep.subr.bf16.mxu0 %v3091_v52 }
  0x9c   :  { %v1680_v4 = vshrl.u32 %v3533_v44, 16  ;;  %v1217_v21 = vmul.bf16 %v1183_v56, %v1119_v60  ;;  %v1218_v13 = vmul.bf16 %v1192_v10, %v3593_v9  ;;  %v553_v29 = vmul.bf16 %v3478_v16, %v476_v12 }
  0x9d   :  { %v1156_v22 = vpop.permute.xlu1 %1155  ;;  %v540_v61 = vsel %vm3528_vm5, %v538_v35, %v539_v50  ;;  %v825_v41 = vshll.u32 %v3603_v15, 16  ;;  %v823_v50 = vshrl.u32 %v3603_v15, 16 }
  0x9e   :  { %v1646_v23 = vpop.permute.xlu0 %1645  ;;  %v3508_v36 = vrot.slane %v1156_v22, %v3420_v17  ;;  %v554_v22 = vmul.bf16 %v540_v61, %v3489_v24  ;;  %v1682_v30 = vrot.slane %v1680_v4, 7 }
  0x9f   :  { %v3511_v37 = vrot.slane %v1646_v23, %v3420_v17  ;;  %v542_v23 = vrot.slane %v517_v62, 5  ;;  %v827_v12 = vrot.slane %v825_v41, 1  ;;  %v830_v41 = vshll.u32 %v3614_v27, 16 }
  0xa0   :  { %v1195_v63 = vshrl.u32 %v3508_v36, 16  ;;  %v1198_v34 = vshll.u32 %v3508_v36, 16  ;;  %v3622_v42 = vcombine.low %v553_v29, %v554_v22 }
  0xa1   :  { %v3535_v45 = vpop.permute.xlu1 %213  ;;  %v1688_v0 = vshrl.u32 %v3511_v37, 16  ;;  %v1691_v35 = vshll.u32 %v3511_v37, 16  ;;  %v543_v49 = vsel %vm3528_vm5, %v541_v28, %v542_v23  ;;  %v544_v58 = vrot.slane %v542_v23, 4  ;;  %v3662_v23 = vld [vmem:[%s4587_s4 + $0x8] sm:$0xf] }
  0xa2   :  { %v1168_v46 = vpop.permute.xlu0 %1167  ;;  %v3610_v25 = vrot.slane %v1195_v63, 7  ;;  %v222_v48 = vrot.slane %v3535_v45, %v3420_v17  ;;  %v3639_v45 = vcombine.low %v1217_v21, %v1218_v13  ;;  %v3648_v63 = vld [vmem:[%s4587_s4 + $0x4] sm:$0xf]  ;;  %v946_v15 = vrot.slane %v3622_v42, 3  ;;  %v3671_v28 = vld [vmem:[%s4587_s4 + $0x8] sm:$0xf] }
  0xa3   :  { %v3601_v14 = vrot.slane %v1168_v46, %v3420_v17  ;;  %v3612_v26 = vrot.slane %v1688_v0, 7  ;;  %v1683_v46 = vshll.u32 %v3533_v44, 16  ;;  %v3092_v44 = vld [vmem:[%s4585_s2] sm:$0xff]   ;;  %v1686_v0 = vrot.slane %v1682_v30, 4 }
  0xa4   :  { %v1200_v36 = vor.u32 %v1198_v34, %v3610_v25  ;;  %v555_v21 = vmul.bf16 %v543_v49, %v3503_v33  ;;  %2988 = vmatpush3.bf16.msra.mxu0 %v3092_v44  ;;  %v1202_v42 = vrot.slane %v3610_v25, 4 }
  0xa5   :  { %v3582_v6 = vpop.permute.xlu1 %237  ;;  %v1204_v40 = vshrl.u32 %v3601_v14, 16  ;;  %v1693_v37 = vor.u32 %v1691_v35, %v3612_v26  ;;  %v3641_v56 = vor.u32 %v1683_v46, %v1682_v30  ;;  %v1207_v22 = vshll.u32 %v3601_v14, 16  ;;  %v3105_v46 = vld [vmem:[%s4585_s2 + $0x68] sm:$0xff]  }
  0xa6   :  { %v3584_v7 = vpop.permute.xlu0 %225  ;;  %v3666_v13 = vsel %vm3466_vm4, %v1193_v3, %v1200_v36  ;;  %v246_v14 = vrot.slane %v3582_v6, %v3420_v17 }
  0xa7   :  { %v234_v60 = vrot.slane %v3584_v7, %v3420_v17  ;;  %v3650_v4 = vrot.slane %v1204_v40, 7  ;;  %v3656_v7 = vrot.slane %v222_v48, 7  ;;  %v3675_v29 = vsel %vm3466_vm4, %v1686_v0, %v1693_v37 }
  0xa8   :  { %v1219_v49 = vmul.bf16 %v3666_v13, %v3662_v23 }
  0xa9   :  { %v1658_v31 = vpop.permute.xlu1 %1657  ;;  %v268_v34 = vrot.slane %v234_v60, 7  ;;  %v1209_v48 = vor.u32 %v1207_v22, %v3650_v4  ;;  %v267_v44 = vrot.slane %v3656_v7, 4 }
  0xaa   :  { %v521_v32 = vpop.permute.xlu0 %520  ;;  %v3705_v52 = vrot.slane %v1658_v31, %v3420_v17  ;;  %v3717_v31 = vrot.slane %v830_v41, 1  ;;  %v3740_v41 = vcombine.low %v714_v1, %v715_v2 }
  0xab   :  { %v529_v16 = vrot.slane %v521_v32, %v3420_v17  ;;  %v3687_v32 = vld [vmem:[%s4586_s0] sm:$0xe]  ;;  %v270_v0 = vrot.slane %v268_v34, 4 }
  0xad   :  { %v297_v61 = vpop.permute.xlu1 %296  ;;  %v3652_v10 = vrot.slane %v529_v16, 5  ;;  %v828_v16 = vor.u32 %v827_v12, %v823_v50  ;;  %v282_v50 = vmul.bf16 %v3656_v7, %v3687_v32  ;;  %v1210_v7 = vsel %vm3466_vm4, %v1202_v42, %v1209_v48 }
  0xae   :  { %v1670_v62 = vpop.permute.xlu0 %1669  ;;  %v305_v60 = vrot.slane %v297_v61, %v3420_v17  ;;  %v269_v61 = vsel %vm3700_vm12, %v267_v44, %v268_v34  ;;  %v1827_v32 = vshrl.u32 %v3639_v45, 16 }
  0xaf   :  { %v546_v30 = vsel %vm3528_vm5, %v544_v58, %v3652_v10  ;;  %v271_v58 = vrot.slane %v246_v14, 7  ;;  %v3729_v14 = vrot.slane %v1670_v62, %v3420_v17  ;;  %v3748_v62 = vcombine.low %v716_v19, %v717_v20 }
  0xb0   :  { %v556_v35 = vmul.bf16 %v546_v30, %v3516_v38  ;;  %v3756_v34 = vrot.slane %v305_v60, 6  ;;  %v283_v2 = vmul.bf16 %v269_v61, %v3489_v24 }
  0xb1   :  { %v321_v40 = vpop.permute.xlu1 %320  ;;  %v272_v1 = vsel %vm3700_vm12, %v270_v0, %v271_v58  ;;  %v1706_v48 = vshrl.u32 %v3729_v14, 16  ;;  %v1700_v0 = vshll.u32 %v3705_v52, 16 }
  0xb2   :  { %v309_v6 = vpop.permute.xlu0 %308  ;;  %v3707_v25 = vcombine.low %v555_v21, %v556_v35  ;;  %v3722_v21 = vld [vmem:[%s4587_s4 + $0xc] sm:$0xf]  ;;  %v1697_v35 = vshrl.u32 %v3705_v52, 16  ;;  %v329_v57 = vrot.slane %v321_v40, %v3420_v17  ;;  %v350_v61 = vrot.slane %v3756_v34, 4 }
  0xb3   :  { %v317_v12 = vrot.slane %v309_v6, %v3420_v17  ;;  %v1829_v6 = vshll.u32 %v3639_v45, 16  ;;  %v3093_v45 = vld [vmem:[%s4585_s2 + $0x48] sm:$0xff]   ;;  %v1220_v55 = vmul.bf16 %v1210_v7, %v3722_v21  ;;  %v284_v7 = vmul.bf16 %v272_v1, %v3503_v33 }
  0xb4   :  { %v4596_v30 = vrot.slane %v3707_v25, 3  ;;  %2989 = vmatprep.subr.bf16.mxu0 %v3093_v45  ;;  %v3776_v60 = vrot.slane %v1697_v35, 7  ;;  %v354_v45 = vrot.slane %v329_v57, 6  ;;  %v3095_v35 = vld [vmem:[%s4585_s2 + $0x50] sm:$0xff]   ;;  %v2828_v1 = vcombine.low %v282_v50, %v283_v2  ;;  %v3806_v57 = vld [vmem:[%s4586_s0] sm:$0xc] }
  0xb5   :  { %v3714_v22 = vpop.permute.xlu1 %1492  ;;  %v351_v19 = vrot.slane %v317_v12, 6  ;;  %2990 = vmatpush3.bf16.msra.mxu0 %v3094_v18  ;;  %v3096_v18 = vld [vmem:[%s4585_s2 + $0x10] sm:$0xff]   ;;  %4616 = vst [vmem:[#allocation5_spill] sm:$0xff] %v3806_v57 }
  0xb6   :  { %v250_v13 = vpop.permute.xlu0 %249  ;;  %v948_v54 = vsel %vm945_vm8, %v946_v15, %v4596_v30  ;;  %v273_v15 = vrot.slane %v271_v58, 4  ;;  %v1831_v58 = vrot.slane %v1829_v6, 1  ;;  %v3801_v30 = vcombine.low %v1219_v49, %v1220_v55  ;;  %2991 = vmatprep.subr.bf16.mxu0 %v3095_v35 }
  0xb7   :  { %v258_v39 = vrot.slane %v250_v13, %v3420_v17  ;;  %951 = vrot.lane.b32.xlu1 %v948_v54, %s3138_s25  ;;  %v3787_v13 = vsel %vm821_vm11, %v828_v16, %v3717_v31  ;;  %v353_v16 = vrot.slane %v351_v19, 4  ;;  %v352_v42 = vsel %vm3781_vm14, %v350_v61, %v351_v19 }
  0xb8   :  { %v1501_v3 = vrot.slane %v3714_v22, %v3420_v17  ;;  %v547_v49 = vrot.slane %v3652_v10, 4  ;;  %v1709_v55 = vshll.u32 %v3729_v14, 16  ;;  %v3099_v22 = vld [vmem:[%s4585_s2 + $0x18] sm:$0xff]   ;;  %v1702_v19 = vor.u32 %v1700_v0, %v3776_v60  ;;  %v3098_v0 = vld [vmem:[%s4588_s6 + $0x40] sm:$0xff]  }
  0xb9   :  { %v3768_v20 = vpop.permute.xlu1 %1516  ;;  %v3774_v44 = vrot.slane %v258_v39, 7  ;;  %2992 = vmatpush3.bf16.msra.mxu0 %v3096_v18  ;;  %v356_v61 = vrot.slane %v354_v45, 4  ;;  %v355_v10 = vsel %vm3781_vm14, %v353_v16, %v354_v45  ;;  %v366_v14 = vmul.bf16 %v352_v42, %v3489_v24  ;;  %3019 = vmatprep.subr.bf16.mxu1 %v3098_v0 }
  0xba   :  { %v3770_v40 = vpop.permute.xlu0 %1504  ;;  %v3842_v45 = vrot.slane %v1501_v3, 5  ;;  %v860_v42 = vrot.slane %v2828_v1, 1  ;;  %v367_v3 = vmul.bf16 %v355_v10, %v3503_v33  ;;  %v3871_v10 = vld [vmem:[%s4587_s4 + $0xc] sm:$0xf] }
  0xbb   :  { %v275_v52 = vsel %vm3700_vm12, %v273_v15, %v3774_v44  ;;  %v3808_v15 = vrot.slane %v1706_v48, 7  ;;  %v3097_v48 = vld [vmem:[%s4585_s2 + $0x58] sm:$0xff]   ;;  %v1513_v1 = vrot.slane %v3770_v40, %v3420_v17  ;;  %v1525_v40 = vrot.slane %v3768_v20, %v3420_v17 }
  0xbc   :  { %v285_v6 = vmul.bf16 %v275_v52, %v3516_v38  ;;  %2993 = vmatprep.subr.bf16.mxu0 %v3097_v48  ;;  %v985_v48 = vshll.u32 %v3740_v41, 16  ;;  %v1543_v20 = vrot.slane %v3842_v45, 4  ;;  %v4621_v12 = vrot.slane %v3774_v44, 4 }
  0xbd   :  { %v1231_v39 = vpop.permute.xlu1 %1230  ;;  %4617 = vst [vmem:[#allocation6_spill] sm:$0xff] %v3808_v15  ;;  %2994 = vmatpush3.bf16.msra.mxu0 %v3099_v22  ;;  %v3101_v22 = vld [vmem:[%s4585_s2 + $0x60] sm:$0xff]  }
  0xbe   :  { %v333_v54 = vpop.permute.xlu0 %332  ;;  %v3818_v2 = vcombine.low %v284_v7, %v285_v6  ;;  %v1239_v7 = vrot.slane %v1231_v39, %v3420_v17  ;;  %2995 = vmatprep.subr.bf16.mxu0 %v3101_v22  ;;  %v3908_v22 = vrot.slane %v985_v48, 1 }
  0xbf   :  { %v341_v52 = vrot.slane %v333_v54, %v3420_v17  ;;  %v3829_v54 = vor.u32 %v1831_v58, %v1827_v32  ;;  %v365_v32 = vmul.bf16 %v3756_v34, %v3806_v57  ;;  %v1711_v58 = vor.u32 %v1709_v55, %v3808_v15  ;;  %v3853_v34 = vld [vmem:[%s4586_s0 + $0x10] sm:$0x7]  ;;  %v3885_v57 = vld [vmem:[%s4587_s4] sm:$0x8] }
  0xc0   :  { %v4597_v36 = vrot.slane %v3818_v2, 1  ;;  %4618 = vst [vmem:[#allocation7_spill] sm:$0xff] %v3853_v34  ;;  %v3875_v0 = vrot.slane %v1239_v7, 7 }
  0xc1   :  { %v3827_v35 = vrot.slane %v341_v52, 6  ;;  %v1255_v18 = vpop.permute.xlu1 %1254  ;;  %v1834_v52 = vshll.u32 %v3801_v30, 16 }
  0xc2   :  { %v1243_v6 = vpop.permute.xlu0 %1242  ;;  %v1263_v7 = vrot.slane %v1255_v18, %v3420_v17  ;;  %v3107_v18 = vld [vmem:[%s4585_s2 + $0x28] sm:$0xff]  }
  0xc3   :  { %v358_v16 = vsel %vm3781_vm14, %v356_v61, %v3827_v35  ;;  %v1251_v39 = vrot.slane %v1243_v6, %v3420_v17  ;;  %v862_v61 = vsel %vm859_vm13, %v860_v42, %v4597_v36  ;;  %v3103_v6 = vld [vmem:[%s4585_s2 + $0x20] sm:$0xff]   ;;  %v2831_v36 = vcombine.low %v365_v32, %v366_v14 }
  0xc4   :  { %v368_v55 = vmul.bf16 %v358_v16, %v3516_v38  ;;  %865 = vrot.lane.b32.xlu1 %v862_v61, %s3139_s27  ;;  %v4619_v14 = vrot.slane %v3612_v26, 4  ;;  %v3899_v47 = vrot.slane %v1834_v52, 1  ;;  %2996 = vmatpush3.bf16.msra.mxu0 %v3103_v6  ;;  %v1281_v52 = vrot.slane %v3875_v0, 4 }
  0xc5   :  { %v1311_v42 = vpop.permute.xlu1 %1310  ;;  %v1282_v53 = vrot.slane %v1251_v39, 7  ;;  %2997 = vmatprep.subr.bf16.mxu0 %v3105_v46  ;;  %v1547_v39 = vrot.slane %v1525_v40, 5  ;;  %v4620_v46 = vrot.slane %v3776_v60, 4  ;;  %v1285_v40 = vrot.slane %v1263_v7, 7 }
  0xc6   :  { %v1529_v16 = vpop.permute.xlu0 %1528  ;;  %v1319_v61 = vrot.slane %v1311_v42, %v3420_v17  ;;  %v3890_v59 = vcombine.low %v367_v3, %v368_v55  ;;  %v3896_v32 = vsel %vm3466_vm4, %v4619_v14, %v1702_v19  ;;  %v3905_v3 = vmul.bf16 %v547_v49, %v3853_v34  ;;  %v3109_v19 = vld [vmem:[%s4585_s2 + $0x70] sm:$0xff]  }
  0xc7   :  { %v1544_v55 = vrot.slane %v1513_v1, 5  ;;  %v1537_v6 = vrot.slane %v1529_v16, %v3420_v17  ;;  %v883_v1 = vrot.slane %v2831_v36, 2  ;;  %v3923_v14 = vsel %vm3466_vm4, %v4620_v46, %v1711_v58 }
  0xc8   :  { %v4603_v26 = vrot.slane %v3890_v59, 2  ;;  %842 = vrot.lane.b32.xlu1 %v3787_v13, %s3138_s25  ;;  %v3925_v50 = vrot.slane %v1319_v61, 6  ;;  %v1222_v13 = vld [vmem:[%s4587_s4] sm:$0xe]  ;;  %v1283_v36 = vsel %vm3700_vm12, %v1281_v52, %v1282_v53  ;;  %v1284_v48 = vrot.slane %v1282_v53, 4  ;;  %2998 = vmatpush3.bf16.msra.mxu0 %v3107_v18 }
  0xc9   :  { %v1335_v49 = vpop.permute.xlu1 %1334  ;;  %v3940_v58 = vsel %vm3528_vm5, %v1543_v20, %v1544_v55  ;;  %2999 = vmatprep.subr.bf16.mxu0 %v3109_v19  ;;  %v1549_v53 = vrot.slane %v1547_v39, 4  ;;  %v3947_v18 = vrot.slane %v1537_v6, 5  ;;  %v1287_v34 = vrot.slane %v1285_v40, 4 }
  0xca   :  { %v1323_v42 = vpop.permute.xlu0 %1322  ;;  %v1343_v7 = vrot.slane %v1335_v49, %v3420_v17  ;;  %v885_v61 = vsel %vm882_vm15, %v883_v1, %v4603_v26  ;;  %v3113_v49 = vld [vmem:[%s4585_s2 + $0x78] sm:$0xff]   ;;  %v1297_v1 = vmul.bf16 %v1283_v36, %v3593_v9  ;;  %v1361_v26 = vrot.slane %v3925_v50, 4 }
  0xcb   :  { %v1331_v60 = vrot.slane %v1323_v42, %v3420_v17  ;;  %v1546_v42 = vrot.slane %v1544_v55, 4  ;;  %v1559_v55 = vmul.bf16 %v3940_v58, %v3593_v9  ;;  %v1286_v6 = vsel %vm3700_vm12, %v1284_v48, %v1285_v40  ;;  %v3115_v36 = vld [vmem:[%s4585_s2 + $0x38] sm:$0xff]  }
  0xcc   :  { %888 = vrot.lane.b32.xlu1 %v885_v61, %s3140_s21  ;;  %v1837_v61 = vsel %vm821_vm11, %v3829_v54, %v3899_v47  ;;  %3000 = vmatpush3.bf16.msra.mxu0 %v3111_v5  ;;  %v1296_v52 = vmul.bf16 %v3875_v0, %v1222_v13  ;;  %v1365_v15 = vrot.slane %v1343_v7, 6  ;;  %v359_v40 = vrot.slane %v3827_v35, 4  ;;  %v3983_v7 = vld [vmem:[%s4587_s4] sm:$0xc] }
  0xcd   :  { %v1362_v46 = vrot.slane %v1331_v60, 6  ;;  %v567_v16 = vpop.permute.xlu1 %566  ;;  %3001 = vmatprep.subr.bf16.mxu0 %v3113_v49  ;;  %v1548_v48 = vsel %vm3528_vm5, %v1546_v42, %v1547_v39  ;;  %v1551_v54 = vsel %vm3528_vm5, %v1549_v53, %v3947_v18  ;;  %vm905_vm4 = vsmask.f32 5376 }
  0xce   :  { %v1267_v20 = vpop.permute.xlu0 %1266  ;;  %v575_v5 = vrot.slane %v567_v16, %v3420_v17  ;;  %v2885_v39 = vcombine.low %v1296_v52, %v1297_v1  ;;  %v1560_v49 = vmul.bf16 %v1548_v48, %v3662_v23  ;;  %v1376_v52 = vmul.bf16 %v3925_v50, %v3983_v7 }
  0xcf   :  { %v1275_v19 = vrot.slane %v1267_v20, %v3420_v17  ;;  %v1364_v60 = vrot.slane %v1362_v46, 4  ;;  %v1363_v20 = vsel %vm3781_vm14, %v1361_v26, %v1362_v46  ;;  %v1298_v26 = vmul.bf16 %v1286_v6, %v3662_v23 }
  0xd0   :  { %1846 = vrot.lane.b32.xlu1 %v1837_v61, %s3138_s25  ;;  %v1377_v53 = vmul.bf16 %v1363_v20, %v3593_v9  ;;  %3002 = vmatpush3.bf16.msra.mxu0 %v3115_v36  ;;  %v1367_v6 = vrot.slane %v1365_v15, 4  ;;  %v612_v1 = vmul.bf16 %v575_v5, %v3489_v24  ;;  %v288_v24 = vld [vmem:[%s4586_s0 + $0x10] sm:$0x3]  ;;  %vm1031_vm5 = vcmask 523264  }
  0xd1   :  { %v3969_v58 = vrot.slane %v1275_v19, 7  ;;  %v1347_v0 = vpop.permute.xlu1 %1346  ;;  %v1366_v16 = vsel %vm3781_vm14, %v1364_v60, %v1365_v15  ;;  %v1561_v19 = vmul.bf16 %v1551_v54, %v3722_v21 }
  0xd2   :  { %v579_v13 = vpop.permute.xlu0 %578  ;;  %v1355_v43 = vrot.slane %v1347_v0, %v3420_v17  ;;  %v1378_v15 = vmul.bf16 %v1366_v16, %v3662_v23  ;;  %v1863_v0 = vrot.slane %v2885_v39, 1  ;;  %v4622_v39 = vshll.u32 %v3748_v62, 16 }
  0xd3   :  { %v1289_v35 = vsel %vm3700_vm12, %v1287_v34, %v3969_v58  ;;  %v587_v46 = vrot.slane %v579_v13, %v3420_v17  ;;  %v4001_v34 = vld [vmem:[%s4587_s4 + $0x10] sm:$0xf]  ;;  %v2827_v13 = vcombine.low %v3587_v8, %v3587_v8  ;;  %v4029_v16 = vcombine.low %v1560_v49, %v1561_v19 }
  0xd4   :  { %v1299_v42 = vmul.bf16 %v1289_v35, %v3722_v21  ;;  %v3996_v61 = vrot.slane %v1355_v43, 6  ;;  %v1722_v35 = vmul.bf16 %v3923_v14, %v4001_v34  ;;  %v286_v43 = vmul.bf16 %v4621_v12, %v3546_v51 }
  0xd5   :  { %v613_v60 = vmul.bf16 %v587_v46, %v3503_v33  ;;  %v1584_v36 = vpop.permute.xlu1 %1583  ;;  %v4027_v8 = vrot.slane %v4622_v39, 1  ;;  %v4624_v49 = vmul.bf16 %v3842_v45, %v3885_v57  ;;  %v1290_v39 = vrot.slane %v3969_v58, 4 }
  0xd6   :  { %v1572_v20 = vpop.permute.xlu0 %1571  ;;  %v4007_v48 = vcombine.low %v1298_v26, %v1299_v42  ;;  %v1369_v54 = vsel %vm3781_vm14, %v1367_v6, %v3996_v61  ;;  %v2888_v26 = vcombine.low %v1376_v52, %v1377_v53  ;;  %v4623_v53 = vshrl.u32 %v3740_v41, 16 }
  0xd7   :  { %v1379_v33 = vmul.bf16 %v1369_v54, %v3722_v21  ;;  %v2840_v50 = vcombine.low %v612_v1, %v613_v60  ;;  %v2894_v19 = vcombine.low %v4624_v49, %v1559_v55  ;;  %v369_v6 = vmul.bf16 %v359_v40, %v288_v24 }
  0xd8   :  { %v1864_v5 = vrot.slane %v4007_v48, 1  ;;  %v988_v51 = vor.u32 %v3908_v22, %v4623_v53  ;;  %v834_v52 = vshrl.u32 %v3614_v27, 16  ;;  %v838_v1 = vshll.u32 %v2827_v13, 16  ;;  %v1123_v22 = vld [vmem:[%s4587_s4 + $0x10] sm:$0x1] }
  0xd9   :  { %965 = vrot.lane.b32.xlu0 %v2840_v50, %s3139_s27  ;;  %v4032_v42 = vpop.permute.xlu1 %602  ;;  %v4042_v44 = vcombine.low %v1378_v15, %v1379_v33  ;;  %v4625_v60 = vmul.bf16 %v3675_v29, %v3671_v28  ;;  %v4626_v41 = vmul.bf16 %v3641_v56, %v3648_v63  ;;  %v1592_v57 = vrot.slane %v1584_v36, %v3420_v17  ;;  %v1563_v48 = vld [vmem:[%s4587_s4 + $0x10] sm:$0xf] }
  0xda   :  { %v4034_v46 = vpop.permute.xlu0 %590  ;;  %v1865_v14 = vsel %vm859_vm13, %v1863_v0, %v1864_v5  ;;  %v1580_v45 = vrot.slane %v1572_v20, %v3420_v17  ;;  %v1885_v55 = vrot.slane %v2888_v26, 2  ;;  %v993_v27 = vsel %vm821_vm11, %v988_v51, %v4027_v8 }
  0xdb   :  { %1868 = vrot.lane.b32.xlu1 %v1865_v14, %s3139_s27  ;;  %v2899_v54 = vcombine.low %v4626_v41, %v4625_v60  ;;  %v1886_v40 = vrot.slane %v4042_v44, 2  ;;  %v1947_v28 = vrot.slane %v4029_v16, 3  ;;  %v4627_v56 = vmul.bf16 %v3896_v32, %v3871_v10  ;;  %v3100_v44 = vld [vmem:[%s4588_s6] sm:$0xff]  }
  0xdc   :  { %v2830_v29 = vcombine.low %v286_v43, %v286_v43  ;;  %v836_v0 = vor.u32 %v834_v52, %v3717_v31  ;;  %v2839_v13 = vcombine.low %v3905_v3, %v3905_v3  ;;  %v4628_v10 = vrot.slane %v3650_v4, 4 }
  0xdd   :  { %v4067_v63 = vcombine.low %v4627_v56, %v1722_v35  ;;  %1002 = vrot.lane.b32.xlu0 %v993_v27, %s3140_s21  ;;  %v4070_v15 = vpop.permute.xlu1 %1607  ;;  %v1887_v20 = vsel %vm882_vm15, %v1885_v55, %v1886_v40  ;;  %v1946_v24 = vrot.slane %v2894_v19, 3  ;;  %v1985_v33 = vshll.u32 %v2899_v54, 16 }
  0xde   :  { %v4072_v36 = vpop.permute.xlu0 %1595  ;;  %v1221_v32 = vmul.bf16 %v4628_v10, %v1123_v22  ;;  %v2833_v50 = vcombine.low %v369_v6, %v369_v6  ;;  %v1618_v26 = vmul.bf16 %v1592_v57, %v3662_v23  ;;  %v1617_v35 = vmul.bf16 %v1580_v45, %v3593_v9  ;;  %v4096_v9 = vld [vmem:[%s4586_s0 + $0x14] sm:$0x1]  ;;  %v4109_v45 = vld [vmem:[%s4588_s6 + $0x80] sm:$0xff]  }
  0xdf   :  { %1890 = vrot.lane.b32.xlu1 %v1887_v20, %s3140_s21  ;;  %v840_v12 = vrot.slane %v838_v1, 1  ;;  %v708_v43 = vrot.slane %v3473_v11, 4  ;;  %v1948_v31 = vsel %vm945_vm8, %v1946_v24, %v1947_v28  ;;  %v1990_v3 = vshll.u32 %v4067_v63, 16  ;;  %3063 = vmatprep.subr.bf16.mxu0 %v4109_v45 }
  0xe0   :  { %v863_v4 = vrot.slane %v2830_v29, 1  ;;  %v1987_v49 = vrot.slane %v1985_v33, 1  ;;  %v949_v19 = vrot.slane %v2839_v13, 3  ;;  %v886_v58 = vrot.slane %v2833_v50, 2  ;;  %v1302_v13 = vld [vmem:[%s4587_s4 + $0x10] sm:$0x3] }
  0xe1   :  { %1951 = vrot.lane.b32.xlu0 %v1948_v31, %s3138_s25  ;;  %v740_v14 = vpop.permute.xlu1 %739  ;;  %v841_v23 = vsel %vm821_vm11, %v836_v0, %v840_v12  ;;  %v2897_v6 = vcombine.low %v1617_v35, %v1618_v26  ;;  %v2884_v52 = vcombine.low %v1221_v32, %v1221_v32  ;;  %v718_v60 = vmul.bf16 %v708_v43, %v4096_v9 }
  0xe2   :  { %v728_v53 = vpop.permute.xlu0 %727  ;;  %v748_v11 = vrot.slane %v740_v14, %v3420_v17  ;;  %v1983_v41 = vshrl.u32 %v2899_v54, 16  ;;  %v4104_v57 = vrot.slane %v1990_v3, 1  ;;  %v1300_v55 = vmul.bf16 %v1290_v39, %v1123_v22 }
  0xe3   :  { %v736_v51 = vrot.slane %v728_v53, %v3420_v17  ;;  %844 = vrot.lane.b32.xlu1 %v841_v23, %s3138_s25  ;;  %v1370_v27 = vrot.slane %v3996_v61, 4  ;;  %v611_v56 = vrot.slane %v4032_v42, %v3420_v17  ;;  %v4629_v0 = vrot.slane %v3818_v2, 1  ;;  %v558_v2 = vld [vmem:[%s4586_s0 + $0x10] sm:$0xf] }
  0xe4   :  { %v599_v22 = vrot.slane %v4034_v46, %v3420_v17  ;;  %v779_v10 = vrot.slane %v748_v11, 7  ;;  %v1988_v42 = vor.u32 %v1987_v49, %v1983_v41  ;;  %v1552_v32 = vrot.slane %v3947_v18, 4  ;;  %v4141_v18 = vld [vmem:[%s4587_s4 + $0x10] sm:$0x7] }
  0xe5   :  { %v4101_v1 = vrot.slane %v736_v51, 7  ;;  %1965 = vrot.lane.b32.xlu0 %v2897_v6, %s3139_s27  ;;  %v764_v29 = vpop.permute.xlu1 %763  ;;  %v864_v54 = vsel %vm859_vm13, %v4629_v0, %v863_v4  ;;  %v1838_v33 = vshrl.u32 %v3801_v30, 16  ;;  %v1842_v50 = vshll.u32 %v2884_v52, 16  ;;  %v4168_v0 = vld [vmem:[%s4587_s4 + $0x14] sm:$0x1] }
  0xe6   :  { %v752_v20 = vpop.permute.xlu0 %751  ;;  %v772_v61 = vrot.slane %v764_v29, %v3420_v17  ;;  %v1993_v35 = vsel %vm821_vm11, %v1988_v42, %v4104_v57  ;;  %v4630_v12 = vrot.slane %v3890_v59, 2  ;;  %v2887_v31 = vcombine.low %v1300_v55, %v1300_v55  ;;  %v719_v29 = vld [vmem:[%s4586_s0 + $0x4] sm:$0xe]  ;;  %v4635_v42 = vld [vmem:[#allocation4_spill] sm:$0xff] }
  0xe7   :  { %867 = vrot.lane.b32.xlu1 %v864_v54, %s3139_s27  ;;  %v760_v24 = vrot.slane %v752_v20, %v3420_v17  ;;  %v778_v46 = vrot.slane %v4101_v1, 4  ;;  %v1380_v3 = vmul.bf16 %v1370_v27, %v1302_v13  ;;  %v1840_v30 = vor.u32 %v1838_v33, %v3899_v47  ;;  %v4632_v27 = vld [vmem:[#allocation6_spill] sm:$0xff] }
  0xe8   :  { %v785_v26 = vrot.slane %v772_v61, 7  ;;  %v887_v43 = vsel %vm882_vm15, %v4630_v12, %v886_v58  ;;  %v615_v39 = vmul.bf16 %v611_v56, %v558_v2  ;;  %v614_v14 = vmul.bf16 %v599_v22, %v3516_v38  ;;  %v4633_v54 = vld [vmem:[#allocation2_spill] sm:$0xff] }
  0xe9   :  { %v782_v4 = vrot.slane %v760_v24, 7  ;;  %2002 = vrot.lane.b32.xlu0 %v1993_v35, %s3140_s21  ;;  %v781_v53 = vrot.slane %v779_v10, 4  ;;  %v2844_v59 = vcombine.low %v718_v60, %v718_v60  ;;  %v1844_v51 = vrot.slane %v1842_v50, 1 }
  0xea   :  { %v787_v23 = vrot.slane %v785_v26, 4  ;;  %v1562_v49 = vmul.bf16 %v1552_v32, %v4141_v18  ;;  %v780_v58 = vsel %vm3700_vm12, %v778_v46, %v779_v10  ;;  %v4631_v47 = vrot.slane %v3707_v25, 3  ;;  %v4634_v10 = vld [vmem:[#allocation3_spill] sm:$0xff] }
  0xeb   :  { %890 = vrot.lane.b32.xlu1 %v887_v43, %s3140_s21  ;;  %v784_v11 = vrot.slane %v782_v4, 4  ;;  %v783_v6 = vsel %vm3700_vm12, %v781_v53, %v782_v4  ;;  %v1866_v38 = vrot.slane %v2887_v31, 1  ;;  %v2890_v41 = vcombine.low %v1380_v3, %v1380_v3 }
  0xec   :  { %v950_v52 = vsel %vm945_vm8, %v4631_v47, %v949_v19  ;;  %v1845_v55 = vsel %vm821_vm11, %v1840_v30, %v1844_v51  ;;  %v1713_v56 = vrot.slane %v4632_v27, 4  ;;  %v2841_v25 = vcombine.low %v614_v14, %v615_v39  ;;  %v3106_v51 = vld [vmem:[%s4588_s6 + $0x50] sm:$0xff]  }
  0xed   :  { %v786_v60 = vsel %vm3700_vm12, %v784_v11, %v785_v26  ;;  %953 = vrot.lane.b32.xlu0 %v950_v52, %s3138_s25  ;;  %v994_v19 = vshrl.u32 %v3748_v62, 16  ;;  %v998_v20 = vshll.u32 %v2844_v59, 16  ;;  %v794_v13 = vmul.bf16 %v780_v58, %v4633_v54  ;;  %v3104_v11 = vld [vmem:[%s4588_s6 + $0x8] sm:$0xff]   ;;  %v3112_v52 = vld [vmem:[%s4588_s6 + $0x18] sm:$0xff]  }
  0xee   :  { %v797_v22 = vmul.bf16 %v787_v23, %v4096_v9  ;;  %v795_v61 = vmul.bf16 %v783_v6, %v4634_v10  ;;  %v796_v32 = vmul.bf16 %v786_v60, %v4635_v42  ;;  %v2896_v2 = vcombine.low %v1562_v49, %v1562_v49  ;;  %v391_v49 = vpop.permute.xlu1 %390  ;;  %v3110_v6 = vld [vmem:[%s4588_s6 + $0x58] sm:$0xff]   ;;  %v3117_v60 = vld [vmem:[%s4588_s6 + $0x68] sm:$0xff]  }
  0xef   :  { %1848 = vrot.lane.b32.xlu1 %v1845_v55, %s3138_s25  ;;  %v996_v24 = vor.u32 %v994_v19, %v4027_v8  ;;  %v1888_v33 = vrot.slane %v2890_v41, 2  ;;  %v793_v62 = vmul.bf16 %v4101_v1, %v719_v29  ;;  %v1867_v50 = vsel %vm859_vm13, %v1864_v5, %v1866_v38  ;;  %v3114_v38 = vld [vmem:[%s4588_s6 + $0x60] sm:$0xff]   ;;  %v379_v55 = vpop.permute.xlu0 %378  ;;  %v3119_v29 = vld [vmem:[%s4588_s6 + $0x70] sm:$0xff]   ;;  %v3121_v54 = vld [vmem:[%s4588_s6 + $0x78] sm:$0xff]  }
  0xf0   :  { %v2846_v46 = vcombine.low %v795_v61, %v796_v32  ;;  %v1723_v26 = vmul.bf16 %v1713_v56, %v4168_v0  ;;  %v1000_v9 = vrot.slane %v998_v20, 1  ;;  %v1616_v35 = vrot.slane %v4070_v15, %v3420_v17  ;;  %v3116_v41 = vld [vmem:[%s4588_s6 + $0x20] sm:$0xff]   ;;  %v3118_v56 = vld [vmem:[%s4588_s6 + $0x28] sm:$0xff]   ;;  %v3120_v20 = vld [vmem:[%s4588_s6 + $0x30] sm:$0xff]  }
  0xf1   :  { %967 = vrot.lane.b32.xlu0 %v2841_v25, %s3139_s27  ;;  %v1604_v8 = vrot.slane %v4072_v36, %v3420_v17  ;;  %v2845_v12 = vcombine.low %v793_v62, %v794_v13  ;;  %v2847_v1 = vcombine.low %v797_v22, %v797_v22  ;;  %v1949_v43 = vrot.slane %v2896_v2, 3  ;;  %v3122_v13 = vld [vmem:[%s4588_s6 + $0x38] sm:$0xff]  }
  0xf2   :  { %v1001_v5 = vsel %vm821_vm11, %v996_v24, %v1000_v9  ;;  %v1020_v31 = vrot.slane %v2846_v46, 1  ;;  %v1889_v3 = vsel %vm882_vm15, %v1886_v40, %v1888_v33  ;;  %v2901_v15 = vcombine.low %v1723_v26, %v1723_v26  ;;  %v415_v47 = vpop.permute.xlu1 %414 }
  0xf3   :  { %1870 = vrot.lane.b32.xlu1 %v1867_v50, %s3139_s27  ;;  %v1620_v36 = vmul.bf16 %v1616_v35, %v1563_v48  ;;  %v1619_v4 = vmul.bf16 %v1604_v8, %v3722_v21  ;;  %v1022_v30 = vrot.slane %v2847_v1, 1  ;;  %v1019_v39 = vrot.slane %v2845_v12, 1  ;;  %v3102_v21 = vld [vmem:[%s4588_s6 + $0x48] sm:$0xff]   ;;  %v403_v25 = vpop.permute.xlu0 %402 }
  0xf4   :  { %v1950_v14 = vsel %vm945_vm8, %v1947_v28, %v1949_v43  ;;  %v1994_v40 = vshrl.u32 %v4067_v63, 16  ;;  %v1998_v59 = vshll.u32 %v2901_v15, 16  ;;  %v411_v32 = vrot.slane %v403_v25, %v3420_v17 }
  0xf5   :  { %1004 = vrot.lane.b32.xlu0 %v1001_v5, %s3140_s21  ;;  %v1021_v53 = vsel %vm859_vm13, %v1019_v39, %v1020_v31  ;;  %v1023_v16 = vsel %vm859_vm13, %v1020_v31, %v1022_v30  ;;  %v2898_v28 = vcombine.low %v1619_v4, %v1620_v36  ;;  %v387_v2 = vrot.slane %v379_v55, %v3420_v17 }
  0xf6   :  { %3059 = vmatprep.mubr.msk.bf16.mxu1 %vm1024_vm0, %v1021_v53  ;;  %v1996_v23 = vor.u32 %v1994_v40, %v4104_v57  ;;  %v2000_v63 = vrot.slane %v1998_v59, 1  ;;  %v3108_v57 = vld [vmem:[%s4588_s6 + $0x10] sm:$0xff]   ;;  %v1402_v27 = vpop.permute.xlu1 %1401  ;;  %v399_v62 = vrot.slane %v391_v49, %v3420_v17  ;;  %v447_v50 = vshrl.u32 %v411_v32, 16 }
  0xf7   :  { %1892 = vrot.lane.b32.xlu1 %v1889_v3, %s3140_s21  ;;  %3060 = vmatmul.mubr.msk.bf16.vlgmr.msra.gmra.mrb[0].mxu1 %vm1024_vm0, %v1023_v16  ;;  %v1390_v22 = vpop.permute.xlu0 %1389  ;;  %v450_v46 = vshll.u32 %v411_v32, 16  ;;  %v428_v26 = vshrl.u32 %v387_v2, 16  ;;  %v431_v9 = vshll.u32 %v387_v2, 16  ;;  %v423_v35 = vrot.slane %v415_v47, %v3420_v17  ;;  %v3128_v2 = vld [vmem:[%s4586_s0 + $0xc] sm:$0xf] }
  0xf8   :  { %3020 = vmatpush3.bf16.msra.mxu1 %v3100_v44  ;;  %v2001_v58 = vsel %vm821_vm11, %v1996_v23, %v2000_v63  ;;  %v437_v8 = vshrl.u32 %v399_v62, 16  ;;  %v440_v12 = vshll.u32 %v399_v62, 16  ;;  %v449_v48 = vrot.slane %v447_v50, 5 }
  0xf9   :  { %1953 = vrot.lane.b32.xlu0 %v1950_v14, %s3138_s25  ;;  %3021 = vmatprep.subr.bf16.mxu1 %v3102_v21  ;;  %v452_v5 = vrot.slane %v450_v46, 6  ;;  %v430_v31 = vrot.slane %v428_v26, 5  ;;  %v433_v3 = vrot.slane %v431_v9, 6  ;;  %v457_v15 = vshrl.u32 %v423_v35, 16  ;;  %v3129_v9 = vld [vmem:[%s4586_s0 + $0x4] sm:$0xf] }
  0xfa   :  { %v1426_v19 = vpop.permute.xlu1 %1425  ;;  %v460_v36 = vshll.u32 %v423_v35, 16  ;;  %v439_v4 = vrot.slane %v437_v8, 5  ;;  %v442_v30 = vrot.slane %v440_v12, 6  ;;  %v1398_v16 = vrot.slane %v1390_v22, %v3420_v17  ;;  %v3130_v8 = vld [vmem:[%s4586_s0 + $0x8] sm:$0xf] }
  0xfb   :  { %v1414_v61 = vpop.permute.xlu0 %1413  ;;  %v453_v39 = vor.u32 %v452_v5, %v449_v48  ;;  %v434_v53 = vor.u32 %v433_v3, %v430_v31  ;;  %v459_v59 = vrot.slane %v457_v15, 5  ;;  %v1410_v23 = vrot.slane %v1402_v27, %v3420_v17 }
  0xfc   :  { %3022 = vmatpush3.bf16.msra.mxu1 %v3104_v11  ;;  %v1422_v14 = vrot.slane %v1414_v61, %v3420_v17  ;;  %v462_v21 = vrot.slane %v460_v36, 6  ;;  %v1436_v47 = vshrl.u32 %v1398_v16, 16  ;;  %v4638_v36 = vld [vmem:[#allocation5_spill] sm:$0xff]  ;;  %vm2774_vm8 = vcmask 257024  }
  0xfd   :  { %1967 = vrot.lane.b32.xlu0 %v2898_v28, %s3139_s27  ;;  %3023 = vmatprep.subr.bf16.mxu1 %v3106_v51  ;;  %v443_v28 = vor.u32 %v442_v30, %v439_v4  ;;  %v455_v11 = vrot.slane %v453_v39, 4  ;;  %v435_v49 = vrot.slane %v434_v53, 4  ;;  %v471_v4 = vmul.bf16 %v434_v53, %v4638_v36 }
  0xfe   :  { %v4254_v10 = vpop.permute.xlu1 %61  ;;  %v1455_v63 = vshrl.u32 %v1422_v14, 16  ;;  %v1458_v51 = vshll.u32 %v1422_v14, 16 }
  0xff   :  { %v4260_v24 = vpop.permute.xlu0 %49 }
 0x100   :  { %3024 = vmatpush3.bf16.msra.mxu1 %v3108_v57  ;;  %v1460_v25 = vrot.slane %v1458_v51, 6  ;;  %v58_v53 = vrot.slane %v4260_v24, %v3420_v17  ;;  %v4333_v24 = vld [vmem:[%s4587_s4 + $0xc] sm:$0xf]  ;;  %v4345_v57 = vld [vmem:[%s4587_s4 + $0x8] sm:$0xf] }
 0x101   :  { %2004 = vrot.lane.b32.xlu0 %v2001_v58, %s3140_s21  ;;  %3025 = vmatprep.subr.bf16.mxu1 %v3110_v6  ;;  %v4283_v6 = vor.u32 %v462_v21, %v459_v59 }
 0x102   :  { %v4256_v42 = vpop.permute.xlu1 %1081 }
 0x103   :  { %v4266_v1 = vpop.permute.xlu0 %1069  ;;  %v464_v27 = vsel %vm4279_vm3, %v455_v11, %v4283_v6 }
 0x104   :  { %3026 = vmatpush3.bf16.msra.mxu1 %v3112_v52  ;;  %v1439_v52 = vshll.u32 %v1398_v16, 16  ;;  %v474_v62 = vmul.bf16 %v3128_v2, %v464_v27 }
 0x105   :  { %3027 = vmatprep.subr.bf16.mxu1 %v3114_v38  ;;  %v1434_v38 = vrot.slane %v1426_v19, %v3420_v17  ;;  %v1438_v19 = vrot.slane %v1436_v47, 5 }
 0x106   :  { %v4262_v33 = vpop.permute.xlu1 %85  ;;  %v1441_v22 = vrot.slane %v1439_v52, 6  ;;  %v40_v52 = vld [vmem:[%s4586_s0 + $0x4] sm:$0xf] }
 0x107   :  { %v4271_v44 = vpop.permute.xlu0 %73  ;;  %v1465_v61 = vshrl.u32 %v1434_v38, 16  ;;  %v1468_v32 = vshll.u32 %v1434_v38, 16  ;;  %v39_v38 = vld [vmem:[%s4586_s0] sm:$0xf] }
 0x108   :  { %3028 = vmatpush3.bf16.msra.mxu1 %v3116_v41  ;;  %v445_v41 = vrot.slane %v443_v28, 4  ;;  %v1442_v5 = vor.u32 %v1441_v22, %v1438_v19  ;;  %v4339_v19 = vld [vmem:[%s4587_s4 + $0x4] sm:$0xf] }
 0x109   :  { %3029 = vmatprep.subr.bf16.mxu1 %v3117_v60  ;;  %v1445_v60 = vshrl.u32 %v1410_v23, 16  ;;  %v1467_v31 = vrot.slane %v1465_v61, 5  ;;  %v1470_v3 = vrot.slane %v1468_v32, 6 }
 0x10a   :  { %v4268_v43 = vpop.permute.xlu1 %1744  ;;  %v1443_v21 = vrot.slane %v1442_v5, 4 }
 0x10b   :  { %v4286_v55 = vpop.permute.xlu0 %1732  ;;  %v1447_v50 = vrot.slane %v1445_v60, 5  ;;  %v4309_v16 = vor.u32 %v1470_v3, %v1467_v31 }
 0x10c   :  { %3030 = vmatpush3.bf16.msra.mxu1 %v3118_v56  ;;  %v1448_v56 = vshll.u32 %v1410_v23, 16 }
 0x10d   :  { %3031 = vmatprep.subr.bf16.mxu1 %v3119_v29  ;;  %v1457_v29 = vrot.slane %v1455_v63, 5 }
 0x10e   :  { %v4273_v40 = vpop.permute.xlu1 %1105  ;;  %v1450_v46 = vrot.slane %v1448_v56, 6 }
 0x10f   :  { %v1461_v26 = vor.u32 %v1460_v25, %v1457_v29  ;;  %v4306_v48 = vpop.permute.xlu0 %1756 }
 0x110   :  { %3032 = vmatpush3.bf16.msra.mxu1 %v3120_v20  ;;  %v444_v20 = vsel %vm4279_vm3, %v435_v49, %v443_v28  ;;  %v70_v49 = vrot.slane %v4254_v10, %v3420_v17 }
 0x111   :  { %3033 = vmatprep.subr.bf16.mxu1 %v3121_v54  ;;  %v454_v54 = vsel %vm4279_vm3, %v445_v41, %v453_v39  ;;  %v472_v35 = vmul.bf16 %v3129_v9, %v444_v20  ;;  %v1451_v39 = vor.u32 %v1450_v46, %v1447_v50  ;;  %v1463_v14 = vrot.slane %v1461_v26, 4 }
 0x112   :  { %v473_v12 = vmul.bf16 %v3130_v8, %v454_v54  ;;  %v96_v20 = vmul.bf16 %v70_v49, %v40_v52  ;;  %v95_v54 = vmul.bf16 %v58_v53, %v39_v38  ;;  %v1479_v46 = vmul.bf16 %v1442_v5, %v3983_v7  ;;  %v3124_v52 = vld [vmem:[%s4588_s6 + $0x88] sm:$0xff]   ;;  %v1060_v38 = vld [vmem:[%s4587_s4 + $0x4] sm:$0xf] }
 0x113   :  { %v2834_v59 = vcombine.low %v471_v4, %v472_v35  ;;  %v4311_v28 = vpop.permute.xlu0 %1093  ;;  %v1453_v63 = vrot.slane %v1451_v39, 4  ;;  %v1472_v51 = vsel %vm4279_vm3, %v1463_v14, %v4309_v16  ;;  %v1452_v27 = vsel %vm4279_vm3, %v1443_v21, %v1451_v39 }
 0x114   :  { %3034 = vmatpush3.bf16.msra.mxu1 %v3122_v13  ;;  %v2835_v30 = vcombine.low %v473_v12, %v474_v62  ;;  %v1482_v56 = vmul.bf16 %v4333_v24, %v1472_v51  ;;  %v1480_v22 = vmul.bf16 %v4339_v19, %v1452_v27  ;;  %v465_v35 = vrot.slane %v4283_v6, 4 }
 0x115   :  { %v907_v41 = vshrl.u32 %v2834_v59, 16  ;;  %v910_v60 = vshll.u32 %v2834_v59, 16  ;;  %v1462_v10 = vsel %vm4279_vm3, %v1453_v63, %v1461_v26  ;;  %v2823_v12 = vcombine.low %v95_v54, %v96_v20  ;;  %v4639_v59 = vld [vmem:[#allocation7_spill] sm:$0xff] }
 0x116   :  { %v915_v23 = vshrl.u32 %v2835_v30, 16  ;;  %v918_v11 = vshll.u32 %v2835_v30, 16  ;;  %v1481_v61 = vmul.bf16 %v4345_v57, %v1462_v10  ;;  %v2891_v8 = vcombine.low %v1479_v46, %v1480_v22 }
 0x117   :  { %v1769_v32 = vpop.permute.xlu0 %1768  ;;  %v909_v2 = vrot.slane %v907_v41, 2  ;;  %v912_v62 = vrot.slane %v910_v60, 3  ;;  %v1741_v14 = vrot.slane %v4286_v55, %v3420_v17  ;;  %v475_v21 = vmul.bf16 %v465_v35, %v4639_v59 }
 0x118   :  { %v917_v29 = vrot.slane %v915_v23, 2  ;;  %v920_v25 = vrot.slane %v918_v11, 3  ;;  %v2892_v26 = vcombine.low %v1481_v61, %v1482_v56  ;;  %v1908_v63 = vshrl.u32 %v2891_v8, 16 }
 0x119   :  { %v913_v31 = vor.u32 %v912_v62, %v909_v2  ;;  %v1911_v51 = vshll.u32 %v2891_v8, 16  ;;  %v1090_v49 = vrot.slane %v4256_v42, %v3420_v17  ;;  %v1059_v42 = vld [vmem:[%s4587_s4] sm:$0xf]  ;;  %v1753_v27 = vrot.slane %v4268_v43, %v3420_v17 }
 0x11a   :  { %v4351_v9 = vor.u32 %v920_v25, %v917_v29  ;;  %v1916_v39 = vshrl.u32 %v2892_v26, 16  ;;  %v1919_v5 = vshll.u32 %v2892_v26, 16  ;;  %v4386_v10 = vrot.slane %v1741_v14, 7 }
 0x11b   :  { %v1777_v56 = vrot.slane %v1769_v32, %v3420_v17  ;;  %v1910_v29 = vrot.slane %v1908_v63, 2  ;;  %v1913_v25 = vrot.slane %v1911_v51, 3  ;;  %v1116_v54 = vmul.bf16 %v1090_v49, %v1060_v38 }
 0x11c   :  { %v922_v4 = vsel %vm905_vm4, %v913_v31, %v4351_v9  ;;  %v1918_v60 = vrot.slane %v1916_v39, 2  ;;  %v2836_v43 = vcombine.low %v475_v21, %v475_v21  ;;  %v1784_v32 = vrot.slane %v1753_v27, 7 }
 0x11d   :  { %v1783_v62 = vrot.slane %v4386_v10, 4  ;;  %v1790_v46 = vrot.slane %v1777_v56, 7  ;;  %v1914_v26 = vor.u32 %v1913_v25, %v1910_v29  ;;  %v1473_v35 = vrot.slane %v4309_v16, 4 }
 0x11e   :  { %v1786_v39 = vrot.slane %v1784_v32, 4  ;;  %v82_v63 = vrot.slane %v4271_v44, %v3420_v17  ;;  %v2949_v29 = vcombine.low %v4345_v57, %v4333_v24 }
 0x129   :  { %v4277_v58 = vpop.permute.xlu1 %951 }
 0x12a   :  { %v1045_v6 = vsel %vm1024_vm0, %v922_v4, %v4277_v58  ;;  %v927_v4 = vshll.u32 %v2836_v43, 16 }
 0x136   :  { %v4295_v13 = vpop.permute.xlu1 %865 }
 0x13a   :  { %v843_v15 = vpop.permute.xlu1 %842 }
 0x13b   :  { %v1027_v30 = vsel %vm1024_vm0, %v2823_v12, %v843_v15  ;;  %v1078_v15 = vrot.slane %v4266_v1, %v3420_v17  ;;  %v1765_v1 = vrot.slane %v4306_v48, %v3420_v17 }
 0x13c   :  { %v1033_v58 = vsel %vm1031_vm5, %v1027_v30, %v4295_v13  ;;  %v1921_v13 = vrot.slane %v1919_v5, 3  ;;  %v94_v30 = vrot.slane %v4262_v33, %v3420_v17  ;;  %v42_v33 = vld [vmem:[%s4586_s0 + $0xc] sm:$0xf] }
 0x13d   :  { %v1115_v48 = vmul.bf16 %v1078_v15, %v1059_v42  ;;  %v1787_v61 = vrot.slane %v1765_v1, 7  ;;  %v1724_v15 = vld [vmem:[%s4587_s4 + $0x4] sm:$0xe]  ;;  %v2948_v1 = vcombine.low %v3983_v7, %v4339_v19 }
 0x13e   :  { %v889_v47 = vpop.permute.xlu1 %888  ;;  %v4397_v2 = vor.u32 %v1921_v13, %v1918_v60  ;;  %v1798_v13 = vmul.bf16 %v4386_v10, %v1724_v15  ;;  %v2950_v10 = vcombine.low %v4141_v18, %v4141_v18 }
 0x13f   :  { %v1038_v41 = vsel %vm1036_vm6, %v1033_v58, %v889_v47  ;;  %v4395_v47 = vld [vmem:[%s4589_s8] sm:$0xff]   ;;  %v2880_v8 = vcombine.low %v1115_v48, %v1116_v54  ;;  %v1789_v12 = vrot.slane %v1787_v61, 4  ;;  %v2591_v7 = vshrl.u32 %v2948_v1, 16 }
 0x140   :  { %v1923_v31 = vsel %vm905_vm4, %v1914_v26, %v4397_v2  ;;  %v2594_v19 = vshll.u32 %v2948_v1, 16 }
 0x141   :  { %v1791_v16 = vsel %vm3700_vm12, %v1789_v12, %v1790_v46 }
 0x142   :  { %v4348_v50 = vpop.permute.xlu1 %1846  ;;  %v1801_v42 = vmul.bf16 %v1791_v16, %v4001_v34  ;;  %v1792_v34 = vrot.slane %v1790_v46, 4 }
 0x143   :  { %v2026_v59 = vsel %vm1024_vm0, %v2880_v8, %v4348_v50  ;;  %v41_v50 = vld [vmem:[%s4586_s0 + $0x8] sm:$0xf] }
 0x144   :  { %v97_v37 = vmul.bf16 %v82_v63, %v41_v50  ;;  %v1802_v26 = vmul.bf16 %v1792_v34, %v4168_v0  ;;  %v2593_v0 = vrot.slane %v2591_v7, 2 }
 0x146   :  { %v2904_v16 = vcombine.low %v1802_v26, %v1802_v26 }
 0x14b   :  { %v966_v3 = vpop.permute.xlu0 %965 }
 0x14c   :  { %v1050_v23 = vsel %vm1031_vm5, %v1045_v6, %v966_v3  ;;  %v924_v3 = vshrl.u32 %v2836_v43, 16  ;;  %v1785_v6 = vsel %vm3700_vm12, %v1783_v62, %v1784_v32  ;;  %v2599_v32 = vshrl.u32 %v2949_v29, 16 }
 0x14d   :  { %v4354_v36 = vpop.permute.xlu1 %1868  ;;  %v2602_v62 = vshll.u32 %v2949_v29, 16 }
 0x14e   :  { %v2031_v51 = vsel %vm1031_vm5, %v2026_v59, %v4354_v36  ;;  %v926_v44 = vrot.slane %v924_v3, 2  ;;  %v3134_v36 = vld [vmem:[%s4587_s4 + $0x8] sm:$0xf] }
 0x14f   :  { %v1003_v11 = vpop.permute.xlu0 %1002  ;;  %v1799_v38 = vmul.bf16 %v3134_v36, %v1785_v6  ;;  %v2604_v6 = vrot.slane %v2602_v62, 3 }
 0x150   :  { %v1054_v53 = vsel %vm1036_vm6, %v1050_v23, %v1003_v11  ;;  %v1483_v11 = vmul.bf16 %v1473_v35, %v4141_v18  ;;  %v1102_v35 = vrot.slane %v4311_v28, %v3420_v17 }
 0x151   :  { %v1891_v55 = vpop.permute.xlu1 %1890  ;;  %2245 = vmatprep.mubr.bf16.mxu0 %v1054_v53  ;;  %v1788_v53 = vsel %vm3700_vm12, %v1786_v39, %v1787_v61  ;;  %v2902_v54 = vcombine.low %v1798_v13, %v1799_v38 }
 0x152   :  { %2246 = vmatmul.mubr.bf16.vlgmr.msra.gmra.mrb[0].mxu0 %v1038_v41  ;;  %v2035_v58 = vsel %vm1036_vm6, %v2031_v51, %v1891_v55  ;;  %v98_v41 = vmul.bf16 %v94_v30, %v42_v33  ;;  %v3135_v55 = vld [vmem:[%s4587_s4 + $0xc] sm:$0xf]  ;;  %v2893_v25 = vcombine.low %v1483_v11, %v1483_v11  ;;  %v2596_v30 = vrot.slane %v2594_v19, 3 }
 0x153   :  { %v1952_v20 = vpop.permute.xlu0 %1951  ;;  %3064 = vmatpush3.bf16.msra.mxu0 %v4109_v45  ;;  %v1800_v27 = vmul.bf16 %v3135_v55, %v1788_v53  ;;  %v2019_v46 = vrot.slane %v2902_v54, 1  ;;  %v2608_v11 = vshrl.u32 %v2950_v10, 16  ;;  %v2611_v33 = vshll.u32 %v2950_v10, 16  ;;  %v1062_v51 = vld [vmem:[%s4587_s4 + $0xc] sm:$0xf] }
 0x154   :  { %3065 = vmatprep.subr.bf16.mxu0 %v3124_v52  ;;  %v2042_v5 = vsel %vm1024_vm0, %v1923_v31, %v1952_v20  ;;  %v2824_v61 = vcombine.low %v97_v37, %v98_v41  ;;  %v1925_v24 = vshrl.u32 %v2893_v25, 16  ;;  %v1928_v57 = vshll.u32 %v2893_v25, 16 }
 0x155   :  { %v4390_v22 = vpop.permute.xlu1 %844  ;;  %v2903_v48 = vcombine.low %v1800_v27, %v1801_v42  ;;  %v2597_v50 = vor.u32 %v2596_v30, %v2593_v0  ;;  %v2613_v36 = vrot.slane %v2611_v33, 3 }
 0x156   :  { %v1030_v18 = vsel %vm1024_vm0, %v2824_v61, %v4390_v22  ;;  %v1927_v59 = vrot.slane %v1925_v24, 2  ;;  %v1061_v22 = vld [vmem:[%s4587_s4 + $0x8] sm:$0xf] }
 0x157   :  { %v1966_v45 = vpop.permute.xlu0 %1965  ;;  %3066 = vmatpush3.bf16.msra.mxu0 %v3124_v52  ;;  %v929_v52 = vrot.slane %v927_v4, 3  ;;  %v2020_v31 = vrot.slane %v2903_v48, 1  ;;  %v1117_v53 = vmul.bf16 %v1102_v35, %v1061_v22 }
 0x158   :  { %3071 = vmatprep.subr.bf16.mxu0 %v4395_v47  ;;  %v2047_v21 = vsel %vm1031_vm5, %v2042_v5, %v1966_v45  ;;  %v2601_v5 = vrot.slane %v2599_v32, 2 }
 0x159   :  { %v868_v14 = vpop.permute.xlu1 %867  ;;  %v930_v20 = vor.u32 %v929_v52, %v926_v44  ;;  %v2610_v52 = vrot.slane %v2608_v11, 2 }
 0x15a   :  { %v2605_v15 = vor.u32 %v2604_v6, %v2601_v5 }
 0x15b   :  { %v2003_v23 = vpop.permute.xlu0 %2002  ;;  %v931_v45 = vsel %vm905_vm4, %v4351_v9, %v930_v20  ;;  %v1035_v9 = vsel %vm1031_vm5, %v1030_v18, %v868_v14  ;;  %v1114_v14 = vrot.slane %v4273_v40, %v3420_v17  ;;  %v3126_v17 = vld [vmem:[%s4589_s8 + $0x8] sm:$0xff]   ;;  %v2614_v29 = vor.u32 %v2613_v36, %v2610_v52 }
 0x15c   :  { %v2051_v49 = vsel %vm1036_vm6, %v2047_v21, %v2003_v23  ;;  %v1930_v21 = vrot.slane %v1928_v57, 3  ;;  %v2021_v23 = vsel %vm859_vm13, %v2019_v46, %v2020_v31  ;;  %v2606_v40 = vsel %vm905_vm4, %v2597_v50, %v2605_v15 }
 0x15d   :  { %2500 = vmatprep.mubr.bf16.mxu1 %v2051_v49  ;;  %v891_v56 = vpop.permute.xlu1 %890  ;;  %v1118_v38 = vmul.bf16 %v1114_v14, %v1062_v51  ;;  %v2615_v20 = vsel %vm905_vm4, %v2605_v15, %v2614_v29 }
 0x15e   :  { %2501 = vmatmul.mubr.bf16.vlgmr.msra.gmra.mrb[4].mxu1 %v2035_v58  ;;  %v1041_v28 = vsel %vm1036_vm6, %v1035_v9, %v891_v56  ;;  %v2022_v58 = vrot.slane %v2904_v16, 1  ;;  %v1931_v44 = vor.u32 %v1930_v21, %v1927_v59  ;;  %v2926_v59 = vld [vmem:[%s4592_s7] ss:$0 sm:$0xff] }
 0x15f   :  { %v954_v60 = vpop.permute.xlu0 %953  ;;  %v2881_v1 = vcombine.low %v1117_v53, %v1118_v38 }
 0x160   :  { %v1048_v8 = vsel %vm1024_vm0, %v931_v45, %v954_v60  ;;  %v1932_v41 = vsel %vm905_vm4, %v4397_v2, %v1931_v44  ;;  %v2023_v60 = vsel %vm859_vm13, %v2020_v31, %v2022_v58 }
 0x161   :  { %v1849_v12 = vpop.permute.xlu1 %1848 }
 0x162   :  { %v2029_v55 = vsel %vm1024_vm0, %v2881_v1, %v1849_v12 }
 0x163   :  { %v968_v43 = vpop.permute.xlu0 %967 }
 0x164   :  { %v1052_v3 = vsel %vm1031_vm5, %v1048_v8, %v968_v43  ;;  %v2905_v43 = vld [vmem:[%s4590_s3] ss:$0 sm:$0xff] }
 0x165   :  { %v1871_v49 = vpop.permute.xlu1 %1870 }
 0x166   :  { %v2033_v25 = vsel %vm1031_vm5, %v2029_v55, %v1871_v49 }
 0x167   :  { %v1005_v4 = vpop.permute.xlu0 %1004 }
 0x168   :  { %v1057_v39 = vsel %vm1036_vm6, %v1052_v3, %v1005_v4 }
 0x169   :  { %2253 = vmatprep.mubr.bf16.mxu0 %v1057_v39  ;;  %v1893_v37 = vpop.permute.xlu1 %1892 }
 0x16a   :  { %2254 = vmatmul.mubr.bf16.gmra.mrb[4].mxu0 %v1041_v28  ;;  %v2038_v34 = vsel %vm1036_vm6, %v2033_v25, %v1893_v37 }
 0x16b   :  { %v1954_v63 = vpop.permute.xlu0 %1953  ;;  %3067 = vmatprep.mubr.msk.bf16.mxu0 %vm1024_vm0, %v2021_v23 }
 0x16c   :  { %v2045_v13 = vsel %vm1024_vm0, %v1932_v41, %v1954_v63 }
 0x16f   :  { %v1968_v42 = vpop.permute.xlu0 %1967 }
 0x170   :  { %v2049_v27 = vsel %vm1031_vm5, %v2045_v13, %v1968_v42 }
 0x172   :  { %3068 = vmatmul.mubr.msk.bf16.vlgmr.msra.gmra.mrb[8].mxu0 %vm1024_vm0, %v2023_v60 }
 0x173   :  { %v2005_v56 = vpop.permute.xlu0 %2004  ;;  %3072 = vmatpush3.bf16.msra.mxu0 %v4395_v47  ;;  %3075 = vmatprep.mubr.msk.bf16.mxu0 %vm1024_vm0, %v2606_v40  ;;  %v2947_v40 = vld [vmem:[%s4594_s9] ss:$0 sm:$0xff] }
 0x174   :  { %v2054_v2 = vsel %vm1036_vm6, %v2049_v27, %v2005_v56  ;;  %3073 = vmatprep.subr.bf16.mxu0 %v3126_v17 }
 0x175   :  { %2508 = vmatprep.mubr.bf16.mxu1 %v2054_v2 }
 0x176   :  { %2509 = vmatmul.mubr.bf16.gmra.mrb[8].mxu1 %v2038_v34 }
 0x177   :  { %3074 = vmatpush3.bf16.msra.mxu0 %v3126_v17 }
 0x17a   :  { %3076 = vmatmul.mubr.msk.bf16.vlgmr.msra.gmra.mrb[12].mxu0 %vm1024_vm0, %v2615_v20 }
 0x1ca   :  { %v3061_v54 = vpop.f32.mrb[0].mxu1 }
 0x1cb   :  { %v2296_v48 = vpop.f32.mrb[1].mxu1 }
 0x1cc   :  { %v3062_v47 = vpop.f32.mrb[2].mxu1 }
 0x1cd   :  { %v2299_v7 = vpop.f32.mrb[3].mxu1 }
 0x225   :  { %v3003_v19 = vpop.f32.mrb[0].mxu0 }
 0x226   :  { %v3004_v10 = vpop.f32.mrb[1].mxu0 }
 0x227   :  { %v3005_v61 = vadd.f32 %v3004_v10, %v3003_v19  ;;  %v3006_v32 = vpop.f32.mrb[2].mxu0 }
 0x228   :  { %v3007_v62 = vpop.f32.mrb[3].mxu0 }
 0x229   :  { %v2248_v26 = vadd.f32 %v3005_v61, %v2905_v43  ;;  %v3008_v45 = vadd.f32 %v3007_v62, %v3006_v32 }
 0x22b   :  { %v2251_v24 = vadd.f32 %v3008_v45, %v2905_v43  ;;  %v2297_v57 = vadd.f32 %v2296_v48, %v2248_v26 }
 0x22d   :  { %v2975_v46 = vpack.c.bf16 %v2297_v57, %v2297_v57  ;;  %v2300_v35 = vadd.f32 %v2299_v7, %v2251_v24 }
 0x22f   :  { %2704 = vrot.lane.b32.xlu0 %v2975_v46, %s3141_s17  ;;  %2700 = vst.msk [vmem:[%s4591_s10] sm:$0xf] %vm2699_vm7, %v2975_v46  ;;  %v2976_v8 = vpack.c.bf16 %v2300_v35, %v2300_v35 }
 0x231   :  { %v3035_v12 = vpop.f32.mrb[4].mxu1  ;;  %2706 = vrot.lane.b32.xlu1 %v2976_v8, %s3141_s17  ;;  %2701 = vst.msk [vmem:[%s4591_s10 + $0x4] sm:$0xf] %vm2699_vm7, %v2976_v8 }
 0x232   :  { %v3036_v31 = vpop.f32.mrb[5].mxu1 }
 0x233   :  { %v3037_v18 = vadd.f32 %v3036_v31, %v3035_v12  ;;  %v3038_v3 = vpop.f32.mrb[6].mxu1 }
 0x234   :  { %v3039_v4 = vpop.f32.mrb[7].mxu1 }
 0x235   :  { %v3040_v0 = vadd.f32 %v3039_v4, %v3038_v3  ;;  %v2503_v14 = vadd.f32 %v3037_v18, %v2926_v59 }
 0x237   :  { %v2506_v15 = vadd.f32 %v3040_v0, %v2926_v59 }
 0x23d   :  { %v3009_v30 = vpop.f32.mrb[4].mxu0 }
 0x23e   :  { %v3010_v9 = vpop.f32.mrb[5].mxu0 }
 0x23f   :  { %v3011_v39 = vadd.f32 %v3010_v9, %v3009_v30  ;;  %v3012_v5 = vpop.f32.mrb[6].mxu0 }
 0x240   :  { %v3013_v6 = vpop.f32.mrb[7].mxu0 }
 0x241   :  { %v2256_v16 = vadd.f32 %v3011_v39, %v2905_v43  ;;  %v3014_v28 = vadd.f32 %v3013_v6, %v3012_v5 }
 0x243   :  { %v2305_v21 = vadd.f32 %v3061_v54, %v2256_v16  ;;  %v2259_v22 = vadd.f32 %v3014_v28, %v2905_v43 }
 0x245   :  { %v2977_v23 = vpack.c.bf16 %v2305_v21, %v2305_v21  ;;  %v2308_v11 = vadd.f32 %v3062_v47, %v2259_v22  ;;  %v3069_v33 = vpop.f32.mrb[8].mxu0 }
 0x246   :  { %v2551_v63 = vpop.f32.mrb[9].mxu0 }
 0x247   :  { %2702 = vst.msk [vmem:[%s4591_s10 + $0x8] sm:$0xf] %vm2699_vm7, %v2977_v23  ;;  %v2978_v51 = vpack.c.bf16 %v2308_v11, %v2308_v11  ;;  %v2552_v49 = vadd.f32 %v2551_v63, %v2503_v14  ;;  %v3070_v50 = vpop.f32.mrb[10].mxu0  ;;  %2708 = vrot.lane.b32.xlu0 %v2977_v23, %s3141_s17 }
 0x248   :  { %v2554_v53 = vpop.f32.mrb[11].mxu0 }
 0x249   :  { %2703 = vst.msk [vmem:[%s4591_s10 + $0xc] sm:$0xf] %vm2699_vm7, %v2978_v51  ;;  %v2979_v58 = vpack.c.bf16 %v2552_v49, %v2552_v49  ;;  %v2555_v44 = vadd.f32 %v2554_v53, %v2506_v15  ;;  %v3041_v52 = vpop.f32.mrb[8].mxu1  ;;  %2710 = vrot.lane.b32.xlu1 %v2978_v51, %s3141_s17 }
 0x24a   :  { %v3042_v36 = vpop.f32.mrb[9].mxu1 }
 0x24b   :  { %2737 = vst.msk [vmem:[%s4593_s11] sm:$0xf] %vm2699_vm7, %v2979_v58  ;;  %v2980_v38 = vpack.c.bf16 %v2555_v44, %v2555_v44  ;;  %v3043_v42 = vadd.f32 %v3042_v36, %v3041_v52  ;;  %v3044_v17 = vpop.f32.mrb[10].mxu1  ;;  %2741 = vrot.lane.b32.xlu0 %v2979_v58, %s3141_s17 }
 0x24c   :  { %v3045_v1 = vpop.f32.mrb[11].mxu1 }
 0x24d   :  { %2738 = vst.msk [vmem:[%s4593_s11 + $0x4] sm:$0xf] %vm2699_vm7, %v2980_v38  ;;  %v2511_v41 = vadd.f32 %v3043_v42, %v2926_v59  ;;  %v3046_v60 = vadd.f32 %v3045_v1, %v3044_v17  ;;  %2743 = vrot.lane.b32.xlu1 %v2980_v38, %s3141_s17  ;;  %v3077_v37 = vpop.f32.mrb[12].mxu0 }
 0x24e   :  { %v2677_v13 = vadd.f32 %v3077_v37, %v2947_v40  ;;  %v2668_v55 = vpop.f32.mrb[13].mxu0 }
 0x24f   :  { %v2560_v27 = vadd.f32 %v3069_v33, %v2511_v41  ;;  %v2514_v56 = vadd.f32 %v3046_v60, %v2926_v59  ;;  %v2669_v29 = vadd.f32 %v2947_v40, %v2668_v55  ;;  %v3078_v25 = vpop.f32.mrb[14].mxu0 }
 0x250   :  { %v2985_v2 = vpack.c.bf16 %v2677_v13, %v2677_v13  ;;  %v2680_v34 = vadd.f32 %v3078_v25, %v2947_v40  ;;  %v2671_v20 = vpop.f32.mrb[15].mxu0 }
 0x251   :  { %v2981_v54 = vpack.c.bf16 %v2560_v27, %v2560_v27  ;;  %v2563_v48 = vadd.f32 %v3070_v50, %v2514_v56  ;;  %v2983_v47 = vpack.c.bf16 %v2669_v29, %v2669_v29  ;;  %v2672_v7 = vadd.f32 %v2947_v40, %v2671_v20 }
 0x252   :  { %2777 = vst.msk [vmem:[%s4595_s12 + $0x8] sm:$0xf] %vm2774_vm8, %v2985_v2  ;;  %v2986_v19 = vpack.c.bf16 %v2680_v34, %v2680_v34 }
 0x253   :  { %2739 = vst.msk [vmem:[%s4593_s11 + $0x8] sm:$0xf] %vm2699_vm7, %v2981_v54  ;;  %v2982_v43 = vpack.c.bf16 %v2563_v48, %v2563_v48  ;;  %2745 = vrot.lane.b32.xlu0 %v2981_v54, %s3141_s17  ;;  %v2984_v10 = vpack.c.bf16 %v2672_v7, %v2672_v7 }
 0x254   :  { %2775 = vst.msk [vmem:[%s4595_s12] sm:$0xf] %vm2774_vm8, %v2983_v47  ;;  %2778 = vst.msk [vmem:[%s4595_s12 + $0xc] sm:$0xf] %vm2774_vm8, %v2986_v19 }
 0x255   :  { %2740 = vst.msk [vmem:[%s4593_s11 + $0xc] sm:$0xf] %vm2699_vm7, %v2982_v43  ;;  %2747 = vrot.lane.b32.xlu1 %v2982_v43, %s3141_s17 }
 0x256   :  { %2776 = vst.msk [vmem:[%s4595_s12 + $0x4] sm:$0xf] %vm2774_vm8, %v2984_v10 }
 0x2a1   :  { %v2705_v61 = vpop.permute.xlu0 %2704 }
 0x2a2   :  { %2959 = vst.msk [vmem:[%s4591_s10 + $0x10] sm:$0xf] %vm2699_vm7, %v2705_v61 }
 0x2a3   :  { %v2707_v32 = vpop.permute.xlu1 %2706 }
 0x2a4   :  { %2960 = vst.msk [vmem:[%s4591_s10 + $0x14] sm:$0xf] %vm2699_vm7, %v2707_v32 }
 0x2b9   :  { %v2709_v62 = vpop.permute.xlu0 %2708 }
 0x2ba   :  { %2961 = vst.msk [vmem:[%s4591_s10 + $0x18] sm:$0xf] %vm2699_vm7, %v2709_v62 }
 0x2bb   :  { %v2711_v26 = vpop.permute.xlu1 %2710 }
 0x2bc   :  { %2962 = vst.msk [vmem:[%s4591_s10 + $0x1c] sm:$0xf] %vm2699_vm7, %v2711_v26 }
 0x2bd   :  { %v2742_v45 = vpop.permute.xlu0 %2741 }
 0x2be   :  { %2967 = vst.msk [vmem:[%s4593_s11 + $0x10] sm:$0xf] %vm2699_vm7, %v2742_v45 }
 0x2bf   :  { %v2744_v24 = vpop.permute.xlu1 %2743 }
 0x2c0   :  { %2968 = vst.msk [vmem:[%s4593_s11 + $0x14] sm:$0xf] %vm2699_vm7, %v2744_v24 }
 0x2c5   :  { %v2746_v57 = vpop.permute.xlu0 %2745 }
 0x2c6   :  { %2969 = vst.msk [vmem:[%s4593_s11 + $0x18] sm:$0xf] %vm2699_vm7, %v2746_v57 }
 0x2c7   :  { %v2748_v46 = vpop.permute.xlu1 %2747 }
 0x2c8   :  { %2970 = vst.msk [vmem:[%s4593_s11 + $0x1c] sm:$0xf] %vm2699_vm7, %v2748_v46 }

</bundles_post_ra>
